<compile_context>
chip_gen: v7x
topology: tpu7x:2x2x1
jax: 0.10.0
libtpu: 0.0.40
codegen_flags: <defaults>
</compile_context>

<pallas_src>
import functools

import jax
import jax.numpy as jnp
from jax import lax
from jax.experimental import pallas as pl
from jax.experimental.pallas import tpu as pltpu

BN_EPS = 1e-5
LANE = 128
CHUNK_ROWS = 256          # target M rows per in-kernel matmul chunk


def _round_up(x, m):
    return (x + m - 1) // m * m


def _vmem_limit_bytes():
    """Generation-aware scoped-VMEM limit (~3/4 of physical: ~96 MiB v5e/v6e, ~48 MiB v7x)."""
    try:
        cap = getattr(pltpu.get_tpu_info(), "vmem_capacity_bytes", None)
    except Exception:
        cap = None
    if not cap:
        cap = 64 * 1024 * 1024          # conservative fallback (v7x physical size)
    return int(min(cap * 3 // 4, 100 * 1024 * 1024))


def _pick_h_block(H, Wp, Cin, Cout, Cpad, itemsize, vmem_limit):
    """Largest divisor of H whose per-step working set stays well under the VMEM limit."""
    budget = vmem_limit // 6
    best = 1
    for hb in range(1, H + 1):
        if H % hb:
            continue
        rows = hb * Wp
        rblk = _round_up((hb + 2) * Wp + 2, 8)
        need = (2 * rblk * max(Cin, LANE) * itemsize        # x block (dbl-buffered, lane-padded)
                + min(rows, CHUNK_ROWS + Wp) * Cpad * 4     # f32 matmul chunk result
                + 2 * rows * max(Cout, LANE) * itemsize)    # y out block (dbl-buffered, lane-padded)
        if need <= budget:
            best = hb
    return best


def _pick_row_tile(Mp, Cout, in_itemsize, budget_bytes=4 * 1024 * 1024):
    """Row tile for the elementwise pass from a VMEM byte budget (lane-padded, dbl-buffered)."""
    bytes_per_row = max(Cout, LANE) * (2 * in_itemsize + 2 * 4)
    tm = (budget_bytes // bytes_per_row) // 8 * 8
    return int(max(8, min(_round_up(Mp, 8), tm)))


def _conv_stats_kernel(x_ref, w_ref, y_ref, s_ref, *, W, HB, chunk_h):
    """One (image, H-row-block) per grid step.

    x_ref: (1, 1, Rblk_pad, Cin)  zero-padded input rows (padded-width grid, +2-row halo)
    w_ref: (9*Cin, Cpad)          conv taps, Cout zero-padded to the 128-lane MXU width
    y_ref: (1, 1, HB*Wp, Cout)    conv output (padded-width row grid, true-Cout lanes)
    s_ref: (1, 1, 2, Cpad)        row 0: masked sum(y), row 1: masked sum(y*y)
    """
    Wp = W + 2
    Cpad = s_ref.shape[-1]
    Cout = y_ref.shape[-1]
    offsets = [kh * Wp + kw for kh in range(3) for kw in range(3)]

    sum_y = jnp.zeros((1, Cpad), jnp.float32)
    sum_y2 = jnp.zeros((1, Cpad), jnp.float32)

    c0 = 0
    while c0 < HB:                       # static chunking of the M (row) dimension
        ch = min(chunk_h, HB - c0)
        r0, rows = c0 * Wp, ch * Wp
        # in-kernel im2col: one K = 9*Cin matmul instead of nine K = Cin matmuls
        cols = jnp.concatenate(
            [x_ref[0, 0, r0 + off:r0 + off + rows, :] for off in offsets], axis=1)
        acc = jnp.dot(cols, w_ref[...], preferred_element_type=jnp.float32)

        # mask the 2 padded-width garbage columns out of the BN statistics
        rid = lax.broadcasted_iota(jnp.int32, (rows, 1), 0)
        m = (rid % Wp < W).astype(jnp.float32)
        am = acc * m
        sum_y = sum_y + jnp.sum(am, axis=0, keepdims=True)
        sum_y2 = sum_y2 + jnp.sum(am * acc, axis=0, keepdims=True)

        y_ref[0, 0, r0:r0 + rows, :] = acc[:, :Cout].astype(y_ref.dtype)
        c0 += ch

    s_ref[0, 0] = jnp.concatenate([sum_y, sum_y2], axis=0)


def _bn_mish_kernel(y_ref, scale_ref, shift_ref, o_ref):
    """Row-tiled fused BN affine + Mish (single-exp formulation)."""
    z = y_ref[...].astype(jnp.float32) * scale_ref[...] + shift_ref[...]
    # mish(z) = z*tanh(softplus(z)); tanh(log1p(e^z)) = (e^2z + 2 e^z)/(e^2z + 2 e^z + 2)
    e = jnp.exp(jnp.minimum(z, 20.0))                 # PyTorch softplus threshold
    num = e * (e + 2.0)
    t = num / (num + 2.0)
    t = jnp.where(z > 20.0, 1.0, t)                   # tanh(z) == 1.0 in f32 for z > 20
    o_ref[...] = (z * t).astype(o_ref.dtype)


def conv_block_forward(x_nchw, weight, bias, gamma, beta,
                       compute_dtype=jnp.bfloat16, h_block=None):
    """x_nchw: [N, Cin, H, W]; weight: [Cout, Cin, 3, 3]; bias/gamma/beta: [Cout].

    `bias` is accepted for API parity but unused: a per-channel constant added before
    training-mode BatchNorm is exactly cancelled by the batch-mean subtraction.
    # TODO(synk): if reused with eval-mode (running-stat) BatchNorm, add the bias back.
    """
    del bias
    N, Cin, H, W = x_nchw.shape
    Cout, _, KH, KW = weight.shape
    assert (KH, KW) == (3, 3)

    Wp = W + 2
    K9 = 9 * Cin
    Cpad = _round_up(Cout, LANE)        # MXU N-width only; HBM tensors stay Cout wide
    Mtot = N * H * W                    # true BN population size
    itemsize = jnp.dtype(compute_dtype).itemsize
    vmem_limit = _vmem_limit_bytes()

    if h_block is None:
        HB = _pick_h_block(H, Wp, Cin, Cout, Cpad, itemsize, vmem_limit)
    else:
        assert H % h_block == 0
        HB = h_block
    nHB = H // HB
    HWb = HB * Wp                       # conv-output rows per block (padded-width grid)
    Rblk = (HB + 2) * Wp + 2            # input rows a block reads (2 halo rows + kw slack)
    Rblk_pad = _round_up(Rblk, 8)
    chunk_h = max(1, min(HB, CHUNK_ROWS // Wp))

    # ---- glue: NCHW -> NHWC, pad, flatten rows, gather per-block row windows (+halo) ----
    x_nhwc = jnp.transpose(x_nchw, (0, 2, 3, 1)).astype(compute_dtype)
    xp = jnp.pad(x_nhwc, ((0, 0), (1, 1), (1, 1), (0, 0)))
    x_rows = xp.reshape(N, (H + 2) * Wp, Cin)
    rows_needed = (H - HB) * Wp + Rblk_pad
    x_rows = jnp.pad(x_rows, ((0, 0), (0, rows_needed - (H + 2) * Wp), (0, 0)))
    x_blk = jnp.stack(
        [x_rows[:, hb * HB * Wp: hb * HB * Wp + Rblk_pad, :] for hb in range(nHB)],
        axis=1)                          # (N, nHB, Rblk_pad, Cin)

    # weight [Cout, Cin, 3, 3] -> [9*Cin, Cpad]  (single big-K matmul operand)
    w_k9 = jnp.transpose(weight, (2, 3, 1, 0)).reshape(K9, Cout)
    w_k9 = jnp.pad(w_k9.astype(jnp.float32), ((0, 0), (0, Cpad - Cout))).astype(compute_dtype)

    # ---- kernel 1: conv (one K=9*Cin matmul per chunk) + BN partial sums ----
    conv_cost = pl.CostEstimate(
        flops=int(2 * N * H * Wp * K9 * Cpad),
        transcendentals=0,
        bytes_accessed=int(N * nHB * Rblk_pad * Cin * itemsize + K9 * Cpad * itemsize
                           + N * H * Wp * Cout * itemsize + N * nHB * 2 * Cpad * 4))
    y_blk, stats = pl.pallas_call(
        functools.partial(_conv_stats_kernel, W=W, HB=HB, chunk_h=chunk_h),
        out_shape=(jax.ShapeDtypeStruct((N, nHB, HWb, Cout), compute_dtype),
                   jax.ShapeDtypeStruct((N, nHB, 2, Cpad), jnp.float32)),
        grid_spec=pltpu.PrefetchScalarGridSpec(
            num_scalar_prefetch=0,
            grid=(N, nHB),
            in_specs=[
                pl.BlockSpec((1, 1, Rblk_pad, Cin), lambda n, h: (n, h, 0, 0)),
                pl.BlockSpec((K9, Cpad), lambda n, h: (0, 0)),
            ],
            out_specs=[
                pl.BlockSpec((1, 1, HWb, Cout), lambda n, h: (n, h, 0, 0)),
                pl.BlockSpec((1, 1, 2, Cpad), lambda n, h: (n, h, 0, 0)),
            ]),
        compiler_params=pltpu.CompilerParams(
            dimension_semantics=("parallel", "parallel"),
            vmem_limit_bytes=vmem_limit),
        cost_estimate=conv_cost,
    )(x_blk, w_k9)

    # ---- BN batch statistics -> fused per-channel scale / shift (O(Cout), in XLA) ----
    # TODO(synk): E[y^2]-E[y]^2 in f32 can cancel for very large N*H*W; switch to a
    # per-block mean-shifted (Welford-style) combine if that regime matters.
    sum_y = jnp.sum(stats[:, :, 0, :Cout], axis=(0, 1))
    sum_y2 = jnp.sum(stats[:, :, 1, :Cout], axis=(0, 1))
    mean = sum_y / Mtot
    var = jnp.maximum(sum_y2 / Mtot - mean * mean, 0.0)   # biased var, clamp cancellation
    inv_std = lax.rsqrt(var + BN_EPS)
    g = gamma.astype(jnp.float32)
    scale = (g * inv_std).reshape(1, Cout)
    shift = (beta.astype(jnp.float32) - mean * g * inv_std).reshape(1, Cout)

    # ---- kernel 2: fused BN affine + Mish, row-tiled over all conv rows ----
    Mp = N * nHB * HWb                  # = N * H * Wp
    y_flat = y_blk.reshape(Mp, Cout)
    tm = _pick_row_tile(Mp, Cout, itemsize)
    mish_cost = pl.CostEstimate(
        flops=int(8 * Mp * Cout), transcendentals=int(Mp * Cout),
        bytes_accessed=int(Mp * Cout * (itemsize + 4) + 8 * Cout))
    out_flat = pl.pallas_call(
        _bn_mish_kernel,
        out_shape=jax.ShapeDtypeStruct((Mp, Cout), jnp.float32),
        grid_spec=pltpu.PrefetchScalarGridSpec(
            num_scalar_prefetch=0,
            grid=(pl.cdiv(Mp, tm),),
            in_specs=[
                pl.BlockSpec((tm, Cout), lambda i: (i, 0)),
                pl.BlockSpec((1, Cout), lambda i: (0, 0)),
                pl.BlockSpec((1, Cout), lambda i: (0, 0)),
            ],
            out_specs=pl.BlockSpec((tm, Cout), lambda i: (i, 0))),
        compiler_params=pltpu.CompilerParams(
            dimension_semantics=("parallel",),
            vmem_limit_bytes=vmem_limit),
        cost_estimate=mish_cost,
    )(y_flat, scale, shift)

    # glue: drop the 2 padded-width columns, back to NCHW (small, Cout-wide tensor)
    # TODO(synk): fold this crop (+ NCHW transpose) into kernel 2's out_specs.
    out = out_flat.reshape(N, H, Wp, Cout)[:, :, :W, :]
    return jnp.transpose(out, (0, 3, 1, 2))


def reference_forward(x_nchw, weight, bias, gamma, beta):
    """Pure-JAX reference matching PyTorch semantics (training-mode BN)."""
    y = lax.conv_general_dilated(
        x_nchw.astype(jnp.float32), weight.astype(jnp.float32),
        window_strides=(1, 1), padding=((1, 1), (1, 1)),
        dimension_numbers=("NCHW", "OIHW", "NCHW"))
    y = y + bias.reshape(1, -1, 1, 1)
    mean = jnp.mean(y, axis=(0, 2, 3), keepdims=True)
    var = jnp.mean((y - mean) ** 2, axis=(0, 2, 3), keepdims=True)
    yn = (y - mean) * lax.rsqrt(var + BN_EPS)
    yn = yn * gamma.reshape(1, -1, 1, 1) + beta.reshape(1, -1, 1, 1)
    return yn * jnp.tanh(jax.nn.softplus(yn))


if __name__ == "__main__":
    key = jax.random.PRNGKey(0)
    k_x, k_w, k_b = jax.random.split(key, 3)

    N, Cin, Cout, H, W = 2, 4, 8, 16, 16

    x = jax.random.normal(k_x, (N, Cin, H, W), dtype=jnp.float32)
    # Deterministic synthetic parameters (shapes from nn.Conv2d / nn.BatchNorm2d init).
    fan_in = Cin * 3 * 3
    bound = 1.0 / (fan_in ** 0.5)
    weight = jax.random.uniform(k_w, (Cout, Cin, 3, 3), jnp.float32, -bound, bound)
    bias = jax.random.uniform(k_b, (Cout,), jnp.float32, -bound, bound)
    gamma = jnp.ones((Cout,), jnp.float32)   # BatchNorm2d weight init
    beta = jnp.zeros((Cout,), jnp.float32)   # BatchNorm2d bias init

    ref = jax.block_until_ready(reference_forward(x, weight, bias, gamma, beta))

    # Default perf path: bf16 MXU operands + bf16 conv->BN intermediate (per review).
    # bf16 rounding bounds the error vs the f32 reference at ~1e-2 max / ~2e-3 mean.
    out = jax.block_until_ready(conv_block_forward(x, weight, bias, gamma, beta))
    assert out.shape == (N, Cout, H, W)
    err = jnp.abs(out - ref)
    assert float(jnp.max(err)) < 3e-2, "bf16 path: max error vs reference too large"
    assert float(jnp.mean(err)) < 5e-3, "bf16 path: mean error vs reference too large"

    # f32 validation path (exact kernel math) with forced H-tiling to exercise the
    # halo'd row-block gather.
    out32 = jax.block_until_ready(
        conv_block_forward(x, weight, bias, gamma, beta,
                           compute_dtype=jnp.float32, h_block=8))
    assert float(jnp.max(jnp.abs(out32 - ref))) < 2e-4, "f32 path: mismatch vs reference"

    print("KERNEL_OK")
</pallas_src>

<mosaic_0001>
module attributes {stable_mosaic.version = 11 : i64} {
  func.func @_conv_stats_kernel(%arg0: i32, %arg1: i32, %arg2: memref<1x1x328x4xbf16, #tpu.memory_space<vmem>>, %arg3: memref<36x128xbf16, #tpu.memory_space<vmem>>, %arg4: memref<1x1x288x8xbf16, #tpu.memory_space<vmem>>, %arg5: memref<1x1x2x128xf32, #tpu.memory_space<vmem>>) attributes {dimension_semantics = [#tpu.dimension_semantics<parallel>, #tpu.dimension_semantics<parallel>], iteration_bounds = array<i64: 2, 1>, scalar_prefetch = 0 : i64, scratch_operands = 0 : i64, tpu.core_type = #tpu.core_type<tc>, window_params = [{transform_indices = @transform_0, window_bounds = array<i64: 1, 1, 328, 4>}, {pipeline_mode = #tpu.pipeline_mode<synchronous>, transform_indices = @transform_1, window_bounds = array<i64: 36, 128>}, {transform_indices = @transform_2, window_bounds = array<i64: 1, 1, 288, 8>}, {transform_indices = @transform_3, window_bounds = array<i64: 1, 1, 2, 128>}]} {
    %cst = arith.constant 0.000000e+00 : f32
    %0 = vector.broadcast %cst : f32 to vector<1x128xf32>
    %cst_0 = arith.constant 0.000000e+00 : f32
    %1 = vector.broadcast %cst_0 : f32 to vector<1x128xf32>
    %c0 = arith.constant 0 : index
    %c0_1 = arith.constant 0 : index
    %c0_2 = arith.constant 0 : index
    %c0_3 = arith.constant 0 : index
    %2 = vector.load %arg2[%c0, %c0_1, %c0_2, %c0_3] : memref<1x1x328x4xbf16, #tpu.memory_space<vmem>>, vector<1x1x252x4xbf16>
    %3 = vector.shape_cast %2 : vector<1x1x252x4xbf16> to vector<252x4xbf16>
    %c0_4 = arith.constant 0 : index
    %c0_5 = arith.constant 0 : index
    %c1 = arith.constant 1 : index
    %c0_6 = arith.constant 0 : index
    %4 = vector.load %arg2[%c0_4, %c0_5, %c1, %c0_6] : memref<1x1x328x4xbf16, #tpu.memory_space<vmem>>, vector<1x1x252x4xbf16>
    %5 = vector.shape_cast %4 : vector<1x1x252x4xbf16> to vector<252x4xbf16>
    %c0_7 = arith.constant 0 : index
    %c0_8 = arith.constant 0 : index
    %c2 = arith.constant 2 : index
    %c0_9 = arith.constant 0 : index
    %6 = vector.load %arg2[%c0_7, %c0_8, %c2, %c0_9] : memref<1x1x328x4xbf16, #tpu.memory_space<vmem>>, vector<1x1x252x4xbf16>
    %7 = vector.shape_cast %6 : vector<1x1x252x4xbf16> to vector<252x4xbf16>
    %c0_10 = arith.constant 0 : index
    %c0_11 = arith.constant 0 : index
    %c18 = arith.constant 18 : index
    %c0_12 = arith.constant 0 : index
    %8 = vector.load %arg2[%c0_10, %c0_11, %c18, %c0_12] : memref<1x1x328x4xbf16, #tpu.memory_space<vmem>>, vector<1x1x252x4xbf16>
    %9 = vector.shape_cast %8 : vector<1x1x252x4xbf16> to vector<252x4xbf16>
    %c0_13 = arith.constant 0 : index
    %c0_14 = arith.constant 0 : index
    %c19 = arith.constant 19 : index
    %c0_15 = arith.constant 0 : index
    %10 = vector.load %arg2[%c0_13, %c0_14, %c19, %c0_15] : memref<1x1x328x4xbf16, #tpu.memory_space<vmem>>, vector<1x1x252x4xbf16>
    %11 = vector.shape_cast %10 : vector<1x1x252x4xbf16> to vector<252x4xbf16>
    %c0_16 = arith.constant 0 : index
    %c0_17 = arith.constant 0 : index
    %c20 = arith.constant 20 : index
    %c0_18 = arith.constant 0 : index
    %12 = vector.load %arg2[%c0_16, %c0_17, %c20, %c0_18] : memref<1x1x328x4xbf16, #tpu.memory_space<vmem>>, vector<1x1x252x4xbf16>
    %13 = vector.shape_cast %12 : vector<1x1x252x4xbf16> to vector<252x4xbf16>
    %c0_19 = arith.constant 0 : index
    %c0_20 = arith.constant 0 : index
    %c36 = arith.constant 36 : index
    %c0_21 = arith.constant 0 : index
    %14 = vector.load %arg2[%c0_19, %c0_20, %c36, %c0_21] : memref<1x1x328x4xbf16, #tpu.memory_space<vmem>>, vector<1x1x252x4xbf16>
    %15 = vector.shape_cast %14 : vector<1x1x252x4xbf16> to vector<252x4xbf16>
    %c0_22 = arith.constant 0 : index
    %c0_23 = arith.constant 0 : index
    %c37 = arith.constant 37 : index
    %c0_24 = arith.constant 0 : index
    %16 = vector.load %arg2[%c0_22, %c0_23, %c37, %c0_24] : memref<1x1x328x4xbf16, #tpu.memory_space<vmem>>, vector<1x1x252x4xbf16>
    %17 = vector.shape_cast %16 : vector<1x1x252x4xbf16> to vector<252x4xbf16>
    %c0_25 = arith.constant 0 : index
    %c0_26 = arith.constant 0 : index
    %c38 = arith.constant 38 : index
    %c0_27 = arith.constant 0 : index
    %18 = vector.load %arg2[%c0_25, %c0_26, %c38, %c0_27] : memref<1x1x328x4xbf16, #tpu.memory_space<vmem>>, vector<1x1x252x4xbf16>
    %19 = vector.shape_cast %18 : vector<1x1x252x4xbf16> to vector<252x4xbf16>
    %20 = tpu.concatenate %3, %5, %7, %9, %11, %13, %15, %17, %19 in 1 : vector<252x4xbf16>, vector<252x4xbf16>, vector<252x4xbf16>, vector<252x4xbf16>, vector<252x4xbf16>, vector<252x4xbf16>, vector<252x4xbf16>, vector<252x4xbf16>, vector<252x4xbf16> -> vector<252x36xbf16>
    %c0_28 = arith.constant 0 : index
    %c0_29 = arith.constant 0 : index
    %21 = vector.load %arg3[%c0_28, %c0_29] : memref<36x128xbf16, #tpu.memory_space<vmem>>, vector<36x128xbf16>
    %cst_30 = arith.constant dense<0.000000e+00> : vector<252x128xf32>
    %22 = tpu.matmul %20, %21, %cst_30 {dimension_numbers = #tpu.dot_dimension_numbers<[1], [0], [0], [1], [0, 0, 1, 1], [], []>} : vector<252x36xbf16>, vector<36x128xbf16>, vector<252x128xf32> -> vector<252x128xf32>
    %23 = tpu.iota {dimensions = array<i32: 0>} : vector<252x1xi32>
    %c18_i32 = arith.constant 18 : i32
    %c0_i32 = arith.constant 0 : i32
    %24 = arith.cmpi eq, %c18_i32, %c0_i32 : i32
    %c1_i32 = arith.constant 1 : i32
    %25 = arith.select %24, %c1_i32, %c18_i32 : i32
    %26 = vector.broadcast %25 : i32 to vector<252x1xi32>
    %27 = arith.remsi %23, %26 : vector<252x1xi32>
    %c0_i32_31 = arith.constant 0 : i32
    %28 = vector.broadcast %c0_i32_31 : i32 to vector<252x1xi32>
    %29 = arith.cmpi ne, %27, %28 : vector<252x1xi32>
    %c0_i32_32 = arith.constant 0 : i32
    %30 = vector.broadcast %c0_i32_32 : i32 to vector<252x1xi32>
    %31 = arith.cmpi slt, %27, %30 : vector<252x1xi32>
    %c0_i32_33 = arith.constant 0 : i32
    %32 = arith.cmpi slt, %25, %c0_i32_33 : i32
    %33 = vector.broadcast %32 : i1 to vector<252x1xi1>
    %34 = vector.broadcast %33 : vector<252x1xi1> to vector<252x1xi1>
    %35 = arith.xori %31, %34 : vector<252x1xi1>
    %36 = arith.andi %35, %29 : vector<252x1xi1>
    %37 = vector.broadcast %25 : i32 to vector<252x1xi32>
    %38 = arith.addi %27, %37 : vector<252x1xi32>
    %39 = arith.select %36, %38, %27 : vector<252x1xi1>, vector<252x1xi32>
    %c16_i32 = arith.constant 16 : i32
    %40 = vector.broadcast %c16_i32 : i32 to vector<252x1xi32>
    %41 = arith.cmpi slt, %39, %40 : vector<252x1xi32>
    %42 = arith.extui %41 : vector<252x1xi1> to vector<252x1xi32>
    %43 = arith.sitofp %42 : vector<252x1xi32> to vector<252x1xf32>
    %44 = vector.broadcast %43 : vector<252x1xf32> to vector<252x128xf32>
    %45 = arith.mulf %22, %44 : vector<252x128xf32>
    %cst_34 = arith.constant dense<0.000000e+00> : vector<128xf32>
    %46 = vector.multi_reduction <add>, %45, %cst_34 [0] : vector<252x128xf32> to vector<128xf32>
    %47 = vector.shape_cast %46 : vector<128xf32> to vector<1x128xf32>
    %48 = arith.addf %0, %47 : vector<1x128xf32>
    %49 = arith.mulf %45, %22 : vector<252x128xf32>
    %cst_35 = arith.constant dense<0.000000e+00> : vector<128xf32>
    %50 = vector.multi_reduction <add>, %49, %cst_35 [0] : vector<252x128xf32> to vector<128xf32>
    %51 = vector.shape_cast %50 : vector<128xf32> to vector<1x128xf32>
    %52 = arith.addf %1, %51 : vector<1x128xf32>
    %53 = vector.extract_strided_slice %22 {offsets = [0, 0], sizes = [252, 8], strides = [1, 1]} : vector<252x128xf32> to vector<252x8xf32>
    %54 = arith.truncf %53 : vector<252x8xf32> to vector<252x8xbf16>
    %c0_36 = arith.constant 0 : index
    %c0_37 = arith.constant 0 : index
    %c0_38 = arith.constant 0 : index
    %c0_39 = arith.constant 0 : index
    %55 = vector.load %arg4[%c0_36, %c0_37, %c0_38, %c0_39] : memref<1x1x288x8xbf16, #tpu.memory_space<vmem>>, vector<1x1x252x8xbf16>
    %56 = vector.shape_cast %55 : vector<1x1x252x8xbf16> to vector<252x8xbf16>
    %57 = vector.shape_cast %54 : vector<252x8xbf16> to vector<1x1x252x8xbf16>
    tpu.vector_store %arg4[%c0_36, %c0_37, %c0_38, %c0_39], %57 {strides = array<i32>} : memref<1x1x288x8xbf16, #tpu.memory_space<vmem>>, vector<1x1x252x8xbf16>,
    %c0_40 = arith.constant 0 : index
    %c0_41 = arith.constant 0 : index
    %c252 = arith.constant 252 : index
    %c0_42 = arith.constant 0 : index
    %58 = vector.load %arg2[%c0_40, %c0_41, %c252, %c0_42] : memref<1x1x328x4xbf16, #tpu.memory_space<vmem>>, vector<1x1x36x4xbf16>
    %59 = vector.shape_cast %58 : vector<1x1x36x4xbf16> to vector<36x4xbf16>
    %c0_43 = arith.constant 0 : index
    %c0_44 = arith.constant 0 : index
    %c253 = arith.constant 253 : index
    %c0_45 = arith.constant 0 : index
    %60 = vector.load %arg2[%c0_43, %c0_44, %c253, %c0_45] : memref<1x1x328x4xbf16, #tpu.memory_space<vmem>>, vector<1x1x36x4xbf16>
    %61 = vector.shape_cast %60 : vector<1x1x36x4xbf16> to vector<36x4xbf16>
    %c0_46 = arith.constant 0 : index
    %c0_47 = arith.constant 0 : index
    %c254 = arith.constant 254 : index
    %c0_48 = arith.constant 0 : index
    %62 = vector.load %arg2[%c0_46, %c0_47, %c254, %c0_48] : memref<1x1x328x4xbf16, #tpu.memory_space<vmem>>, vector<1x1x36x4xbf16>
    %63 = vector.shape_cast %62 : vector<1x1x36x4xbf16> to vector<36x4xbf16>
    %c0_49 = arith.constant 0 : index
    %c0_50 = arith.constant 0 : index
    %c270 = arith.constant 270 : index
    %c0_51 = arith.constant 0 : index
    %64 = vector.load %arg2[%c0_49, %c0_50, %c270, %c0_51] : memref<1x1x328x4xbf16, #tpu.memory_space<vmem>>, vector<1x1x36x4xbf16>
    %65 = vector.shape_cast %64 : vector<1x1x36x4xbf16> to vector<36x4xbf16>
    %c0_52 = arith.constant 0 : index
    %c0_53 = arith.constant 0 : index
    %c271 = arith.constant 271 : index
    %c0_54 = arith.constant 0 : index
    %66 = vector.load %arg2[%c0_52, %c0_53, %c271, %c0_54] : memref<1x1x328x4xbf16, #tpu.memory_space<vmem>>, vector<1x1x36x4xbf16>
    %67 = vector.shape_cast %66 : vector<1x1x36x4xbf16> to vector<36x4xbf16>
    %c0_55 = arith.constant 0 : index
    %c0_56 = arith.constant 0 : index
    %c272 = arith.constant 272 : index
    %c0_57 = arith.constant 0 : index
    %68 = vector.load %arg2[%c0_55, %c0_56, %c272, %c0_57] : memref<1x1x328x4xbf16, #tpu.memory_space<vmem>>, vector<1x1x36x4xbf16>
    %69 = vector.shape_cast %68 : vector<1x1x36x4xbf16> to vector<36x4xbf16>
    %c0_58 = arith.constant 0 : index
    %c0_59 = arith.constant 0 : index
    %c288 = arith.constant 288 : index
    %c0_60 = arith.constant 0 : index
    %70 = vector.load %arg2[%c0_58, %c0_59, %c288, %c0_60] : memref<1x1x328x4xbf16, #tpu.memory_space<vmem>>, vector<1x1x36x4xbf16>
    %71 = vector.shape_cast %70 : vector<1x1x36x4xbf16> to vector<36x4xbf16>
    %c0_61 = arith.constant 0 : index
    %c0_62 = arith.constant 0 : index
    %c289 = arith.constant 289 : index
    %c0_63 = arith.constant 0 : index
    %72 = vector.load %arg2[%c0_61, %c0_62, %c289, %c0_63] : memref<1x1x328x4xbf16, #tpu.memory_space<vmem>>, vector<1x1x36x4xbf16>
    %73 = vector.shape_cast %72 : vector<1x1x36x4xbf16> to vector<36x4xbf16>
    %c0_64 = arith.constant 0 : index
    %c0_65 = arith.constant 0 : index
    %c290 = arith.constant 290 : index
    %c0_66 = arith.constant 0 : index
    %74 = vector.load %arg2[%c0_64, %c0_65, %c290, %c0_66] : memref<1x1x328x4xbf16, #tpu.memory_space<vmem>>, vector<1x1x36x4xbf16>
    %75 = vector.shape_cast %74 : vector<1x1x36x4xbf16> to vector<36x4xbf16>
    %76 = tpu.concatenate %59, %61, %63, %65, %67, %69, %71, %73, %75 in 1 : vector<36x4xbf16>, vector<36x4xbf16>, vector<36x4xbf16>, vector<36x4xbf16>, vector<36x4xbf16>, vector<36x4xbf16>, vector<36x4xbf16>, vector<36x4xbf16>, vector<36x4xbf16> -> vector<36x36xbf16>
    %c0_67 = arith.constant 0 : index
    %c0_68 = arith.constant 0 : index
    %77 = vector.load %arg3[%c0_67, %c0_68] : memref<36x128xbf16, #tpu.memory_space<vmem>>, vector<36x128xbf16>
    %cst_69 = arith.constant dense<0.000000e+00> : vector<36x128xf32>
    %78 = tpu.matmul %76, %77, %cst_69 {dimension_numbers = #tpu.dot_dimension_numbers<[1], [0], [0], [1], [0, 0, 1, 1], [], []>} : vector<36x36xbf16>, vector<36x128xbf16>, vector<36x128xf32> -> vector<36x128xf32>
    %79 = tpu.iota {dimensions = array<i32: 0>} : vector<36x1xi32>
    %c18_i32_70 = arith.constant 18 : i32
    %c0_i32_71 = arith.constant 0 : i32
    %80 = arith.cmpi eq, %c18_i32_70, %c0_i32_71 : i32
    %c1_i32_72 = arith.constant 1 : i32
    %81 = arith.select %80, %c1_i32_72, %c18_i32_70 : i32
    %82 = vector.broadcast %81 : i32 to vector<36x1xi32>
    %83 = arith.remsi %79, %82 : vector<36x1xi32>
    %c0_i32_73 = arith.constant 0 : i32
    %84 = vector.broadcast %c0_i32_73 : i32 to vector<36x1xi32>
    %85 = arith.cmpi ne, %83, %84 : vector<36x1xi32>
    %c0_i32_74 = arith.constant 0 : i32
    %86 = vector.broadcast %c0_i32_74 : i32 to vector<36x1xi32>
    %87 = arith.cmpi slt, %83, %86 : vector<36x1xi32>
    %c0_i32_75 = arith.constant 0 : i32
    %88 = arith.cmpi slt, %81, %c0_i32_75 : i32
    %89 = vector.broadcast %88 : i1 to vector<36x1xi1>
    %90 = vector.broadcast %89 : vector<36x1xi1> to vector<36x1xi1>
    %91 = arith.xori %87, %90 : vector<36x1xi1>
    %92 = arith.andi %91, %85 : vector<36x1xi1>
    %93 = vector.broadcast %81 : i32 to vector<36x1xi32>
    %94 = arith.addi %83, %93 : vector<36x1xi32>
    %95 = arith.select %92, %94, %83 : vector<36x1xi1>, vector<36x1xi32>
    %c16_i32_76 = arith.constant 16 : i32
    %96 = vector.broadcast %c16_i32_76 : i32 to vector<36x1xi32>
    %97 = arith.cmpi slt, %95, %96 : vector<36x1xi32>
    %98 = arith.extui %97 : vector<36x1xi1> to vector<36x1xi32>
    %99 = arith.sitofp %98 : vector<36x1xi32> to vector<36x1xf32>
    %100 = vector.broadcast %99 : vector<36x1xf32> to vector<36x128xf32>
    %101 = arith.mulf %78, %100 : vector<36x128xf32>
    %cst_77 = arith.constant dense<0.000000e+00> : vector<128xf32>
    %102 = vector.multi_reduction <add>, %101, %cst_77 [0] : vector<36x128xf32> to vector<128xf32>
    %103 = vector.shape_cast %102 : vector<128xf32> to vector<1x128xf32>
    %104 = arith.addf %48, %103 : vector<1x128xf32>
    %105 = arith.mulf %101, %78 : vector<36x128xf32>
    %cst_78 = arith.constant dense<0.000000e+00> : vector<128xf32>
    %106 = vector.multi_reduction <add>, %105, %cst_78 [0] : vector<36x128xf32> to vector<128xf32>
    %107 = vector.shape_cast %106 : vector<128xf32> to vector<1x128xf32>
    %108 = arith.addf %52, %107 : vector<1x128xf32>
    %109 = vector.extract_strided_slice %78 {offsets = [0, 0], sizes = [36, 8], strides = [1, 1]} : vector<36x128xf32> to vector<36x8xf32>
    %110 = arith.truncf %109 : vector<36x8xf32> to vector<36x8xbf16>
    %c0_79 = arith.constant 0 : index
    %c0_80 = arith.constant 0 : index
    %c252_81 = arith.constant 252 : index
    %c0_82 = arith.constant 0 : index
    %111 = vector.load %arg4[%c0_79, %c0_80, %c252_81, %c0_82] : memref<1x1x288x8xbf16, #tpu.memory_space<vmem>>, vector<1x1x36x8xbf16>
    %112 = vector.shape_cast %111 : vector<1x1x36x8xbf16> to vector<36x8xbf16>
    %113 = vector.shape_cast %110 : vector<36x8xbf16> to vector<1x1x36x8xbf16>
    tpu.vector_store %arg4[%c0_79, %c0_80, %c252_81, %c0_82], %113 {strides = array<i32>} : memref<1x1x288x8xbf16, #tpu.memory_space<vmem>>, vector<1x1x36x8xbf16>,
    %114 = tpu.concatenate %104, %108 in 0 : vector<1x128xf32>, vector<1x128xf32> -> vector<2x128xf32>
    %c0_83 = arith.constant 0 : index
    %c0_84 = arith.constant 0 : index
    %c0_85 = arith.constant 0 : index
    %c0_86 = arith.constant 0 : index
    %115 = vector.load %arg5[%c0_83, %c0_84, %c0_85, %c0_86] : memref<1x1x2x128xf32, #tpu.memory_space<vmem>>, vector<1x1x2x128xf32>
    %116 = vector.shape_cast %115 : vector<1x1x2x128xf32> to vector<2x128xf32>
    %117 = vector.shape_cast %114 : vector<2x128xf32> to vector<1x1x2x128xf32>
    tpu.vector_store %arg5[%c0_83, %c0_84, %c0_85, %c0_86], %117 {strides = array<i32>} : memref<1x1x2x128xf32, #tpu.memory_space<vmem>>, vector<1x1x2x128xf32>,
    return
  }
  func.func @transform_0(%arg0: i32, %arg1: i32) -> (i32, i32, i32, i32) {
    %c0_i32 = arith.constant 0 : i32
    %c0_i32_0 = arith.constant 0 : i32
    %c0_i32_1 = arith.constant 0 : i32
    return %arg0, %arg1, %c0_i32, %c0_i32_0 : i32, i32, i32, i32
  }
  func.func @transform_1(%arg0: i32, %arg1: i32) -> (i32, i32) {
    %c0_i32 = arith.constant 0 : i32
    %c0_i32_0 = arith.constant 0 : i32
    %c0_i32_1 = arith.constant 0 : i32
    return %c0_i32, %c0_i32_0 : i32, i32
  }
  func.func @transform_2(%arg0: i32, %arg1: i32) -> (i32, i32, i32, i32) {
    %c0_i32 = arith.constant 0 : i32
    %c0_i32_0 = arith.constant 0 : i32
    %c0_i32_1 = arith.constant 0 : i32
    return %arg0, %arg1, %c0_i32, %c0_i32_0 : i32, i32, i32, i32
  }
  func.func @transform_3(%arg0: i32, %arg1: i32) -> (i32, i32, i32, i32) {
    %c0_i32 = arith.constant 0 : i32
    %c0_i32_0 = arith.constant 0 : i32
    %c0_i32_1 = arith.constant 0 : i32
    return %arg0, %arg1, %c0_i32, %c0_i32_0 : i32, i32, i32, i32
  }
}

</mosaic_0001>

<bundles_post_ra>
// kernel: tpu_custom_call.1
= control target key start
LH: loop header
LB: loop body
LE: loop exit
PB: predicated region body
PF: predicated region fallthrough
CT: control target
= control target key end

     0   :  { %9 = vsyncpa [#allocation3], 0  ;;  %s5740_s0 = inlined_call_operand.vmem [shape: bf16[2,1,328,4], index: 0, kind: input, shape index: {}]   ;;  %s5741_s1 = inlined_call_operand.vmem [shape: bf16[36,128], index: 1, kind: input, shape index: {}]   ;;  %s5742_s2 = inlined_call_operand.vmem [shape: bf16[2,1,288,8], index: 2, kind: output, shape index: {0}]   ;;  %s5743_s3 = inlined_call_operand.hbm [shape: f32[2,1,2,128], index: 3, kind: output, shape index: {1}]  }
   0x1   :  { %11 = vsyncpa [#allocation3 + $0x1], 0  ;;  %s3623_s12 = smov 0   ;;  %s3625_s13 = smov 0  }
   0x2   :  { %s3627_s14 = smov 0   ;;  %s3629_s15 = smov 0  }
   0x3   :  { %s3631_s16 = smov 0   ;;  %s3633_s17 = smov 0  }
   0x4 LB: > { %s3048_s18 = sadd.s32 4294967295, %s3590_s17   ;;  %s3049_s19 = sadd.s32 4294967294, %s3590_s17   ;;  %s3590_s17 = sphi %s3633_s17, %s17_s17   ;;  %s3586_s16 = sphi %s3631_s16, %s5904_s16   ;;  %s3582_s15 = sphi %s3629_s15, %s5903_s15   ;;  %s3578_s14 = sphi %s3627_s14, %s5902_s14   ;;  %s3574_s13 = sphi %s3625_s13, %s5901_s13   ;;  %s3570_s12 = sphi %s3623_s12, %s5900_s12  }
   0x5   : > { %s29_s20 = sadd.s32 1, %s3586_s16  ;;  %s115_s21 = sadd.s32 1, %s3578_s14 }
   0x6   : > { %p31_p0 = scmp.ge.s32.totalorder %s29_s20, 2  ;;  %p125_p1 = scmp.ne.s32.totalorder %s3578_s14, %s3574_s13 }
   0x7   : > { %p126_p2 = scmp.eq.s32.totalorder %s3048_s18, 1  ;;  %p131_p3 = scmp.ne.s32.totalorder %s3574_s13, %s3570_s12 }
   0x8   : > { %s5906_s20 = smov (%p31_p0, %s29_s20), 0  ;;  %p132_p5 = scmp.eq.s32.totalorder %s3049_s19, 1 }
   0x9   : > { %p3663_p4 = por %p126_p2, %p125_p1  ;;  %s110_s23 = ssub.s32 %s3586_s16, %s5906_s20 }
   0xa   : > { %p3052_p6 = scmp.ge.s32.totalorder %s3590_s17, 1  ;;  %p113_p7 = scmp.eq.s32.totalorder %s110_s23, 0 }
   0xb   : > { %p3670_p8 = por %p132_p5, %p131_p3  ;;  %p165_p9 = scmp.lt.s32.totalorder %s3590_s17, 3 }
   0xc   : > { %s3676_s25 = scalar_select %p113_p7, %s3578_s14, %s115_s21  }
   0xd   : > { %p166_p10 = pnand %p3052_p6, %p165_p9 }
   0xe   : > { %p202_p11 = scmp.lt.s32.totalorder (!%p166_p10), %s3582_s15, 1  ;;  %vm512_vm0 = vcmask (!%p166_p10), 1046528   ;;  %vm5754_vm1 = vcmask (!%p166_p10), 1045504   ;;  %vm349_vm2 = vsmask.f32 (!%p166_p10), 7424  ;;  %s3592_s4 = smov (!%p166_p10), 12  }
   0xf   : > { %169 = sbr.rel (%p166_p10) target bundleno = 710 (0x2c6), region = 28  ;;  %s3593_s5 = smov (!%p166_p10), 8   ;;  %vm628_vm3 = vsmask.f32 (!%p166_p10), 6400  ;;  %vm853_vm4 = vsmask.f32 (!%p166_p10), 5376 }
  0x10   : > { %s3594_s6 = smov (!%p166_p10), 20   ;;  %s3595_s7 = smov (!%p166_p10), 4   ;;  %vm967_vm5 = vcmask (!%p166_p10), 1044480   ;;  %vm5753_vm6 = vcmask (!%p166_p10), 1041408   ;;  %vm1033_vm7 = vcmask (!%p166_p10), 31744   ;;  %vm1067_vm8 = vcmask (!%p166_p10), 64512  }
  0x11   : > { %s3596_s18 = smov (!%p166_p10), 16   ;;  %s3597_s19 = smov (!%p166_p10), 24   ;;  %vm5762_vm9 = vcmask (!%p166_p10), 97280   ;;  %vm1133_vm10 = vcmask (!%p166_p10), 130048   ;;  %vm1166_vm11 = vcmask (!%p166_p10), 162816   ;;  %vm5758_vm12 = vcmask (!%p166_p10), 195584  }
  0x12   : > { %s3598_s21 = smov (!%p166_p10), 28   ;;  %s3599_s23 = smov (!%p166_p10), 32   ;;  %vm5757_vm13 = vcmask (!%p166_p10), 228352   ;;  %vm5756_vm14 = vcmask (!%p166_p10), 261120   ;;  %vm5755_vm15 = vcmask (!%p166_p10), 293888  }
  0x16   : > { %s3680_s26 = scalar_select %p202_p11, %s3582_s15, 1 }
  0x18   : > { %s3323_s27 = smul.u32 164, %s3680_s26 }
  0x19   : > { %s3324_s9 = smul.u32 144, %s3680_s26 }
  0x1a   : > { %s3686_s30 = scalar_lea.vmem %s5740_s0, %s3323_s27 }
  0x1b   : > { %v224_v0 = vld [vmem:[%s3686_s30 + $0xc] sm:$0xf]  ;;  %v225_v1 = vld [vmem:[%s3686_s30 + $0x10] sm:$0xf]  ;;  %v3691_v2 = vld [vmem:[%s3686_s30 + $0x14] sm:$0xf]  ;;  %s4945_s11 = scalar_lea.vmem %s5742_s2, %s3324_s9 }
  0x1c   : > { %v255_v3 = vld [vmem:[%s3686_s30 + $0x8] sm:$0xe]  ;;  %v3695_v4 = vcombine.low %v225_v1, %v3691_v2  ;;  %v222_v5 = vld [vmem:[%s3686_s30 + $0x4] sm:$0xf]  ;;  %v254_v8 = vld [vmem:[%s3686_s30] sm:$0xe] }
  0x1d   : > { %v223_v6 = vld [vmem:[%s3686_s30 + $0x8] sm:$0xf]  ;;  %v3074_v7 = vcombine.low %v255_v3, %v224_v0  ;;  %v221_v10 = vld [vmem:[%s3686_s30] sm:$0xf]  ;;  %v3073_v13 = vcombine.low %v254_v8, %v222_v5  ;;  %v3708_v16 = vld [vmem:[%s3686_s30 + $0x18] sm:$0xff]  }
  0x1e   : > { %v3700_v9 = vcombine.low %v223_v6, %v224_v0  ;;  %v260_v11 = vld [vmem:[%s3686_s30 + $0x8] sm:$0xc]  ;;  %v516_v12 = vrot.slane %v3695_v4, 1  ;;  %v3705_v14 = vcombine.low %v221_v10, %v222_v5  ;;  %v744_v19 = vrot.slane %v3695_v4, 2  ;;  %v261_v34 = vld [vmem:[%s3686_s30 + $0x10] sm:$0xc] }
  0x1f   : > { %v3078_v15 = vcombine.low %v260_v11, %v224_v0  ;;  %v587_v17 = vrot.slane %v3074_v7, 1  ;;  %v513_v21 = vrot.slane %v3073_v13, 1  ;;  %v518_v28 = vrot.slane %v3708_v16, 1  ;;  %v3739_v45 = vld [vmem:[%s3686_s30 + $0x20] sm:$0xff]   ;;  %v3474_v8 = vld [vmem:[%s5741_s1 + $0x8] sm:$0xff]  }
  0x20   : > { %v514_v18 = vrot.slane %v3700_v9, 1  ;;  %v358_v20 = vshll.u32 %v3700_v9, 16  ;;  %v351_v24 = vshrl.u32 %v3705_v14, 16  ;;  %v353_v25 = vshll.u32 %v3705_v14, 16  ;;  %v3473_v1 = vld [vmem:[%s5741_s1] sm:$0xff]  }
  0x21   : > { %v743_v22 = vrot.slane %v3078_v15, 2  ;;  %v588_v23 = vsel %vm512_vm0, %v587_v17, %v516_v12  ;;  %v362_v31 = vshrl.u32 %v3700_v9, 16  ;;  %v366_v32 = vshll.u32 %v3695_v4, 16  ;;  %v265_v15 = vld [vmem:[%s3686_s30 + $0x10] sm:$0x8]  ;;  %3259 = vmatprep.subr.bf16.mxu0 %v3473_v1  ;;  %3315 = vmatprep.subr.bf16.mxu1 %v3473_v1 }
  0x22   : > { %593 = vrot.lane.b32.xlu0 %v588_v23, %s3592_s4  ;;  %v515_v26 = vsel %vm512_vm0, %v513_v21, %v514_v18  ;;  %v360_v29 = vrot.slane %v358_v20, 1  ;;  %v355_v30 = vrot.slane %v353_v25, 1  ;;  %v370_v33 = vshrl.u32 %v3695_v4, 16  ;;  %3260 = vmatpush3.bf16.msra.mxu0 %v3473_v1 }
  0x23   : > { %v745_v27 = vsel %vm5754_vm1, %v743_v22, %v744_v19  ;;  %544 = vrot.lane.b32.xlu1 %v515_v26, %s3593_s5  ;;  %v517_v35 = vsel %vm512_vm0, %v514_v18, %v516_v12  ;;  %v3727_v36 = vshll.u32 %v3708_v16, 16  ;;  %v3730_v37 = vshrl.u32 %v3708_v16, 16  ;;  %3318 = vmatpush3.bf16.msra.mxu1 %v3473_v1 }
  0x24   : > { %v630_v38 = vshrl.u32 %v3074_v7, 16  ;;  %v356_v39 = vor.u32 %v355_v30, %v351_v24  ;;  %v746_v40 = vrot.slane %v3708_v16, 2  ;;  %v364_v41 = vor.u32 %v362_v31, %v360_v29  ;;  %3261 = vmatprep.subr.bf16.mxu0 %v3474_v8  ;;  %3316 = vmatprep.subr.bf16.mxu1 %v3474_v8 }
  0x25   : > { %v3734_v42 = vrot.slane %v366_v32, 1  ;;  %v637_v43 = vrot.slane %v370_v33, 1  ;;  %v638_v44 = vrot.slane %v366_v32, 2  ;;  %v633_v48 = vshll.u32 %v3074_v7, 16 }
  0x26   : > { %774 = vrot.lane.b32.xlu0 %v745_v27, %s3594_s6  ;;  %v361_v46 = vsel %vm349_vm2, %v356_v39, %v360_v29  ;;  %v632_v47 = vrot.slane %v630_v38, 1  ;;  %v3746_v49 = vsel %vm512_vm0, %v516_v12, %v518_v28  ;;  %v641_v50 = vrot.slane %v3730_v37, 1  ;;  %3262 = vmatpush3.bf16.msra.mxu0 %v3474_v8 }
  0x27   : > { %546 = vrot.lane.b32.xlu1 %v517_v35, %s3593_s5  ;;  %v642_v51 = vrot.slane %v3727_v36, 2  ;;  %v3079_v52 = vcombine.low %v261_v34, %v3691_v2  ;;  %v635_v53 = vrot.slane %v633_v48, 2  ;;  %v369_v54 = vsel %vm349_vm2, %v364_v41, %v3734_v42  ;;  %3319 = vmatpush3.bf16.msra.mxu1 %v3474_v8  ;;  %v3809_v35 = vld [vmem:[%s3686_s30 + $0x28] sm:$0xff]  }
  0x28   : > { %v639_v55 = vor.u32 %v638_v44, %v637_v43  ;;  %v747_v59 = vsel %vm5754_vm1, %v744_v19, %v746_v40  ;;  %v3760_v61 = vshll.u32 %v3739_v45, 16  ;;  %v3763_v62 = vshrl.u32 %v3739_v45, 16 }
  0x29   : > { %v636_v56 = vor.u32 %v635_v53, %v632_v47  ;;  %v855_v57 = vshrl.u32 %v3079_v52, 16  ;;  %v858_v58 = vshll.u32 %v3079_v52, 16  ;;  %v3757_v60 = vor.u32 %v642_v51, %v641_v50  ;;  %v3839_v51 = vld [vmem:[%s3686_s30 + $0x30] sm:$0xff]  }
  0x2a   : > { %477 = vrot.lane.b32.xlu0 %v361_v46, %s3595_s7  ;;  %v814_v63 = vrot.slane %v3079_v52, 2  ;;  %v862_v0 = vrot.slane %v3730_v37, 2  ;;  %v863_v5 = vrot.slane %v3727_v36, 3  ;;  %v748_v11 = vrot.slane %v3739_v45, 2 }
  0x2b   : > { %595 = vrot.lane.b32.xlu1 %v3746_v49, %s3592_s4  ;;  %v640_v3 = vsel %vm628_vm3, %v636_v56, %v639_v55  ;;  %v857_v6 = vrot.slane %v855_v57, 2  ;;  %v860_v7 = vrot.slane %v858_v58, 3  ;;  %v644_v10 = vsel %vm628_vm3, %v639_v55, %v3757_v60 }
  0x2c   : > { %v866_v12 = vrot.slane %v3763_v62, 2  ;;  %v867_v13 = vrot.slane %v3760_v61, 3  ;;  %v815_v17 = vsel %vm5754_vm1, %v814_v63, %v746_v40  ;;  %v864_v18 = vor.u32 %v863_v5, %v862_v0 }
  0x2d   : > { %v861_v19 = vor.u32 %v860_v7, %v857_v6  ;;  %v3082_v20 = vcombine.low %v265_v15, %v3691_v2  ;;  %v749_v21 = vsel %vm5754_vm1, %v746_v40, %v748_v11  ;;  %v969_v2 = vrot.slane %v3708_v16, 3 }
  0x2e   : > { %479 = vrot.lane.b32.xlu0 %v369_v54, %s3595_s7  ;;  %v3789_v22 = vor.u32 %v867_v13, %v866_v12  ;;  %v372_v26 = vor.u32 %v370_v33, %v3734_v42  ;;  %v376_v27 = vrot.slane %v3727_v36, 1  ;;  %v971_v30 = vrot.slane %v3739_v45, 3 }
  0x2f   : > { %776 = vrot.lane.b32.xlu1 %v747_v59, %s3594_s6  ;;  %v865_v23 = vsel %vm853_vm4, %v861_v19, %v864_v18  ;;  %v968_v24 = vrot.slane %v3082_v20, 3  ;;  %v384_v34 = vrot.slane %v3760_v61, 1  ;;  %v520_v38 = vrot.slane %v3739_v45, 1 }
  0x30   : > { %v869_v25 = vsel %vm853_vm4, %v864_v18, %v3789_v22  ;;  %v377_v31 = vsel %vm349_vm2, %v372_v26, %v376_v27  ;;  %v380_v32 = vor.u32 %v3730_v37, %v376_v27  ;;  %v972_v33 = vsel %vm967_vm5, %v969_v2, %v971_v30  ;;  %v3896_v18 = vld [vmem:[%s3686_s30 + $0x38] sm:$0xff]  }
  0x31   : > { %v970_v29 = vsel %vm967_vm5, %v968_v24, %v969_v2  ;;  %v390_v37 = vshll.u32 %v3809_v35, 16  ;;  %v394_v39 = vshrl.u32 %v3809_v35, 16  ;;  %v645_v40 = vrot.slane %v3763_v62, 1 }
  0x32   : > { %707 = vrot.lane.b32.xlu0 %v640_v3, %s3596_s18  ;;  %v385_v36 = vsel %vm349_vm2, %v380_v32, %v384_v34  ;;  %v646_v41 = vrot.slane %v3760_v61, 2  ;;  %v521_v42 = vsel %vm512_vm0, %v518_v28, %v520_v38  ;;  %v522_v43 = vrot.slane %v3809_v35, 1  ;;  %v3475_v61 = vld [vmem:[%s5741_s1 + $0x10] ss:$0 sps:$4 sm:$0x33]  }
  0x33   : > { %709 = vrot.lane.b32.xlu1 %v644_v10, %s3596_s18  ;;  %v649_v44 = vrot.slane %v394_v39, 1  ;;  %v650_v46 = vrot.slane %v390_v37, 2  ;;  %v750_v52 = vrot.slane %v3809_v35, 2  ;;  %v3850_v53 = vshll.u32 %v3839_v51, 16  ;;  %3321 = vmatprep.subr.msk.bf16.mxu0 %vm5753_vm6, %v3475_v61 }
  0x34   : > { %v647_v47 = vor.u32 %v646_v41, %v645_v40  ;;  %v3834_v48 = vsel %vm512_vm0, %v520_v38, %v522_v43  ;;  %v3853_v54 = vshrl.u32 %v3839_v51, 16  ;;  %v870_v55 = vrot.slane %v394_v39, 2  ;;  %3322 = vmatprep.subr.msk.bf16.mxu1 %vm5753_vm6, %v3475_v61  ;;  %v3937_v38 = vld [vmem:[%s3686_s30 + $0x40] sm:$0xff]  }
  0x35   : > { %v3836_v50 = vor.u32 %v650_v46, %v649_v44  ;;  %v871_v56 = vrot.slane %v390_v37, 3  ;;  %v751_v57 = vsel %vm5754_vm1, %v748_v11, %v750_v52  ;;  %v752_v58 = vrot.slane %v3839_v51, 2 }
  0x36   : > { %818 = vrot.lane.b32.xlu0 %v815_v17, %s3597_s19  ;;  %v648_v28 = vsel %vm628_vm3, %v3757_v60, %v647_v47  ;;  %v874_v59 = vrot.slane %v3853_v54, 2  ;;  %v875_v60 = vrot.slane %v3850_v53, 3  ;;  %v1353_v3 = vsel %vm5753_vm6, %v3475_v61, 0 }
  0x37   : > { %820 = vrot.lane.b32.xlu1 %v749_v21, %s3597_s19  ;;  %v872_v63 = vor.u32 %v871_v56, %v870_v55  ;;  %v3871_v0 = vsel %vm5754_vm1, %v750_v52, %v752_v58  ;;  %v973_v6 = vrot.slane %v3809_v35, 3  ;;  %3264 = vmatpush3.bf16.msra.mxu0 %v1353_v3  ;;  %v388_v8 = vor.u32 %v3763_v62, %v384_v34 }
  0x38   : > { %v3873_v1 = vor.u32 %v875_v60, %v874_v59  ;;  %v392_v10 = vrot.slane %v390_v37, 1  ;;  %3320 = vmatpush3.bf16.msra.mxu1 %v1353_v3  ;;  %v975_v12 = vrot.slane %v3839_v51, 3  ;;  %v400_v17 = vrot.slane %v3850_v53, 1  ;;  %v3981_v60 = vld [vmem:[%s3686_s30 + $0x68] sm:$0xff]  }
  0x39   : > { %v873_v5 = vsel %vm853_vm4, %v3789_v22, %v872_v63  ;;  %v974_v11 = vsel %vm967_vm5, %v971_v30, %v973_v6  ;;  %v524_v19 = vrot.slane %v3839_v51, 1  ;;  %v406_v20 = vshll.u32 %v3896_v18, 16  ;;  %v3908_v22 = vld [vmem:[%s3686_s30 + $0x60] sm:$0xff]  }
  0x3a   : > { %932 = vrot.lane.b32.xlu0 %v865_v23, %s3598_s21  ;;  %v877_v7 = vsel %vm853_vm4, %v872_v63, %v3873_v1  ;;  %v393_v13 = vsel %vm349_vm2, %v388_v8, %v392_v10  ;;  %v396_v15 = vor.u32 %v394_v39, %v392_v10  ;;  %v976_v62 = vsel %vm967_vm5, %v973_v6, %v975_v12  ;;  %v3993_v6 = vld [vmem:[%s3686_s30 + $0x48] sm:$0xff]  }
  0x3b   : > { %934 = vrot.lane.b32.xlu1 %v869_v25, %s3598_s21  ;;  %v526_v23 = vrot.slane %v3896_v18, 1  ;;  %v653_v24 = vrot.slane %v3853_v54, 1  ;;  %v654_v2 = vrot.slane %v3850_v53, 2  ;;  %v3916_v25 = vshrl.u32 %v3908_v22, 16 }
  0x3c   : > { %v401_v45 = vsel %vm349_vm2, %v396_v15, %v400_v17  ;;  %v525_v26 = vsel %vm512_vm0, %v522_v43, %v524_v19  ;;  %v3922_v30 = vshll.u32 %v3908_v22, 16  ;;  %v754_v41 = vrot.slane %v3896_v18, 2 }
  0x3d   : > { %v655_v34 = vor.u32 %v654_v2, %v653_v24  ;;  %v3953_v43 = vshrl.u32 %v3937_v38, 16  ;;  %v879_v46 = vrot.slane %v406_v20, 3  ;;  %v977_v56 = vrot.slane %v3896_v18, 3 }
  0x3e   : > { %1001 = vrot.lane.b32.xlu0 %v970_v29, %s3599_s23  ;;  %v658_v29 = vrot.slane %v406_v20, 2  ;;  %v899_v32 = vrot.slane %v3922_v30, 3  ;;  %v408_v59 = vrot.slane %v406_v20, 1  ;;  %v677_v61 = vrot.slane %v3916_v25, 1 }
  0x3f   : > { %481 = vrot.lane.b32.xlu1 %v377_v31, %s3595_s7  ;;  %v898_v31 = vrot.slane %v3916_v25, 2  ;;  %v656_v39 = vsel %vm628_vm3, %v3836_v50, %v655_v34  ;;  %v678_v63 = vrot.slane %v3922_v30, 2  ;;  %v3999_v8 = vshll.u32 %v3981_v60, 16 }
  0x40   : > { %v4002_v10 = vshrl.u32 %v3981_v60, 16  ;;  %v4013_v15 = vshll.u32 %v3993_v6, 16  ;;  %v661_v20 = vrot.slane %v3953_v43, 1 }
  0x41   : > { %v3939_v37 = vor.u32 %v899_v32, %v898_v31 }
  0x42   : > { %1003 = vrot.lane.b32.xlu0 %v972_v33, %s3599_s23  ;;  %v3932_v33 = vsel %vm512_vm0, %v524_v19, %v526_v23  ;;  %v530_v19 = vrot.slane %v3993_v6, 1 }
  0x43   : > { %483 = vrot.lane.b32.xlu1 %v385_v36, %s3595_s7 }
  0x46   : > { %548 = vrot.lane.b32.xlu0 %v3746_v49, %s3593_s5  ;;  %v652_v49 = vsel %vm628_vm3, %v647_v47, %v3836_v50  ;;  %v755_v47 = vsel %vm5754_vm1, %v752_v58, %v754_v41  ;;  %v882_v50 = vrot.slane %v3953_v43, 2  ;;  %v404_v58 = vor.u32 %v3853_v54, %v400_v17 }
  0x47   : > { %550 = vrot.lane.b32.xlu1 %v521_v42, %s3593_s5  ;;  %v979_v54 = vrot.slane %v3937_v38, 3  ;;  %v4016_v17 = vshrl.u32 %v3993_v6, 16 }
  0x49   : > { %v665_v2 = vrot.slane %v4016_v17, 1 }
  0x4a   : > { %597 = vrot.lane.b32.xlu0 %v521_v42, %s3592_s4  ;;  %v3950_v42 = vshll.u32 %v3937_v38, 16 }
  0x4b   : > { %599 = vrot.lane.b32.xlu1 %v3834_v48, %s3592_s4 }
  0x4c   : > { %v416_v3 = vrot.slane %v3950_v42, 1 }
  0x4e   : > { %711 = vrot.lane.b32.xlu0 %v648_v28, %s3596_s18  ;;  %v883_v28 = vrot.slane %v3950_v42, 3 }
  0x4f   : > { %713 = vrot.lane.b32.xlu1 %v652_v49, %s3596_s18 }
  0x50   : > { %v3969_v53 = vor.u32 %v883_v28, %v882_v50  ;;  %v456_v50 = vrot.slane %v3999_v8, 1  ;;  %v887_v28 = vrot.slane %v4013_v15, 3 }
  0x52   : > { %778 = vrot.lane.b32.xlu0 %v749_v21, %s3594_s6  ;;  %v410_v21 = vshrl.u32 %v3896_v18, 16 }
  0x53   : > { %780 = vrot.lane.b32.xlu1 %v751_v57, %s3594_s6 }
  0x54   : > { %v657_v27 = vrot.slane %v410_v21, 1  ;;  %v878_v44 = vrot.slane %v410_v21, 2 }
  0x56   : > { %822 = vrot.lane.b32.xlu0 %v751_v57, %s3597_s19  ;;  %v3934_v36 = vor.u32 %v658_v29, %v657_v27  ;;  %v880_v49 = vor.u32 %v879_v46, %v878_v44  ;;  %v886_v44 = vrot.slane %v4016_v17, 2  ;;  %v4063_v46 = vld [vmem:[%s3686_s30 + $0x70] sm:$0xff]  }
  0x57   : > { %824 = vrot.lane.b32.xlu1 %v3871_v0, %s3597_s19 }
  0x58   : > { %v660_v40 = vsel %vm628_vm3, %v655_v34, %v3934_v36  ;;  %v881_v55 = vsel %vm853_vm4, %v3873_v1, %v880_v49  ;;  %v885_v57 = vsel %vm853_vm4, %v880_v49, %v3969_v53  ;;  %v412_v1 = vor.u32 %v410_v21, %v408_v59 }
  0x59   : > { %v662_v21 = vrot.slane %v3950_v42, 2 }
  0x5a   : > { %936 = vrot.lane.b32.xlu0 %v873_v5, %s3598_s21  ;;  %v409_v5 = vsel %vm349_vm2, %v404_v58, %v408_v59  ;;  %v888_v58 = vor.u32 %v887_v28, %v886_v44  ;;  %v4130_v44 = vrot.slane %v4063_v46, 1 }
  0x5b   : > { %938 = vrot.lane.b32.xlu1 %v877_v7, %s3598_s21  ;;  %v3995_v7 = vor.u32 %v678_v63, %v677_v61  ;;  %v663_v31 = vor.u32 %v662_v21, %v661_v20  ;;  %v460_v61 = vor.u32 %v4002_v10, %v456_v50 }
  0x5d   : > { %v664_v34 = vsel %vm628_vm3, %v3934_v36, %v663_v31 }
  0x5e   : > { %1005 = vrot.lane.b32.xlu0 %v974_v11, %s3599_s23  ;;  %v417_v11 = vsel %vm349_vm2, %v412_v1, %v416_v3 }
  0x5f   : > { %485 = vrot.lane.b32.xlu1 %v393_v13, %s3595_s7  ;;  %v528_v13 = vrot.slane %v3937_v38, 1 }
  0x61   : > { %v529_v24 = vsel %vm512_vm0, %v526_v23, %v528_v13  ;;  %v4043_v23 = vsel %vm512_vm0, %v528_v13, %v530_v19  ;;  %v538_v13 = vrot.slane %v3981_v60, 1 }
  0x62   : > { %1007 = vrot.lane.b32.xlu0 %v976_v62, %s3599_s23  ;;  %v681_v62 = vrot.slane %v4002_v10, 1 }
  0x63   : > { %487 = vrot.lane.b32.xlu1 %v401_v45, %s3595_s7  ;;  %v682_v45 = vrot.slane %v3999_v8, 2 }
  0x65   : > { %v4030_v27 = vor.u32 %v682_v45, %v681_v62 }
  0x66   : > { %552 = vrot.lane.b32.xlu0 %v3834_v48, %s3593_s5  ;;  %v756_v48 = vrot.slane %v3937_v38, 2 }
  0x67   : > { %554 = vrot.lane.b32.xlu1 %v525_v26, %s3593_s5  ;;  %v4037_v29 = vsel %vm628_vm3, %v3995_v7, %v4030_v27 }
  0x68   : > { %v757_v52 = vsel %vm5754_vm1, %v754_v41, %v756_v48  ;;  %v4058_v41 = vld [vmem:[%s3686_s30 + $0x50] sm:$0xff]  }
  0x69   : > { %v760_v49 = vrot.slane %v4058_v41, 2 }
  0x6a   : > { %601 = vrot.lane.b32.xlu0 %v525_v26, %s3592_s4  ;;  %v666_v26 = vrot.slane %v4013_v15, 2 }
  0x6b   : > { %603 = vrot.lane.b32.xlu1 %v3932_v33, %s3592_s4 }
  0x6c   : > { %v4045_v32 = vor.u32 %v666_v26, %v665_v2 }
  0x6e   : > { %715 = vrot.lane.b32.xlu0 %v656_v39, %s3596_s18  ;;  %v758_v39 = vrot.slane %v3993_v6, 2 }
  0x6f   : > { %717 = vrot.lane.b32.xlu1 %v660_v40, %s3596_s18  ;;  %v5747_v40 = vrot.slane %v3922_v30, 1 }
  0x70   : > { %v759_v36 = vsel %vm5754_vm1, %v756_v48, %v758_v39  ;;  %v4083_v48 = vshrl.u32 %v4058_v41, 16 }
  0x72   : > { %782 = vrot.lane.b32.xlu0 %v3871_v0, %s3594_s6  ;;  %v978_v0 = vsel %vm967_vm5, %v975_v12, %v977_v56  ;;  %v980_v12 = vsel %vm967_vm5, %v977_v56, %v979_v54  ;;  %v4080_v56 = vshll.u32 %v4058_v41, 16 }
  0x73   : > { %784 = vrot.lane.b32.xlu1 %v755_v47, %s3594_s6 }
  0x74   : > { %v891_v1 = vrot.slane %v4080_v56, 3 }
  0x76   : > { %826 = vrot.lane.b32.xlu0 %v755_v47, %s3597_s19  ;;  %v452_v47 = vor.u32 %v3916_v25, %v5747_v40 }
  0x77   : > { %828 = vrot.lane.b32.xlu1 %v757_v52, %s3597_s19 }
  0x7a   : > { %940 = vrot.lane.b32.xlu0 %v881_v55, %s3598_s21  ;;  %v4077_v55 = vshll.u32 %v4063_v46, 16 }
  0x7b   : > { %942 = vrot.lane.b32.xlu1 %v885_v57, %s3598_s21  ;;  %v457_v57 = vsel %vm349_vm2, %v452_v47, %v456_v50  ;;  %v5751_v47 = vrot.slane %v4058_v41, 3  ;;  %v4145_v50 = vshrl.u32 %v4063_v46, 16 }
  0x7c   : > { %v464_v63 = vrot.slane %v4077_v55, 1 }
  0x7e   : > { %1009 = vrot.lane.b32.xlu0 %v978_v0, %s3599_s23  ;;  %v890_v0 = vrot.slane %v4083_v48, 2  ;;  %v465_v45 = vsel %vm349_vm2, %v460_v61, %v464_v63 }
  0x7f   : > { %489 = vrot.lane.b32.xlu1 %v409_v5, %s3595_s7 }
  0x80   : > { %v4109_v20 = vor.u32 %v891_v1, %v890_v0  ;;  %v432_v0 = vrot.slane %v4080_v56, 1 }
  0x82   : > { %1011 = vrot.lane.b32.xlu0 %v980_v12, %s3599_s23  ;;  %v5746_v12 = vrot.slane %v3908_v22, 1  ;;  %v893_v26 = vsel %vm853_vm4, %v888_v58, %v4109_v20 }
  0x83   : > { %491 = vrot.lane.b32.xlu1 %v417_v11, %s3595_s7  ;;  %v889_v11 = vsel %vm853_vm4, %v3969_v53, %v888_v58 }
  0x84   : > { %v4114_v53 = vsel %vm512_vm0, %v5746_v12, %v538_v13 }
  0x86   : > { %556 = vrot.lane.b32.xlu0 %v3932_v33, %s3593_s5  ;;  %v668_v33 = vsel %vm628_vm3, %v663_v31, %v4045_v32  ;;  %v420_v31 = vor.u32 %v3953_v43, %v416_v3  ;;  %v4136_v43 = vld [vmem:[%s3686_s30 + $0x78] sm:$0xf]  ;;  %v256_v3 = vld [vmem:[%s3686_s30 + $0x7c] sm:$0xf] }
  0x87   : > { %558 = vrot.lane.b32.xlu1 %v529_v24, %s3593_s5  ;;  %v4151_v58 = vcombine.low %v4136_v43, %v256_v3 }
  0x8a   : > { %605 = vrot.lane.b32.xlu0 %v529_v24, %s3592_s4  ;;  %v981_v24 = vrot.slane %v3993_v6, 3 }
  0x8b   : > { %607 = vrot.lane.b32.xlu1 %v4043_v23, %s3592_s4 }
  0x8e   : > { %719 = vrot.lane.b32.xlu0 %v664_v34, %s3596_s18  ;;  %v424_v34 = vrot.slane %v4013_v15, 1 }
  0x8f   : > { %721 = vrot.lane.b32.xlu1 %v668_v33, %s3596_s18 }
  0x90   : > { %v425_v42 = vsel %vm349_vm2, %v420_v31, %v424_v34  ;;  %v428_v61 = vor.u32 %v4016_v17, %v424_v34  ;;  %v5750_v17 = vrot.slane %v4151_v58, 1  ;;  %v690_v31 = vshrl.u32 %v4151_v58, 16 }
  0x92   : > { %786 = vrot.lane.b32.xlu0 %v757_v52, %s3594_s6  ;;  %v4090_v52 = vsel %vm5754_vm1, %v758_v39, %v760_v49  ;;  %v982_v39 = vsel %vm967_vm5, %v979_v54, %v981_v24  ;;  %v541_v54 = vsel %vm512_vm0, %v538_v13, %v4130_v44  ;;  %v686_v13 = vrot.slane %v4077_v55, 2 }
  0x93   : > { %788 = vrot.lane.b32.xlu1 %v759_v36, %s3594_s6  ;;  %v590_v3 = vsel %vm512_vm0, %v4130_v44, %v5750_v17 }
  0x94   : > { %v594_v25 = vpop.permute.xlu0 %593 }
  0x95   : > { %v545_v59 = vpop.permute.xlu1 %544 }
  0x96   : > { %830 = vrot.lane.b32.xlu0 %v759_v36, %s3597_s19 }
  0x97   : > { %501 = vrot.lane.b32.xlu1 %v457_v57, %s3595_s7 }
  0x98   : > { %v4097_v5 = vpop.permute.xlu0 %774 }
  0x99   : > { %v547_v62 = vpop.permute.xlu1 %546 }
  0x9a   : > { %832 = vrot.lane.b32.xlu0 %v4090_v52, %s3597_s19 }
  0x9b   : > { %944 = vrot.lane.b32.xlu1 %v889_v11, %s3598_s21  ;;  %v685_v11 = vrot.slane %v4145_v50, 1 }
  0x9c   : > { %v478_v21 = vpop.permute.xlu0 %477 }
  0x9d   : > { %v596_v2 = vpop.permute.xlu1 %595  ;;  %v1035_v38 = vsel %vm1033_vm7, %v3705_v14, %v478_v21 }
  0x9e   : > { %503 = vrot.lane.b32.xlu0 %v465_v45, %s3595_s7  ;;  %v1069_v14 = vsel %vm1067_vm8, %v1035_v38, %v545_v59  ;;  %v532_v38 = vrot.slane %v4058_v41, 1 }
  0x9f   : > { %568 = vrot.lane.b32.xlu1 %v4114_v53, %s3593_s5  ;;  %v1102_v21 = vsel %vm5762_vm9, %v1069_v14, %v594_v25 }
  0xa0   : > { %v480_v33 = vpop.permute.xlu0 %479 }
  0xa1   : > { %v777_v36 = vpop.permute.xlu1 %776  ;;  %v1037_v57 = vsel %vm1033_vm7, %v3700_v9, %v480_v33  ;;  %v984_v9 = vsel %vm967_vm5, %v981_v24, %v5751_v47  ;;  %v433_v24 = vsel %vm349_vm2, %v428_v61, %v432_v0  ;;  %v687_v33 = vor.u32 %v686_v13, %v685_v11 }
  0xa2   : > { %946 = vrot.lane.b32.xlu0 %v893_v26, %s3598_s21  ;;  %v1071_v45 = vsel %vm1067_vm8, %v1037_v57, %v547_v62  ;;  %v693_v62 = vshll.u32 %v4151_v58, 16  ;;  %v533_v11 = vsel %vm512_vm0, %v530_v19, %v532_v38 }
  0xa3   : > { %1013 = vrot.lane.b32.xlu1 %v982_v39, %s3599_s23  ;;  %v1104_v34 = vsel %vm5762_vm9, %v1071_v45, %v596_v2  ;;  %v688_v61 = vsel %vm628_vm3, %v4030_v27, %v687_v33  ;;  %v5744_v27 = vrot.slane %v3981_v60, 2  ;;  %v4208_v45 = vld [vmem:[%s3686_s30 + $0x58] sm:$0xff]  }
  0xa4   : > { %v708_v15 = vpop.permute.xlu0 %707 }
  0xa5   : > { %v710_v28 = vpop.permute.xlu1 %709  ;;  %v1135_v26 = vsel %vm1133_vm10, %v1102_v21, %v708_v15 }
  0xa6   : > { %493 = vrot.lane.b32.xlu0 %v425_v42, %s3595_s7  ;;  %v1168_v42 = vsel %vm1166_vm11, %v1135_v26, %v4097_v5  ;;  %v1137_v2 = vsel %vm1133_vm10, %v1104_v34, %v710_v28  ;;  %v692_v5 = vrot.slane %v690_v31, 1  ;;  %v768_v26 = vrot.slane %v4063_v46, 2 }
  0xa7   : > { %570 = vrot.lane.b32.xlu1 %v541_v54, %s3593_s5 }
  0xa8   : > { %v819_v1 = vpop.permute.xlu0 %818 }
  0xa9   : > { %v821_v59 = vpop.permute.xlu1 %820  ;;  %v1201_v15 = vsel %vm5758_vm12, %v1168_v42, %v819_v1  ;;  %v1170_v1 = vsel %vm1166_vm11, %v1137_v2, %v777_v36  ;;  %v4227_v42 = vshrl.u32 %v4208_v45, 16  ;;  %v4232_v2 = vsel %vm5754_vm1, %v5744_v27, %v768_v26 }
  0xaa   : > { %617 = vrot.lane.b32.xlu0 %v541_v54, %s3592_s4  ;;  %v695_v54 = vrot.slane %v693_v62, 2 }
  0xab   : > { %1015 = vrot.lane.b32.xlu1 %v984_v9, %s3599_s23 }
  0xac   : > { %v933_v25 = vpop.permute.xlu0 %932  ;;  %v4205_v13 = vor.u32 %v695_v54, %v692_v5  ;;  %v770_v54 = vrot.slane %v4151_v58, 2 }
  0xad   : > { %v935_v39 = vpop.permute.xlu1 %934  ;;  %v1234_v57 = vsel %vm5757_vm13, %v1201_v15, %v933_v25  ;;  %v5745_v25 = vrot.slane %v4208_v45, 1 }
  0xae   : > { %495 = vrot.lane.b32.xlu0 %v433_v24, %s3595_s7  ;;  %v669_v24 = vrot.slane %v4083_v48, 1  ;;  %v697_v19 = vsel %vm628_vm3, %v687_v33, %v4205_v13 }
  0xaf   : > { %560 = vrot.lane.b32.xlu1 %v4043_v23, %s3593_s5  ;;  %v1203_v23 = vsel %vm5758_vm12, %v1170_v1, %v821_v59  ;;  %v670_v59 = vrot.slane %v4080_v56, 2  ;;  %v4242_v33 = vsel %vm512_vm0, %v532_v38, %v5745_v25  ;;  %v4250_v1 = vld [vmem:[%s3686_s30 + $0x80] sm:$0xf]  ;;  %v771_v38 = vsel %vm5754_vm1, %v768_v26, %v770_v54 }
  0xb0   : > { %v1002_v14 = vpop.permute.xlu0 %1001  ;;  %v1236_v36 = vsel %vm5757_vm13, %v1203_v23, %v935_v39  ;;  %v4224_v39 = vshll.u32 %v4208_v45, 16  ;;  %v259_v23 = vld [vmem:[%s3686_s30 + $0x84] sm:$0xf] }
  0xb1   : > { %v4193_v9 = vpop.permute.xlu1 %481  ;;  %v1267_v28 = vsel %vm5756_vm14, %v1234_v57, %v1002_v14  ;;  %v671_v15 = vor.u32 %v670_v59, %v669_v24  ;;  %v673_v57 = vrot.slane %v4227_v42, 1  ;;  %v907_v59 = vrot.slane %v4077_v55, 3 }
  0xb2   : > { %619 = vrot.lane.b32.xlu0 %v590_v3, %s3592_s4  ;;  %3265 = vmatprep.mubr.msk.bf16.mxu0 %vm5755_vm15, %v1267_v28  ;;  %v674_v14 = vrot.slane %v4224_v39, 2 }
  0xb3   : > { %731 = vrot.lane.b32.xlu1 %v688_v61, %s3596_s18  ;;  %v672_v28 = vsel %vm628_vm3, %v4045_v32, %v671_v15  ;;  %v906_v32 = vrot.slane %v4145_v50, 2 }
  0xb4   : > { %v1004_v21 = vpop.permute.xlu0 %1003 }
  0xb5   : > { %v4214_v34 = vpop.permute.xlu1 %483  ;;  %v1269_v6 = vsel %vm5756_vm14, %v1236_v36, %v1004_v21  ;;  %v4257_v36 = vor.u32 %v674_v14, %v673_v57  ;;  %v4260_v21 = vcombine.low %v4250_v1, %v259_v23 }
  0xb6   : > { %562 = vrot.lane.b32.xlu0 %v533_v11, %s3593_s5  ;;  %3266 = vmatmul.mubr.msk.bf16.vlgmr.msra.gmra.mrb[0].mxu0 %vm5755_vm15, %v1269_v6  ;;  %v910_v6 = vrot.slane %v690_v31, 2  ;;  %v4277_v31 = vor.u32 %v907_v59, %v906_v32 }
  0xb7   : > { %609 = vrot.lane.b32.xlu1 %v533_v11, %s3592_s4  ;;  %v676_v26 = vsel %vm628_vm3, %v671_v15, %v4257_v36  ;;  %v4273_v57 = vrot.slane %v4260_v21, 2  ;;  %v5749_v14 = vshrl.u32 %v4260_v21, 16  ;;  %v5748_v23 = vshll.u32 %v4260_v21, 16 }
  0xb8   : > { %v549_v3 = vpop.permute.xlu0 %548 }
  0xb9   : > { %v4234_v5 = vpop.permute.xlu1 %550  ;;  %v4286_v15 = vsel %vm5754_vm1, %v770_v54, %v4273_v57  ;;  %v914_v40 = vrot.slane %v5749_v14, 2  ;;  %v915_v32 = vrot.slane %v5748_v23, 3 }
  0xba   : > { %733 = vrot.lane.b32.xlu0 %v697_v19, %s3596_s18  ;;  %v911_v19 = vrot.slane %v693_v62, 3  ;;  %v253_v62 = vld [vmem:[%s3686_s30 + $0x7c] sm:$0x7] }
  0xbb   : > { %798 = vrot.lane.b32.xlu1 %v4232_v2, %s3594_s6  ;;  %v4293_v59 = vcombine.low %v4136_v43, %v253_v62  ;;  %v4307_v62 = vor.u32 %v915_v32, %v914_v40  ;;  %v1041_v40 = vsel %vm1033_vm7, %v3708_v16, %v4214_v34  ;;  %v895_v32 = vrot.slane %v4224_v39, 3 }
  0xbc   : > { %v598_v61 = vpop.permute.xlu0 %597  ;;  %v912_v25 = vor.u32 %v911_v19, %v910_v6  ;;  %v764_v34 = vrot.slane %v3908_v22, 2 }
  0xbd   : > { %v600_v11 = vpop.permute.xlu1 %599  ;;  %v470_v23 = vshll.u32 %v4293_v59, 16 }
  0xbe   : > { %611 = vrot.lane.b32.xlu0 %v4242_v33, %s3592_s4  ;;  %v913_v19 = vsel %vm853_vm4, %v4277_v31, %v912_v25  ;;  %v917_v55 = vsel %vm853_vm4, %v912_v25, %v4307_v62 }
  0xbf   : > { %723 = vrot.lane.b32.xlu1 %v672_v28, %s3596_s18 }
  0xc0   : > { %v712_v24 = vpop.permute.xlu0 %711 }
  0xc1   : > { %v714_v28 = vpop.permute.xlu1 %713 }
  0xc2   : > { %800 = vrot.lane.b32.xlu0 %v771_v38, %s3594_s6 }
  0xc3   : > { %842 = vrot.lane.b32.xlu1 %v771_v38, %s3597_s19  ;;  %v762_v38 = vrot.slane %v4208_v45, 2 }
  0xc4   : > { %v779_v27 = vpop.permute.xlu0 %778 }
  0xc5   : > { %v781_v12 = vpop.permute.xlu1 %780  ;;  %v763_v43 = vsel %vm5754_vm1, %v760_v49, %v762_v38 }
  0xc6   : > { %725 = vrot.lane.b32.xlu0 %v676_v26, %s3596_s18 }
  0xc7   : > { %790 = vrot.lane.b32.xlu1 %v4090_v52, %s3594_s6  ;;  %v1039_v52 = vsel %vm1033_vm7, %v3695_v4, %v4193_v9  ;;  %v991_v4 = vrot.slane %v4063_v46, 3  ;;  %v993_v9 = vrot.slane %v4151_v58, 3 }
  0xc8   : > { %v823_v6 = vpop.permute.xlu0 %822  ;;  %v1073_v54 = vsel %vm1067_vm8, %v1039_v52, %v549_v3 }
  0xc9   : > { %v825_v26 = vpop.permute.xlu1 %824  ;;  %v1106_v14 = vsel %vm5762_vm9, %v1073_v54, %v598_v61  ;;  %v894_v61 = vrot.slane %v4227_v42, 2 }
  0xca   : > { %844 = vrot.lane.b32.xlu0 %v4286_v15, %s3597_s19  ;;  %v1139_v47 = vsel %vm1133_vm10, %v1106_v14, %v712_v24  ;;  %v1075_v24 = vsel %vm1067_vm8, %v1041_v40, %v4234_v5 }
  0xcb   : > { %956 = vrot.lane.b32.xlu1 %v913_v19, %s3598_s21  ;;  %v468_v19 = vor.u32 %v4145_v50, %v464_v63  ;;  %v1172_v49 = vsel %vm1166_vm11, %v1139_v47, %v779_v27  ;;  %v472_v63 = vrot.slane %v470_v23, 1  ;;  %v1108_v16 = vsel %vm5762_vm9, %v1075_v24, %v600_v11 }
  0xcc   : > { %v937_v17 = vpop.permute.xlu0 %936  ;;  %v1205_v14 = vsel %vm5758_vm12, %v1172_v49, %v823_v6  ;;  %v994_v27 = vsel %vm967_vm5, %v991_v4, %v993_v9  ;;  %v1141_v5 = vsel %vm1133_vm10, %v1108_v16, %v714_v28  ;;  %v896_v11 = vor.u32 %v895_v32, %v894_v61 }
  0xcd   : > { %v939_v3 = vpop.permute.xlu1 %938  ;;  %v1238_v47 = vsel %vm5757_vm13, %v1205_v14, %v937_v17  ;;  %v1174_v54 = vsel %vm1166_vm11, %v1141_v5, %v781_v12  ;;  %v473_v25 = vsel %vm349_vm2, %v468_v19, %v472_v63  ;;  %v4348_v28 = vsel %vm5754_vm1, %v762_v38, %v764_v34 }
  0xce   : > { %792 = vrot.lane.b32.xlu0 %v763_v43, %s3594_s6  ;;  %v1207_v17 = vsel %vm5758_vm12, %v1174_v54, %v825_v26  ;;  %v995_v12 = vrot.slane %v4260_v21, 3  ;;  %v474_v26 = vshrl.u32 %v4293_v59, 16  ;;  %v542_v61 = vrot.slane %v4293_v59, 1 }
  0xcf   : > { %834 = vrot.lane.b32.xlu1 %v763_v43, %s3597_s19  ;;  %v1240_v23 = vsel %vm5757_vm13, %v1207_v17, %v939_v3  ;;  %v897_v3 = vsel %vm853_vm4, %v4109_v20, %v896_v11  ;;  %v985_v16 = vrot.slane %v4208_v45, 3  ;;  %v258_v20 = vld [vmem:[%s3686_s30 + $0x84] sm:$0x7]  ;;  %v901_v59 = vsel %vm853_vm4, %v896_v11, %v3939_v37 }
  0xd0   : > { %v1006_v50 = vpop.permute.xlu0 %1005  ;;  %v996_v19 = vsel %vm967_vm5, %v993_v9, %v995_v12  ;;  %v476_v24 = vor.u32 %v474_v26, %v472_v63  ;;  %v436_v9 = vor.u32 %v4083_v48, %v432_v0  ;;  %v440_v63 = vrot.slane %v4224_v39, 1 }
  0xd1   : > { %v486_v6 = vpop.permute.xlu1 %485  ;;  %v1271_v52 = vsel %vm5756_vm14, %v1238_v47, %v1006_v50  ;;  %v3076_v50 = vcombine.low %v4250_v1, %v258_v20  ;;  %v987_v48 = vrot.slane %v3908_v22, 3 }
  0xd2   : > { %958 = vrot.lane.b32.xlu0 %v917_v55, %s3598_s21  ;;  %3269 = vmatprep.mubr.msk.bf16.mxu0 %vm5755_vm15, %v1271_v52  ;;  %v543_v55 = vsel %vm512_vm0, %v4130_v44, %v542_v61  ;;  %v441_v54 = vsel %vm349_vm2, %v436_v9, %v440_v63  ;;  %v444_v1 = vor.u32 %v4227_v42, %v440_v63  ;;  %v5769_v42 = vrot.slane %v3922_v30, 1 }
  0xd3   : > { %1025 = vrot.lane.b32.xlu1 %v994_v27, %s3599_s23  ;;  %v5765_v27 = vrot.slane %v4058_v41, 3  ;;  %v591_v56 = vrot.slane %v3076_v50, 1  ;;  %v5766_v41 = vrot.slane %v4151_v58, 1  ;;  %v988_v11 = vsel %vm967_vm5, %v985_v16, %v987_v48 }
  0xd4   : > { %v1008_v43 = vpop.permute.xlu0 %1007 }
  0xd5   : > { %v488_v40 = vpop.permute.xlu1 %487  ;;  %v1273_v49 = vsel %vm5756_vm14, %v1240_v23, %v1008_v43  ;;  %v986_v5 = vsel %vm967_vm5, %v5765_v27, %v985_v16  ;;  %v592_v39 = vsel %vm512_vm0, %v5766_v41, %v591_v56  ;;  %v5767_v23 = vshrl.u32 %v4260_v21, 16  ;;  %v4442_v41 = vld [vmem:[%s3686_s30 + $0x88] sm:$0xff]  }
  0xd6   : > { %505 = vrot.lane.b32.xlu0 %v473_v25, %s3595_s7  ;;  %3270 = vmatmul.mubr.msk.bf16.gmra.mrb[4].mxu0 %vm5755_vm15, %v1273_v49  ;;  %v5768_v49 = vshll.u32 %v4260_v21, 16 }
  0xd7   : > { %836 = vrot.lane.b32.xlu1 %v4348_v28, %s3597_s19  ;;  %v701_v43 = vrot.slane %v5767_v23, 1  ;;  %v4454_v23 = vld [vmem:[%s3686_s30 + $0x88] sm:$0xf] }
  0xd8   : > { %v553_v38 = vpop.permute.xlu0 %552  ;;  %v704_v26 = vrot.slane %v5768_v49, 2 }
  0xd9   : > { %v555_v32 = vpop.permute.xlu1 %554 }
  0xda   : > { %948 = vrot.lane.b32.xlu0 %v897_v3, %s3598_s21  ;;  %v705_v20 = vor.u32 %v704_v26, %v701_v43  ;;  %v816_v43 = vrot.slane %v4442_v41, 2 }
  0xdb   : > { %1027 = vrot.lane.b32.xlu1 %v996_v19, %s3599_s23  ;;  %v3502_v19 = vld [vmem:[%s3686_s30 + $0x20] sm:$0xff]  }
  0xdc   : > { %v602_v14 = vpop.permute.xlu0 %601  ;;  %v706_v27 = vsel %vm628_vm3, %v4205_v13, %v705_v20  ;;  %v5770_v13 = vrot.slane %v3908_v22, 1 }
  0xdd   : > { %v604_v47 = vpop.permute.xlu1 %603 }
  0xde   : > { %507 = vrot.lane.b32.xlu0 %v476_v24, %s3595_s7  ;;  %v449_v24 = vsel %vm349_vm2, %v444_v1, %v5769_v42  ;;  %v4448_v1 = vld [vmem:[%s3686_s30 + $0x80] sm:$0xf] }
  0xdf   : > { %572 = vrot.lane.b32.xlu1 %v543_v55, %s3593_s5 }
  0xe0   : > { %v716_v44 = vpop.permute.xlu0 %715 }
  0xe1   : > { %v718_v52 = vpop.permute.xlu1 %717 }
  0xe2   : > { %950 = vrot.lane.b32.xlu0 %v901_v59, %s3598_s21 }
  0xe3   : > { %1017 = vrot.lane.b32.xlu1 %v986_v5, %s3599_s23 }
  0xe4   : > { %v783_v17 = vpop.permute.xlu0 %782 }
  0xe5   : > { %v785_v0 = vpop.permute.xlu1 %784 }
  0xe6   : > { %497 = vrot.lane.b32.xlu0 %v441_v54, %s3595_s7 }
  0xe7   : > { %574 = vrot.lane.b32.xlu1 %v542_v61, %s3593_s5  ;;  %v1043_v61 = vsel %vm1033_vm7, %v3502_v19, %v486_v6  ;;  %v1045_v6 = vsel %vm1033_vm7, %v3809_v35, %v488_v40  ;;  %v919_v19 = vshrl.u32 %v4442_v41, 16 }
  0xe8   : > { %v827_v25 = vpop.permute.xlu0 %826  ;;  %v1077_v58 = vsel %vm1067_vm8, %v1043_v61, %v553_v38  ;;  %v1079_v38 = vsel %vm1067_vm8, %v1045_v6, %v555_v32  ;;  %v922_v61 = vshll.u32 %v4442_v41, 16 }
  0xe9   : > { %v829_v3 = vpop.permute.xlu1 %828  ;;  %v1110_v55 = vsel %vm5762_vm9, %v1077_v58, %v602_v14  ;;  %v1112_v14 = vsel %vm5762_vm9, %v1079_v38, %v604_v47  ;;  %v5771_v47 = vrot.slane %v4208_v45, 1  ;;  %v2462_v45 = vld [vmem:[%s3686_s30 + $0x7c] sm:$0xc] }
  0xea   : > { %621 = vrot.lane.b32.xlu0 %v592_v39, %s3592_s4  ;;  %v1143_v59 = vsel %vm1133_vm10, %v1110_v55, %v716_v44  ;;  %v1145_v35 = vsel %vm1133_vm10, %v1112_v14, %v718_v52  ;;  %v4461_v49 = vcombine.low %v2462_v45, %v4448_v1 }
  0xeb   : > { %1019 = vrot.lane.b32.xlu1 %v988_v11, %s3599_s23  ;;  %v1176_v63 = vsel %vm1166_vm11, %v1143_v59, %v783_v17  ;;  %v1178_v5 = vsel %vm1166_vm11, %v1145_v35, %v785_v0  ;;  %v537_v52 = vsel %vm512_vm0, %v5771_v47, %v5770_v13  ;;  %v2464_v11 = vld [vmem:[%s3686_s30 + $0x84] sm:$0xf]  ;;  %v4502_v35 = vld [vmem:[%s3686_s30 + $0x90] ss:$0 sps:$4 sm:$0x11]  }
  0xec   : > { %v941_v16 = vpop.permute.xlu0 %940  ;;  %v1209_v30 = vsel %vm5758_vm12, %v1176_v63, %v827_v25  ;;  %v4469_v58 = vcombine.low %v2464_v11, %v4454_v23  ;;  %v5772_v11 = vrot.slane %v3981_v60, 2 }
  0xed   : > { %v943_v9 = vpop.permute.xlu1 %942  ;;  %v1242_v50 = vsel %vm5757_vm13, %v1209_v30, %v941_v16  ;;  %v921_v16 = vrot.slane %v919_v19, 2 }
  0xee   : > { %499 = vrot.lane.b32.xlu0 %v449_v24, %s3595_s7  ;;  %v2467_v24 = vld [vmem:[%s3686_s30 + $0x90] sm:$0x1] }
  0xef   : > { %564 = vrot.lane.b32.xlu1 %v4242_v33, %s3593_s5  ;;  %v1211_v33 = vsel %vm5758_vm12, %v1178_v5, %v829_v3  ;;  %v680_v3 = vsel %vm628_vm3, %v4257_v36, %v3995_v7  ;;  %v817_v7 = vsel %vm5754_vm1, %v4273_v57, %v816_v43  ;;  %v2498_v36 = vshll.u32 %v4461_v49, 16 }
  0xf0   : > { %v1010_v44 = vpop.permute.xlu0 %1009  ;;  %v1244_v54 = vsel %vm5757_vm13, %v1211_v33, %v943_v9  ;;  %v2503_v9 = vshll.u32 %v4469_v58, 16 }
  0xf1   : > { %v4421_v40 = vpop.permute.xlu1 %489  ;;  %v1275_v32 = vsel %vm5756_vm14, %v1242_v50, %v1010_v44  ;;  %v2500_v63 = vrot.slane %v2498_v36, 1  ;;  %v2507_v50 = vshrl.u32 %v4469_v58, 16  ;;  %v902_v36 = vrot.slane %v4002_v10, 2 }
  0xf2   : > { %623 = vrot.lane.b32.xlu0 %v591_v56, %s3592_s4  ;;  %3273 = vmatprep.mubr.msk.bf16.mxu0 %vm5755_vm15, %v1275_v32  ;;  %v2505_v14 = vrot.slane %v2503_v9, 1  ;;  %v1047_v45 = vsel %vm1033_vm7, %v3839_v51, %v4421_v40  ;;  %v997_v51 = vrot.slane %v4442_v41, 3  ;;  %v2528_v41 = vrot.slane %v4469_v58, 1  ;;  %v4547_v9 = vld [vmem:[%s3686_s30 + $0x90] sm:$0xf] }
  0xf3   : > { %735 = vrot.lane.b32.xlu1 %v706_v27, %s3596_s18 }
  0xf4   : > { %v1012_v17 = vpop.permute.xlu0 %1011  ;;  %v2509_v33 = vor.u32 %v2507_v50, %v2505_v14 }
  0xf5   : > { %v4435_v0 = vpop.permute.xlu1 %491  ;;  %v1277_v56 = vsel %vm5756_vm14, %v1244_v54, %v1012_v17  ;;  %v2468_v17 = vld [vmem:[%s3686_s30 + $0x7c] sm:$0x8] }
  0xf6   : > { %566 = vrot.lane.b32.xlu0 %v537_v52, %s3593_s5  ;;  %3274 = vmatmul.mubr.msk.bf16.gmra.mrb[8].mxu0 %vm5755_vm15, %v1277_v56  ;;  %v3170_v19 = vcombine.low %v2468_v17, %v4448_v1 }
  0xf7   : > { %613 = vrot.lane.b32.xlu1 %v537_v52, %s3592_s4  ;;  %v3600_v52 = vmov 0.0  }
  0xf8   : > { %v4444_v39 = vpop.permute.xlu0 %556  ;;  %3297 = vmatprep.subr.bf16.mxu1 %v3600_v52 }
  0xf9   : > { %v4450_v25 = vpop.permute.xlu1 %558 }
  0xfa   : > { %737 = vrot.lane.b32.xlu0 %v705_v20, %s3596_s18  ;;  %v924_v20 = vrot.slane %v922_v61, 3  ;;  %v1081_v61 = vsel %vm1067_vm8, %v1047_v45, %v4444_v39  ;;  %v999_v45 = vrot.slane %v4502_v35, 3 }
  0xfb   : > { %802 = vrot.lane.b32.xlu1 %v4286_v15, %s3594_s6  ;;  %v4474_v15 = vld [vmem:[%s3686_s30 + $0x8c] sm:$0xf] }
  0xfc   : > { %v606_v26 = vpop.permute.xlu0 %605  ;;  %v4484_v59 = vcombine.low %v4474_v15, %v2467_v24  ;;  %v925_v30 = vor.u32 %v924_v20, %v921_v16  ;;  %v2527_v20 = vrot.slane %v3170_v19, 1  ;;  %v3172_v21 = vcombine.low %v4474_v15, %v4547_v9 }
  0xfd   : > { %v4471_v42 = vpop.permute.xlu1 %607  ;;  %v1114_v40 = vsel %vm5762_vm9, %v1081_v61, %v606_v26  ;;  %v2469_v26 = vld [vmem:[%s3686_s30 + $0x84] sm:$0x8] }
  0xfe   : > { %615 = vrot.lane.b32.xlu0 %v4114_v53, %s3592_s4  ;;  %v2496_v53 = vshrl.u32 %v4461_v49, 16  ;;  %v2511_v44 = vshll.u32 %v4484_v59, 16  ;;  %v926_v5 = vsel %vm853_vm4, %v4307_v62, %v925_v30  ;;  %v3171_v50 = vcombine.low %v2469_v26, %v4454_v23 }
  0xff   : > { %727 = vrot.lane.b32.xlu1 %v680_v3, %s3596_s18  ;;  %v2572_v61 = vshrl.u32 %v3172_v21, 16 }
 0x100   : > { %v720_v55 = vpop.permute.xlu0 %719  ;;  %v4506_v13 = vrot.slane %v2511_v44, 1  ;;  %v2529_v44 = vsel %vm512_vm0, %v2527_v20, %v2528_v41  ;;  %v2549_v17 = vrot.slane %v3171_v50, 1  ;;  %v2567_v19 = vshll.u32 %v3171_v50, 16 }
 0x101   : > { %v4487_v6 = vpop.permute.xlu1 %721  ;;  %v1147_v16 = vsel %vm1133_vm10, %v1114_v40, %v720_v55  ;;  %v2530_v55 = vrot.slane %v4484_v59, 1  ;;  %v2575_v40 = vshll.u32 %v3172_v21, 16 }
 0x102   : > { %804 = vrot.lane.b32.xlu0 %v4273_v57, %s3594_s6  ;;  %v2501_v57 = vor.u32 %v2500_v63, %v2496_v53  ;;  %v2514_v62 = vsel %vm349_vm2, %v2509_v33, %v4506_v13  ;;  %v4574_v33 = vld [vmem:[%s3686_s30 + $0x94] sm:$0xf]  ;;  %v2569_v26 = vrot.slane %v2567_v19, 2 }
 0x103   : > { %846 = vrot.lane.b32.xlu1 %v817_v7, %s3597_s19 }
 0x104   : > { %v787_v38 = vpop.permute.xlu0 %786 }
 0x105   : > { %v4495_v27 = vpop.permute.xlu1 %788  ;;  %v1180_v1 = vsel %vm1166_vm11, %v1147_v16, %v787_v38 }
 0x106   : > { %729 = vrot.lane.b32.xlu0 %v4037_v29, %s3596_s18  ;;  %v2506_v29 = vsel %vm349_vm2, %v2501_v57, %v2505_v14  ;;  %vm5752_vm2 = vcmask 1040384  }
 0x107   : > { %794 = vrot.lane.b32.xlu1 %v4348_v28, %s3594_s6  ;;  %v928_v28 = vshll.u32 %v4502_v35, 16 }
 0x108   : > { %v831_v32 = vpop.permute.xlu0 %830 }
 0x109   : > { %v4508_v47 = vpop.permute.xlu1 %501  ;;  %v930_v3 = vrot.slane %v928_v28, 3  ;;  %v1213_v10 = vsel %vm5758_vm12, %v1180_v1, %v831_v32  ;;  %v4578_v28 = vld [vmem:[%s3686_s30 + $0x98] sm:$0x3] }
 0x10a   : > { %848 = vrot.lane.b32.xlu0 %v816_v43, %s3597_s19  ;;  %v767_v43 = vsel %vm5754_vm1, %v764_v34, %v5772_v11  ;;  %v903_v34 = vrot.slane %v3999_v8, 3  ;;  %v998_v8 = vsel %vm967_vm5, %v995_v12, %v997_v51  ;;  %v1049_v12 = vsel %vm1033_vm7, %v3896_v18, %v4435_v0 }
 0x10b   : > { %960 = vrot.lane.b32.xlu1 %v926_v5, %s3598_s21  ;;  %v931_v39 = vsel %vm853_vm4, %v925_v30, %v930_v3  ;;  %v1083_v57 = vsel %vm1067_vm8, %v1049_v12, %v4450_v25  ;;  %v2531_v5 = vsel %vm512_vm0, %v2528_v41, %v2530_v55 }
 0x10c   : > { %v833_v54 = vpop.permute.xlu0 %832  ;;  %v904_v30 = vor.u32 %v903_v34, %v902_v36  ;;  %v1116_v18 = vsel %vm5762_vm9, %v1083_v57, %v4471_v42 }
 0x10d   : > { %v945_v56 = vpop.permute.xlu1 %944  ;;  %v1149_v25 = vsel %vm1133_vm10, %v1116_v18, %v4487_v6  ;;  %v4639_v18 = vld [vmem:[%s3686_s30 + $0x98] sm:$0xff]  }
 0x10e   : > { %2518 = vrot.lane.b32.xlu0 %v2506_v29, %s3595_s7  ;;  %v1246_v63 = vsel %vm5757_vm13, %v1213_v10, %v945_v56  ;;  %v2472_v29 = vld [vmem:[%s3686_s30 + $0x98] sm:$0x1]  ;;  %v2550_v56 = vrot.slane %v3172_v21, 1  ;;  %v1182_v11 = vsel %vm1166_vm11, %v1149_v25, %v4495_v27  ;;  %v2574_v10 = vrot.slane %v2572_v61, 1 }
 0x10f   : > { %2520 = vrot.lane.b32.xlu1 %v2514_v62, %s3595_s7  ;;  %v905_v62 = vsel %vm853_vm4, %v3939_v37, %v904_v30  ;;  %v3173_v42 = vcombine.low %v4574_v33, %v2472_v29  ;;  %v3174_v37 = vcombine.low %v4574_v33, %v4578_v28  ;;  %v1215_v3 = vsel %vm5758_vm12, %v1182_v11, %v833_v54 }
 0x110   : > { %v4531_v24 = vpop.permute.xlu0 %503  ;;  %v2551_v34 = vsel %vm512_vm0, %v2549_v17, %v2550_v56  ;;  %v1000_v54 = vsel %vm967_vm5, %v997_v51, %v999_v45  ;;  %v989_v51 = vrot.slane %v3981_v60, 3  ;;  %v2644_v45 = vshll.u32 %v4639_v18, 16 }
 0x111   : > { %v4535_v7 = vpop.permute.xlu1 %568  ;;  %v4607_v16 = vrot.slane %v3173_v42, 1  ;;  %v2581_v1 = vshrl.u32 %v3174_v37, 16 }
 0x112   : > { %796 = vrot.lane.b32.xlu0 %v767_v43, %s3594_s6  ;;  %v990_v60 = vsel %vm967_vm5, %v987_v48, %v989_v51  ;;  %v992_v22 = vsel %vm967_vm5, %v989_v51, %v991_v4  ;;  %v2618_v4 = vrot.slane %v4639_v18, 6  ;;  %v2646_v19 = vrot.slane %v2644_v45, 7 }
 0x113   : > { %838 = vrot.lane.b32.xlu1 %v767_v43, %s3597_s19  ;;  %v2564_v43 = vshrl.u32 %v3171_v50, 16  ;;  %v909_v50 = vsel %vm853_vm4, %v904_v30, %v4277_v31  ;;  %v3176_v31 = vcombine.low %v4547_v9, %v4574_v33 }
 0x114   : > { %v947_v53 = vpop.permute.xlu0 %946 }
 0x115   : > { %v1014_v38 = vpop.permute.xlu1 %1013  ;;  %v1248_v35 = vsel %vm5757_vm13, %v1215_v3, %v947_v53  ;;  %v2566_v20 = vrot.slane %v2564_v43, 1  ;;  %v2577_v53 = vrot.slane %v2575_v40, 2  ;;  %v2633_v25 = vshrl.u32 %v3176_v31, 16  ;;  %v2478_v40 = vld [vmem:[%s3686_s30 + $0x90] sm:$0xe] }
 0x116   : > { %v1279_v14 = vsel %vm5756_vm14, %v1246_v63, %v1014_v38  ;;  %962 = vrot.lane.b32.xlu0 %v931_v39, %s3598_s21  ;;  %v2584_v39 = vshll.u32 %v3174_v37, 16  ;;  %v2583_v63 = vrot.slane %v2581_v1, 1  ;;  %v2636_v17 = vshll.u32 %v3176_v31, 16 }
 0x117   : > { %1029 = vrot.lane.b32.xlu1 %v998_v8, %s3599_s23  ;;  %3277 = vmatprep.mubr.msk.bf16.mxu0 %vm5755_vm15, %v1279_v14  ;;  %v2570_v21 = vor.u32 %v2569_v26, %v2566_v20  ;;  %v2578_v12 = vor.u32 %v2577_v53, %v2574_v10  ;;  %v2635_v43 = vrot.slane %v2633_v25, 6  ;;  %v2669_v10 = vrot.slane %v4639_v18, 7 }
 0x118   : > { %v4568_v32 = vpop.permute.xlu0 %493  ;;  %v2586_v38 = vrot.slane %v2584_v39, 2  ;;  %v2638_v37 = vrot.slane %v2636_v17, 7 }
 0x119   : > { %v4582_v0 = vpop.permute.xlu1 %570  ;;  %v2579_v29 = vsel %vm628_vm3, %v2570_v21, %v2578_v12  ;;  %v3503_v21 = vld [vmem:[%s3686_s30 + $0x60] sm:$0xff]  }
 0x11a   : > { %2532 = vrot.lane.b32.xlu0 %v2529_v44, %s3593_s5  ;;  %v4629_v57 = vor.u32 %v2586_v38, %v2583_v63 }
 0x11b   : > { %2534 = vrot.lane.b32.xlu1 %v2531_v5, %s3593_s5  ;;  %v3175_v5 = vcombine.low %v4454_v23, %v4474_v15  ;;  %v4650_v15 = vrot.slane %v3176_v31, 6 }
 0x11c   : > { %v4597_v6 = vpop.permute.xlu0 %617  ;;  %v2588_v48 = vsel %vm628_vm3, %v2578_v12, %v4629_v57  ;;  %v1059_v12 = vsel %vm1033_vm7, %v3503_v21, %v4508_v47 }
 0x11d   : > { %v1016_v36 = vpop.permute.xlu1 %1015  ;;  %v2599_v23 = vrot.slane %v3175_v5, 6 }
 0x11e   : > { %v1281_v27 = vsel %vm5756_vm14, %v1248_v35, %v1016_v36  ;;  %840 = vrot.lane.b32.xlu0 %v4232_v2, %s3597_s19  ;;  %v2553_v2 = vsel %vm512_vm0, %v2550_v56, %v4607_v16  ;;  %v2641_v56 = vshrl.u32 %v4639_v18, 16  ;;  %v2619_v36 = vsel %vm5753_vm6, %v4650_v15, %v2618_v4 }
 0x11f   : > { %952 = vrot.lane.b32.xlu1 %v905_v62, %s3598_s21  ;;  %3278 = vmatmul.mubr.msk.bf16.gmra.mrb[12].mxu0 %vm5755_vm15, %v1281_v27  ;;  %v2601_v46 = vsel %vm5753_vm6, %v2599_v23, %v4650_v15  ;;  %v2639_v27 = vor.u32 %v2638_v37, %v2635_v43  ;;  %vm2631_vm0 = vsmask.f32 1280 }
 0x120   : > { %v4609_v41 = vpop.permute.xlu0 %495  ;;  %v2643_v3 = vrot.slane %v2641_v56, 6 }
 0x121   : > { %v4611_v8 = vpop.permute.xlu1 %560 }
 0x122   : > { %1031 = vrot.lane.b32.xlu0 %v1000_v54, %s3599_s23  ;;  %v3181_v54 = vcombine.low %v2478_v40, %v4574_v33  ;;  %v2515_v33 = vshrl.u32 %v4484_v59, 16 }
 0x123   : > { %2554 = vrot.lane.b32.xlu1 %v2551_v34, %s3592_s4  ;;  %v4674_v34 = vor.u32 %v2646_v19, %v2643_v3 }
 0x124   : > { %v4618_v14 = vpop.permute.xlu0 %619  ;;  %v2668_v26 = vrot.slane %v3181_v54, 7 }
 0x125   : > { %v4622_v44 = vpop.permute.xlu1 %731  ;;  %v2648_v20 = vsel %vm2631_vm0, %v2639_v27, %v4674_v34 }
 0x126   : > { %2556 = vrot.lane.b32.xlu0 %v2553_v2, %s3592_s4  ;;  %v3497_v2 = vld [vmem:[%s3686_s30 + $0xa0] ss:$0 sps:$4 sm:$0x77]   ;;  %v2670_v63 = vsel %vm5752_vm2, %v2668_v26, %v2669_v10 }
 0x127   : > { %954 = vrot.lane.b32.xlu1 %v909_v50, %s3598_s21  ;;  %v2517_v50 = vor.u32 %v2515_v33, %v4506_v13  ;;  %v2650_v5 = vshrl.u32 %v3497_v2, 16  ;;  %v2653_v31 = vshll.u32 %v3497_v2, 16  ;;  %v2671_v40 = vrot.slane %v3497_v2, 7 }
 0x128   : > { %v4635_v30 = vpop.permute.xlu0 %562 }
 0x129   : > { %v4641_v62 = vpop.permute.xlu1 %609  ;;  %v2652_v25 = vrot.slane %v2650_v5, 6  ;;  %v2655_v17 = vrot.slane %v2653_v31, 7 }
 0x12a   : > { %1021 = vrot.lane.b32.xlu0 %v990_v60, %s3599_s23  ;;  %v3177_v60 = vcombine.low %v4578_v28, %v4578_v28 }
 0x12b   : > { %2589 = vrot.lane.b32.xlu1 %v2579_v29, %s3596_s18  ;;  %v1093_v29 = vsel %vm1067_vm8, %v1059_v12, %v4535_v7  ;;  %v2656_v37 = vor.u32 %v2655_v17, %v2652_v25 }
 0x12c   : > { %v4652_v9 = vpop.permute.xlu0 %733  ;;  %v1126_v13 = vsel %vm5762_vm9, %v1093_v29, %v4597_v6  ;;  %v2602_v7 = vrot.slane %v3177_v60, 6  ;;  %v3506_v60 = vld [vmem:[%s3686_s30 + $0x48] sm:$0xff]  }
 0x12d   : > { %v799_v11 = vpop.permute.xlu1 %798  ;;  %v1159_v47 = vsel %vm1133_vm10, %v1126_v13, %v4622_v44  ;;  %v2657_v18 = vsel %vm2631_vm0, %v4674_v34, %v2656_v37  ;;  %v1516_v13 = vlaneseq }
 0x12e   : > { %2591 = vrot.lane.b32.xlu0 %v2588_v48, %s3596_s18  ;;  %v3496_v48 = vld [vmem:[%s3686_s30 + $0xa0] ss:$0 sps:$4 sm:$0x33]   ;;  %v1192_v28 = vsel %vm1166_vm11, %v1159_v47, %v799_v11  ;;  %v3504_v11 = vld [vmem:[%s3686_s30 + $0x68] sm:$0xff]  }
 0x12f   : > { %1023 = vrot.lane.b32.xlu1 %v992_v22, %s3599_s23  ;;  %v2620_v6 = vrot.slane %v3496_v48, 6  ;;  %v1061_v59 = vsel %vm1033_vm7, %v3504_v11, %v4531_v24  ;;  %v4802_v25 = vshrl.u32 %v1516_v13, 7 }
 0x130   : > { %v4661_v42 = vpop.permute.xlu0 %611  ;;  %v1095_v3 = vsel %vm1067_vm8, %v1061_v59, %v4582_v0 }
 0x131   : > { %v4663_v61 = vpop.permute.xlu1 %723  ;;  %v1128_v24 = vsel %vm5762_vm9, %v1095_v3, %v4618_v14  ;;  %v3499_v14 = vld [vmem:[%s5741_s1] sm:$0xff]   ;;  %v1519_v17 = vadd.s32 16, %v4802_v25  ;;  %v1520_v11 = vadd.s32 24, %v4802_v25 }
 0x132   : > { %2604 = vrot.lane.b32.xlu0 %v2599_v23, %s3594_s6 }
 0x133   : > { %2606 = vrot.lane.b32.xlu1 %v2601_v46, %s3594_s6 }
 0x134   : > { %v4668_v35 = vpop.permute.xlu0 %800 }
 0x135   : > { %v843_v1 = vpop.permute.xlu1 %842 }
 0x136   : > { %2622 = vrot.lane.b32.xlu0 %v4650_v15, %s3597_s19  ;;  %v1225_v56 = vsel %vm5758_vm12, %v1192_v28, %v843_v1 }
 0x137   : > { %2624 = vrot.lane.b32.xlu1 %v2619_v36, %s3597_s19 }
 0x138   : > { %v4680_v39 = vpop.permute.xlu0 %725 }
 0x139   : > { %v4685_v53 = vpop.permute.xlu1 %790 }
 0x13a   : > { %2658 = vrot.lane.b32.xlu0 %v2639_v27, %s3598_s21  ;;  %v2672_v27 = vsel %vm5752_vm2, %v2669_v10, %v2671_v40  ;;  %v3500_v10 = vld [vmem:[%s5741_s1 + $0x8] sm:$0xff]  }
 0x13b   : > { %2660 = vrot.lane.b32.xlu1 %v2648_v20, %s3598_s21 }
 0x13c   : > { %v845_v51 = vpop.permute.xlu0 %844 }
 0x13d   : > { %v957_v38 = vpop.permute.xlu1 %956 }
 0x13e   : > { %2673 = vrot.lane.b32.xlu0 %v2668_v26, %s3599_s23  ;;  %v1258_v46 = vsel %vm5757_vm13, %v1225_v56, %v957_v38  ;;  %v1518_v56 = vadd.s32 8, %v4802_v25 }
 0x13f   : > { %2675 = vrot.lane.b32.xlu1 %v2670_v63, %s3599_s23 }
 0x140   : > { %v4702_v22 = vpop.permute.xlu0 %792 }
 0x141   : > { %v835_v23 = vpop.permute.xlu1 %834 }
 0x142   : > { %2522 = vrot.lane.b32.xlu0 %v2517_v50, %s3595_s7 }
 0x143   : > { %2536 = vrot.lane.b32.xlu1 %v2530_v55, %s3593_s5  ;;  %v2603_v55 = vsel %vm5753_vm6, %v4650_v15, %v2602_v7 }
 0x144   : > { %v959_v45 = vpop.permute.xlu0 %958 }
 0x145   : > { %v1026_v43 = vpop.permute.xlu1 %1025 }
 0x146   : > { %2558 = vrot.lane.b32.xlu0 %v4607_v16, %s3592_s4  ;;  %v1291_v44 = vsel %vm5756_vm14, %v1258_v46, %v1026_v43  ;;  %v2621_v16 = vsel %vm5753_vm6, %v2618_v4, %v2620_v6  ;;  %v4815_v6 = vmul.u32.u64.low 3817748708, %v1519_v17  ;;  %v4816_v46 = vmul.u32.u64.high 3817748708, %v1519_v17, %v4815_v6 }
 0x147   : > { %3289 = vmatprep.mubr.msk.bf16.mxu1 %vm5755_vm15, %v1291_v44  ;;  %2593 = vrot.lane.b32.xlu1 %v4629_v57, %s3596_s18  ;;  %v1161_v57 = vsel %vm1133_vm10, %v1128_v24, %v4652_v9  ;;  %v4819_v43 = vmul.u32.u64.low 3817748708, %v4802_v25  ;;  %v4820_v44 = vmul.u32.u64.high 3817748708, %v4802_v25, %v4819_v43 }
 0x148   : > { %v4729_v19 = vpop.permute.xlu0 %505  ;;  %v1194_v0 = vsel %vm1166_vm11, %v1161_v57, %v4668_v35  ;;  %v3505_v35 = vld [vmem:[%s3686_s30 + $0x40] sm:$0xff]   ;;  %v1577_v57 = vshrl.u32 %v4816_v46, 4  ;;  %v252_v43 = vld [vmem:[%s3686_s30 + $0x7c] sm:$0x3] }
 0x149   : > { %v837_v36 = vpop.permute.xlu1 %836  ;;  %v1227_v15 = vsel %vm5758_vm12, %v1194_v0, %v845_v51  ;;  %v1051_v34 = vsel %vm1033_vm7, %v3505_v35, %v4568_v32  ;;  %v3501_v32 = vld [vmem:[%s5741_s1 + $0x10] ss:$0 sps:$4 sm:$0x33]   ;;  %v1555_v0 = vshrl.u32 %v4820_v44, 4 }
 0x14a   : > { %2608 = vrot.lane.b32.xlu0 %v2603_v55, %s3594_s6  ;;  %v1260_v9 = vsel %vm5757_vm13, %v1227_v15, %v959_v45  ;;  %v1085_v20 = vsel %vm1067_vm8, %v1051_v34, %v4611_v8  ;;  %v2766_v21 = vsel %vm5753_vm6, %v3501_v32, 0 }
 0x14b   : > { %2626 = vrot.lane.b32.xlu1 %v2621_v16, %s3597_s19  ;;  %v1118_v33 = vsel %vm5762_vm9, %v1085_v20, %v4641_v62  ;;  %v4825_v55 = vmul.u32.u64.low 3817748708, %v1518_v56  ;;  %v4826_v37 = vmul.u32.u64.high 3817748708, %v1518_v56, %v4825_v55  ;;  %s3194_s19 = sshll.u32 %s3582_s15, 5  ;;  %s3602_s15 = smov [#allocation2]  }
 0x14c   : > { %v949_v4 = vpop.permute.xlu0 %948  ;;  %v1151_v8 = vsel %vm1133_vm10, %v1118_v33, %v4663_v61  ;;  %v1053_v61 = vsel %vm1033_vm7, %v3506_v60, %v4609_v41  ;;  %v4830_v16 = vmul.u32.u64.low 3817748708, %v1520_v11  ;;  %v4831_v40 = vmul.u32.u64.high 3817748708, %v1520_v11, %v4830_v16  ;;  %s5692_s29 = scalar_lea.hbm %s5743_s3, %s3194_s19  ;;  %s3516_s6 = sshll.u32 %s3602_s15, 4  ;;  %s3517_s6 = int_to_ptr.vmem [resolvable:$false] %s3516_s6 }
 0x14d   : > { %v1028_v54 = vpop.permute.xlu1 %1027  ;;  %v1184_v51 = vsel %vm1166_vm11, %v1151_v8, %v4685_v53  ;;  %v1087_v53 = vsel %vm1067_vm8, %v1053_v61, %v4635_v30  ;;  %v1566_v15 = vshrl.u32 %v4826_v37, 4  ;;  %v4903_v37 = vadd.s32 56, %v4802_v25  ;;  %s3518_s7 = scalar_lea.vmem %s3517_s6, 64 }
 0x14e   : > { %v1293_v1 = vsel %vm5756_vm14, %v1260_v9, %v1028_v54  ;;  %2662 = vrot.lane.b32.xlu0 %v2657_v18, %s3598_s21  ;;  %v1217_v63 = vsel %vm5758_vm12, %v1184_v51, %v835_v23  ;;  %v1120_v31 = vsel %vm5762_vm9, %v1087_v53, %v4661_v42  ;;  %v1588_v9 = vshrl.u32 %v4831_v40, 4 }
 0x14f   : > { %3290 = vmatmul.mubr.msk.bf16.vlgmr.msra.gmra.mrb[0].mxu1 %vm5755_vm15, %v1293_v1  ;;  %2677 = vrot.lane.b32.xlu1 %v2672_v27, %s3599_s23  ;;  %v1250_v62 = vsel %vm5757_vm13, %v1217_v63, %v949_v4  ;;  %v1153_v48 = vsel %vm1133_vm10, %v1120_v31, %v4680_v39  ;;  %v1578_v27 = vmul.u32 18, %v1577_v57  ;;  %v1567_v1 = vmul.u32 18, %v1566_v15 }
 0x150   : > { %v4759_v26 = vpop.permute.xlu0 %507  ;;  %3298 = vmatpush3.bf16.msra.mxu1 %v3499_v14  ;;  %v1186_v41 = vsel %vm1166_vm11, %v1153_v48, %v4702_v22  ;;  %v1556_v14 = vmul.u32 18, %v1555_v0  ;;  %v4871_v48 = vadd.s32 48, %v4802_v25 }
 0x151   : > { %v4766_v2 = vpop.permute.xlu1 %572  ;;  %3299 = vmatprep.subr.bf16.mxu1 %v3600_v52  ;;  %v1219_v23 = vsel %vm5758_vm12, %v1186_v41, %v837_v36  ;;  %v1579_v34 = vsub.s32 %v1519_v17, %v1578_v27  ;;  %v1568_v32 = vsub.s32 %v1518_v56, %v1567_v1  ;;  %v3507_v17 = vld [vmem:[%s3686_s30 + $0x70] sm:$0xff]   ;;  %v3508_v27 = vld [vmem:[%s3686_s30 + $0x78] sm:$0xf] }
 0x152   : > { %v1557_v20 = vsub.s32 %v4802_v25, %v1556_v14  ;;  %v1063_v56 = vsel %vm1033_vm7, %v3507_v17, %v4729_v19  ;;  %v3071_v14 = vcombine.low %v3508_v27, %v252_v43 }
 0x153   : > { %vm1903_vm3 = vcmp.ne.s32.totalorder %v1579_v34, 0  ;;  %vm1935_vm4 = vcmp.lt.s32.totalorder %v1579_v34, 0  ;;  %vm1902_vm2 = vcmp.ne.s32.totalorder %v1568_v32, 0  ;;  %vm1934_vm6 = vcmp.lt.s32.totalorder %v1568_v32, 0 }
 0x154   : > { %v951_v38 = vpop.permute.xlu0 %950  ;;  %3300 = vmatpush3.bf16.msra.mxu1 %v3500_v10  ;;  %v1589_v10 = vmul.u32 18, %v1588_v9  ;;  %vm1901_vm5 = vcmp.ne.s32.totalorder %v1557_v20, 0  ;;  %vm1933_vm0 = vcmp.lt.s32.totalorder %v1557_v20, 0  ;;  %vm4854_vm1 = vmand %vm1935_vm4, %vm1903_vm3  ;;  %v1998_v60 = vadd.s32 18, %v1568_v32 }
 0x155   : > { %v1018_v50 = vpop.permute.xlu1 %1017  ;;  %3301 = vmatprep.subr.bf16.mxu1 %v3600_v52  ;;  %v1252_v30 = vsel %vm5757_vm13, %v1219_v23, %v951_v38  ;;  %v1999_v38 = vadd.s32 18, %v1579_v34  ;;  %vm4862_vm12 = vmand %vm1934_vm6, %vm1902_vm2  ;;  %v1097_v46 = vsel %vm1067_vm8, %v1063_v56, %v4766_v2  ;;  %vm5787_vm4 = vcmask 261120  }
 0x156   : > { %v1283_v12 = vsel %vm5756_vm14, %v1250_v62, %v1018_v50  ;;  %v1590_v51 = vsub.s32 %v1520_v11, %v1589_v10  ;;  %v4899_v11 = vmul.u32.u64.low 3817748708, %v4871_v48  ;;  %v4900_v55 = vmul.u32.u64.high 3817748708, %v4871_v48, %v4899_v11 }
 0x157   : > { %3281 = vmatprep.mubr.msk.bf16.mxu0 %vm5755_vm15, %v1283_v12  ;;  %v1997_v12 = vadd.s32 18, %v1557_v20  ;;  %v2031_v31 = vsel %vm4854_vm1, %v1999_v38, %v1579_v34  ;;  %v1066_v6 = vsel %vm1033_vm7, %v3071_v14, %v4759_v26 }
 0x158   : > { %v4787_v5 = vpop.permute.xlu0 %497  ;;  %3302 = vmatpush3.bf16.msra.mxu1 %v2766_v21  ;;  %vm1936_vm13 = vcmp.lt.s32.totalorder %v1590_v51, 0  ;;  %v2000_v41 = vadd.s32 18, %v1590_v51  ;;  %vm4889_vm1 = vcmp.lt.s32.totalorder %v2031_v31, 16  ;;  %v1621_v56 = vshrl.u32 %v4900_v55, 4 }
 0x159   : > { %v4791_v29 = vpop.permute.xlu1 %574  ;;  %v4931_v1 = vsel %vm4889_vm1, 1.0, %v3600_v52  ;;  %vm5791_vm1 = vmmov %vm5787_vm4 }
 0x15c   : > { %v4798_v47 = vpop.permute.xlu0 %621 }
 0x15d   : > { %v1020_v28 = vpop.permute.xlu1 %1019  ;;  %v1130_v19 = vsel %vm5762_vm9, %v1097_v46, %v4798_v47  ;;  %v4923_v47 = vadd.s32 40, %v4802_v25 }
 0x15e   : > { %v1285_v7 = vsel %vm5756_vm14, %v1252_v30, %v1020_v28  ;;  %vm1904_vm14 = vcmp.ne.s32.totalorder %v1590_v51, 0  ;;  %v2030_v28 = vsel %vm4862_vm12, %v1998_v60, %v1568_v32 }
 0x15f   : > { %3282 = vmatmul.mubr.msk.bf16.gmra.mrb[16].mxu0 %vm5755_vm15, %v1285_v7  ;;  %vm4858_vm15 = vmand %vm1933_vm0, %vm1901_vm5  ;;  %v4884_v7 = vadd.s32 32, %v4802_v25  ;;  %vm4912_vm12 = vcmp.lt.s32.totalorder %v2030_v28, 16  ;;  %v4938_v10 = vmul.u32.u64.low 3817748708, %v4903_v37  ;;  %v4939_v32 = vmul.u32.u64.high 3817748708, %v4903_v37, %v4938_v10 }
 0x160   : > { %v4805_v42 = vpop.permute.xlu0 %499  ;;  %v2029_v23 = vsel %vm4858_vm15, %v1997_v12, %v1557_v20  ;;  %vm4877_vm3 = vmand %vm1936_vm13, %vm1904_vm14  ;;  %vm5785_vm13 = vcmask 195584   ;;  %vm5786_vm14 = vcmask 228352   ;;  %vm5761_vm15 = vcmask 60416  }
 0x161   : > { %v4807_v39 = vpop.permute.xlu1 %564  ;;  %vm2061_vm6 = vcmp.lt.s32.totalorder %v2029_v23, 16  ;;  %v2032_v2 = vsel %vm4877_vm3, %v2000_v41, %v1590_v51  ;;  %v4919_v0 = vmul.u32.u64.low 3817748708, %v4884_v7  ;;  %v4920_v15 = vmul.u32.u64.high 3817748708, %v4884_v7, %v4919_v0  ;;  %vm5789_vm0 = vmmov %vm5785_vm13 }
 0x162   : > { %v4935_v20 = vsel %vm2061_vm6, 1.0, %v3600_v52  ;;  %vm2064_vm2 = vcmp.lt.s32.totalorder %v2032_v2, 16  ;;  %v4954_v12 = vmul.u32.u64.low 3817748708, %v4923_v47  ;;  %v4955_v60 = vmul.u32.u64.high 3817748708, %v4923_v47, %v4954_v12  ;;  %vm5790_vm3 = vmmov %vm5786_vm14 }
 0x163   : > { %vm5788_vm5 = vcmask 293888   ;;  %v4962_v23 = vsel %vm2064_vm2, 1.0, %v3600_v52  ;;  %v1099_v2 = vsel %vm1067_vm8, %v1066_v6, %v4791_v29  ;;  %v1599_v40 = vshrl.u32 %v4920_v15, 4  ;;  %vm5793_vm2 = vmmov %vm5789_vm0 }
 0x164   : > { %v4810_v22 = vpop.permute.xlu0 %623  ;;  %vm5792_vm6 = vmmov %vm5788_vm5 }
 0x165   : > { %v4813_v45 = vpop.permute.xlu1 %735  ;;  %v1132_v27 = vsel %vm5762_vm9, %v1099_v2, %v4810_v22 }
 0x166   : > { %v1163_v57 = vsel %vm1133_vm10, %v1130_v19, %v4813_v45 }
 0x168   : > { %v4823_v59 = vpop.permute.xlu0 %566 }
 0x169   : > { %v4828_v3 = vpop.permute.xlu1 %613 }
 0x16c   : > { %v4833_v24 = vpop.permute.xlu0 %737 }
 0x16d   : > { %v4835_v36 = vpop.permute.xlu1 %802  ;;  %v1165_v29 = vsel %vm1133_vm10, %v1132_v27, %v4833_v24 }
 0x16e   : > { %v1196_v9 = vsel %vm1166_vm11, %v1163_v57, %v4835_v36 }
 0x170   : > { %v4839_v18 = vpop.permute.xlu0 %615 }
 0x171   : > { %v4842_v4 = vpop.permute.xlu1 %727 }
 0x174   : > { %v4845_v54 = vpop.permute.xlu0 %804 }
 0x175   : > { %v847_v35 = vpop.permute.xlu1 %846 }
 0x176   : > { %v1229_v34 = vsel %vm5785_vm13, %v1196_v9, %v847_v35  ;;  %v4950_v35 = vsel %vm4912_vm12, 1.0, %v3600_v52  ;;  %v1622_v9 = vmul.u32 18, %v1621_v56  ;;  %vm5759_vm12 = vmmov 0  }
 0x178   : > { %v4848_v33 = vpop.permute.xlu0 %729 }
 0x179   : > { %v4850_v8 = vpop.permute.xlu1 %794 }
 0x17c   : > { %v4852_v63 = vpop.permute.xlu0 %848 }
 0x17d   : > { %v961_v62 = vpop.permute.xlu1 %960 }
 0x17e   : > { %v1262_v51 = vsel %vm5786_vm14, %v1229_v34, %v961_v62  ;;  %v1632_v34 = vshrl.u32 %v4939_v32, 4 }
 0x180   : > { %v4866_v53 = vpop.permute.xlu0 %2518 }
 0x181   : > { %v4873_v13 = vpop.permute.xlu1 %2520 }
 0x184   : > { %v4896_v44 = vpop.permute.xlu0 %796 }
 0x185   : > { %v4907_v16 = vpop.permute.xlu1 %838 }
 0x188   : > { %v963_v45 = vpop.permute.xlu0 %962 }
 0x189   : > { %v1030_v38 = vpop.permute.xlu1 %1029  ;;  %v3267_v36 = vpop.f32.mrb[0].mxu0 }
 0x18a   : > { %v1295_v50 = vsel %vm5787_vm4, %v1262_v51, %v1030_v38  ;;  %v3199_v21 = vpack.c.bf16 %v3267_v36, %v3267_v36  ;;  %v1389_v62 = vpop.f32.mrb[1].mxu0  ;;  %v2159_v46 = vmul.f32 %v3267_v36, %v4931_v1 }
 0x18b   : > { %v2157_v61 = vmul.f32 %v4935_v20, %v1389_v62  ;;  %v3197_v31 = vpack.c.bf16 %v1389_v62, %v1389_v62  ;;  %3293 = vmatprep.mubr.msk.bf16.mxu1 %vm5788_vm5, %v1295_v50  ;;  %v3268_v41 = vpop.f32.mrb[2].mxu0  ;;  %v1198_v50 = vsel %vm1166_vm11, %v1165_v29, %v4845_v54  ;;  %v1623_v54 = vsub.s32 %v4871_v48, %v1622_v9 }
 0x18c   : > { %2431 = vst.msk [vmem:[%s4945_s11 + $0x8] sm:$0xf] %vm5761_vm15, %v3199_v21  ;;  %v3200_v30 = vpack.c.bf16 %v3268_v41, %v3268_v41  ;;  %v1392_v28 = vpop.f32.mrb[3].mxu0  ;;  %v4964_v17 = vpop.permute.xlu0 %2532  ;;  %v2160_v57 = vmul.f32 %v3268_v41, %v4962_v23  ;;  %v2231_v10 = vmul.f32 %v3267_v36, %v2159_v46  ;;  %v1600_v21 = vmul.u32 18, %v1599_v40  ;;  %v3510_v40 = vld [vmem:[%s3686_s30 + $0x58] sm:$0xff]  }
 0x18d   : > { %2429 = vst.msk [vmem:[%s4945_s11] sm:$0xf] %vm5761_vm15, %v3197_v31  ;;  %v4972_v43 = vpop.permute.xlu1 %2534  ;;  %v2158_v11 = vmul.f32 %v4950_v35, %v1392_v28  ;;  %v3198_v19 = vpack.c.bf16 %v1392_v28, %v1392_v28  ;;  %v2229_v55 = vmul.f32 %v2157_v61, %v1389_v62  ;;  %v1610_v62 = vshrl.u32 %v4955_v60, 4  ;;  %v3509_v60 = vld [vmem:[%s3686_s30 + $0x50] sm:$0xff]  }
 0x18e   : > { %2432 = vst.msk [vmem:[%s4945_s11 + $0xc] sm:$0xf] %vm5761_vm15, %v3200_v30  ;;  %v1231_v22 = vsel %vm5789_vm0, %v1198_v50, %v4852_v63  ;;  %v2232_v12 = vmul.f32 %v3268_v41, %v2160_v57  ;;  %v1633_v31 = vmul.u32 18, %v1632_v34  ;;  %v1055_v63 = vsel %vm1033_vm7, %v3509_v60, %v4787_v5  ;;  %vm5794_vm0 = vmmov %vm5790_vm3 }
 0x18f   : > { %v2189_v26 = vadd.f32 %v2158_v11, %v2157_v61  ;;  %v2230_v0 = vmul.f32 %v2158_v11, %v1392_v28  ;;  %2430 = vst.msk [vmem:[%s4945_s11 + $0x4] sm:$0xf] %vm5761_vm15, %v3198_v19  ;;  %v1264_v24 = vsel %vm5790_vm3, %v1231_v22, %v963_v45  ;;  %v1611_v41 = vmul.u32 18, %v1610_v62 }
 0x190   : > { %v4985_v14 = vpop.permute.xlu0 %840  ;;  %v1089_v45 = vsel %vm1067_vm8, %v1055_v63, %v4807_v39  ;;  %v1601_v6 = vsub.s32 %v4884_v7, %v1600_v21  ;;  %v1634_v5 = vsub.s32 %v4903_v37, %v1633_v31  ;;  %vm1907_vm13 = vcmp.ne.s32.totalorder %v1623_v54, 0 }
 0x191   : > { %v2190_v15 = vadd.f32 %v2189_v26, %v2159_v46  ;;  %v2261_v51 = vadd.f32 %v2230_v0, %v2229_v55  ;;  %v953_v38 = vpop.permute.xlu1 %952  ;;  %v1122_v48 = vsel %vm5762_vm9, %v1089_v45, %v4828_v3  ;;  %vm1939_vm14 = vcmp.lt.s32.totalorder %v1623_v54, 0 }
 0x192   : > { %v1155_v11 = vsel %vm1133_vm10, %v1122_v48, %v4842_v4  ;;  %v2003_v7 = vadd.s32 18, %v1623_v54  ;;  %v1612_v2 = vsub.s32 %v4923_v47, %v1611_v41  ;;  %v1057_v3 = vsel %vm1033_vm7, %v3510_v40, %v4805_v42 }
 0x193   : > { %v2262_v61 = vadd.f32 %v2261_v51, %v2231_v10  ;;  %v4995_v32 = vadd.f32 %v2190_v15, %v2160_v57  ;;  %v1188_v39 = vsel %vm1166_vm11, %v1155_v11, %v4850_v8  ;;  %vm1905_vm4 = vcmp.ne.s32.totalorder %v1601_v6, 0 }
 0x194   : > { %v1032_v36 = vpop.permute.xlu0 %1031  ;;  %v1221_v55 = vsel %vm5793_vm2, %v1188_v39, %v4907_v16  ;;  %vm1937_vm5 = vcmp.lt.s32.totalorder %v1601_v6, 0  ;;  %v1091_v4 = vsel %vm1067_vm8, %v1057_v3, %v4823_v59  ;;  %vm1908_vm3 = vcmp.ne.s32.totalorder %v1634_v5, 0 }
 0x195   : > { %v4998_v30 = vpop.permute.xlu1 %2554  ;;  %v1297_v28 = vsel %vm5791_vm1, %v1264_v24, %v1032_v36  ;;  %v5002_v56 = vadd.f32 %v2262_v61, %v2232_v12  ;;  %v1254_v37 = vsel %vm5794_vm0, %v1221_v55, %v953_v38  ;;  %vm1940_vm1 = vcmp.lt.s32.totalorder %v1634_v5, 0  ;;  %vm5043_vm0 = vmand %vm1937_vm5, %vm1905_vm4 }
 0x196   : > { %3294 = vmatmul.mubr.msk.bf16.gmra.mrb[4].mxu1 %vm5792_vm6, %v1297_v28  ;;  %v1124_v8 = vsel %vm5762_vm9, %v1091_v4, %v4839_v18  ;;  %vm5795_vm6 = vcmask 261120   ;;  %v2001_v16 = vadd.s32 18, %v1601_v6  ;;  %vm5798_vm2 = vcmask 293888  }
 0x197   : > { %3303 = vmatprep.mubr.msk.bf16.mxu1 %vm5759_vm12, %v3600_v52  ;;  %vm5036_vm12 = vmand %vm1939_vm14, %vm1907_vm13  ;;  %v1157_v59 = vsel %vm1133_vm10, %v1124_v8, %v4848_v33  ;;  %v2004_v18 = vadd.s32 18, %v1634_v5  ;;  %vm1906_vm15 = vcmp.ne.s32.totalorder %v1612_v2, 0  ;;  %vm1938_vm9 = vcmp.lt.s32.totalorder %v1612_v2, 0 }
 0x198   : > { %v5015_v46 = vpop.permute.xlu0 %2556  ;;  %v1190_v27 = vsel %vm1166_vm11, %v1157_v59, %v4896_v44  ;;  %vm5049_vm13 = vmand %vm1940_vm1, %vm1908_vm3  ;;  %vm5803_vm14 = vcmask 195584   ;;  %v2035_v29 = vsel %vm5036_vm12, %v2003_v7, %v1623_v54  ;;  %v2002_v10 = vadd.s32 18, %v1612_v2 }
 0x199   : > { %v955_v19 = vpop.permute.xlu1 %954  ;;  %v1223_v34 = vsel %vm5803_vm14, %v1190_v27, %v4985_v14  ;;  %vm5804_vm4 = vcmask 228352   ;;  %v2033_v38 = vsel %vm5043_vm0, %v2001_v16, %v1601_v6  ;;  %vm5060_vm5 = vmand %vm1938_vm9, %vm1906_vm15  ;;  %v2036_v14 = vsel %vm5049_vm13, %v2004_v18, %v1634_v5 }
 0x19a   : > { %v1256_v15 = vsel %vm5804_vm4, %v1223_v34, %v955_v19  ;;  %vm5807_vm3 = vmmov %vm5795_vm6  ;;  %v5068_v21 = vadd.s32 80, %v4802_v25  ;;  %vm2067_vm1 = vcmp.lt.s32.totalorder %v2035_v29, 16  ;;  %v5072_v62 = vadd.s32 64, %v4802_v25 }
 0x19b   : > { %vm5808_vm12 = vmmov %vm5798_vm2  ;;  %v2034_v12 = vsel %vm5060_vm5, %v2002_v10, %v1612_v2  ;;  %v5077_v61 = vadd.s32 88, %v4802_v25  ;;  %vm2068_vm9 = vcmp.lt.s32.totalorder %v2036_v14, 16  ;;  %v5080_v36 = vadd.s32 72, %v4802_v25 }
 0x19c   : > { %v1022_v57 = vpop.permute.xlu0 %1021  ;;  %v3108_v31 = vsel %vm2067_vm1, 1.0, %v3600_v52  ;;  %v5084_v28 = vmul.u32.u64.low 3817748708, %v5068_v21  ;;  %v5085_v54 = vmul.u32.u64.high 3817748708, %v5068_v21, %v5084_v28  ;;  %vm2066_vm15 = vcmp.lt.s32.totalorder %v2034_v12, 16 }
 0x19d   : > { %v2590_v47 = vpop.permute.xlu1 %2589  ;;  %v1287_v26 = vsel %vm5795_vm6, %v1254_v37, %v1022_v57  ;;  %vm2065_vm6 = vcmp.lt.s32.totalorder %v2033_v38, 16  ;;  %v5091_v63 = vmul.u32.u64.low 3817748708, %v5072_v62  ;;  %v5092_v41 = vmul.u32.u64.high 3817748708, %v5072_v62, %v5091_v63 }
 0x19e   : > { %3285 = vmatprep.mubr.msk.bf16.mxu0 %vm5798_vm2, %v1287_v26  ;;  %v5088_v60 = vsel %vm2065_vm6, 1.0, %v3600_v52  ;;  %v2680_v45 = vsel %vm1033_vm7, %v4461_v49, %v4866_v53  ;;  %v3109_v48 = vsel %vm2068_vm9, 1.0, %v3600_v52  ;;  %v2682_v19 = vsel %vm1033_vm7, %v4469_v58, %v4873_v13 }
 0x19f   : > { %v5099_v5 = vmul.u32.u64.low 3817748708, %v5077_v61  ;;  %v5100_v11 = vmul.u32.u64.high 3817748708, %v5077_v61, %v5099_v5  ;;  %v2687_v39 = vsel %vm1067_vm8, %v2680_v45, %v4964_v17  ;;  %v2689_v53 = vsel %vm1067_vm8, %v2682_v19, %v4972_v43 }
 0x1a0   : > { %v2592_v33 = vpop.permute.xlu0 %2591  ;;  %v5108_v40 = vmul.u32.u64.low 3817748708, %v5080_v36  ;;  %v5109_v49 = vmul.u32.u64.high 3817748708, %v5080_v36, %v5108_v40  ;;  %vm5809_vm2 = vcmask 97280   ;;  %v3107_v58 = vsel %vm2066_vm15, 1.0, %v3600_v52 }
 0x1a1   : > { %v1024_v51 = vpop.permute.xlu1 %1023  ;;  %v2693_v3 = vsel %vm5809_vm2, %v2687_v39, %v4998_v30  ;;  %vm5810_vm0 = vmmov %vm5809_vm2  ;;  %vm5811_vm13 = vcmask 60416   ;;  %vm5813_vm4 = vcmask 195584   ;;  %v1665_v10 = vshrl.u32 %v5085_v54, 4 }
 0x1a2   : > { %v1289_v50 = vsel %vm5807_vm3, %v1256_v15, %v1024_v51  ;;  %v2695_v13 = vsel %vm5810_vm0, %v2689_v53, %v5015_v46  ;;  %v2699_v17 = vsel %vm1133_vm10, %v2693_v3, %v2590_v47  ;;  %vm5812_vm14 = vmmov %vm5811_vm13  ;;  %vm5817_vm1 = vcmask 228352  }
 0x1a3   : > { %3286 = vmatmul.mubr.msk.bf16.gmra.mrb[20].mxu0 %vm5808_vm12, %v1289_v50  ;;  %v2701_v43 = vsel %vm1133_vm10, %v2695_v13, %v2592_v33  ;;  %vm5814_vm5 = vmmov %vm5811_vm13  ;;  %v3511_v33 = vld [vmem:[%s3686_s30 + $0x8c] sm:$0xf]  ;;  %v1643_v12 = vshrl.u32 %v5092_v41, 4  ;;  %vm5819_vm9 = vcmask 261120   ;;  %v1676_v41 = vshrl.u32 %v5100_v11, 4  ;;  %s199_s30 = sand.u32 1, %s3574_s13  }
 0x1a4   : > { %v2605_v22 = vpop.permute.xlu0 %2604  ;;  %v3168_v29 = vcombine.low %v3511_v33, %v3511_v33  ;;  %vm5815_vm3 = vmmov %vm5814_vm5  ;;  %vm5821_vm2 = vcmask 1045504   ;;  %vm5822_vm0 = vcmask 293888   ;;  %s3053_s18 = sshll.u32 %s199_s30, 1  ;;  %s2913_s4 = scalar_lea.sflag [#allocation3], %s199_s30 }
 0x1a5   : > { %v2607_v24 = vpop.permute.xlu1 %2606  ;;  %v2705_v30 = vsel %vm1166_vm11, %v2699_v17, %v2605_v22  ;;  %vm5816_vm12 = vmmov %vm5813_vm4  ;;  %v1677_v11 = vmul.u32 18, %v1676_v41  ;;  %v1530_v41 = vadd.s32 104, %v4802_v25  ;;  %s201_s21 = scalar_lea.vmem [#allocation2], %s3053_s18 }
 0x1a6   : > { %v2707_v9 = vsel %vm1166_vm11, %v2701_v43, %v2607_v24  ;;  %vm5818_vm6 = vmmov %vm5817_vm1  ;;  %s2930_s23 = sshll.u32 %s201_s21, 4  ;;  %s5694_s23 = int_to_ptr.vmem [resolvable:$true] %s2930_s23 }
 0x1a7   : > { %vm5820_vm15 = vmmov %vm5819_vm9  ;;  %s3512_s5 = scalar_lea.vmem %s5694_s23, 32  ;;  %p3519_p1 = scmp.lt.s32.totalorder %s5694_s23, %s3517_s6 }
 0x1a8   : > { %v2623_v6 = vpop.permute.xlu0 %2622  ;;  %p3513_p12 = scmp.ne.s32.totalorder %s5694_s23, %s3512_s5  ;;  %p3520_p2 = scmp.lt.s32.totalorder %s3518_s7, %s3512_s5 }
 0x1a9   : > { %v2625_v7 = vpop.permute.xlu1 %2624  ;;  %v3271_v2 = vpop.f32.mrb[4].mxu0  ;;  %v2711_v34 = vsel %vm5813_vm4, %v2705_v30, %v2623_v6  ;;  %v1654_v6 = vshrl.u32 %v5109_v49, 4 }
 0x1aa   : > { %v3203_v55 = vpack.c.bf16 %v3271_v2, %v3271_v2  ;;  %v1405_v4 = vpop.f32.mrb[5].mxu0  ;;  %v2163_v26 = vmul.f32 %v3271_v2, %v3108_v31  ;;  %v2713_v44 = vsel %vm5816_vm12, %v2707_v9, %v2625_v7  ;;  %p3514_p13 = pnand %p3513_p12, %p3663_p4  ;;  %p3521_p3 = por %p3520_p2, %p3519_p1 }
 0x1ab   : > { %v2161_v37 = vmul.f32 %v5088_v60, %v1405_v4  ;;  %v3201_v57 = vpack.c.bf16 %v1405_v4, %v1405_v4  ;;  %v3272_v8 = vpop.f32.mrb[6].mxu0  ;;  %v1655_v49 = vmul.u32 18, %v1654_v6  ;;  %v1529_v6 = vadd.s32 96, %v4802_v25 }
 0x1ac   : > { %2435 = vst.msk [vmem:[%s4945_s11 + $0x18] sm:$0xf] %vm5811_vm13, %v3203_v55  ;;  %v3204_v42 = vpack.c.bf16 %v3272_v8, %v3272_v8  ;;  %v1408_v16 = vpop.f32.mrb[7].mxu0  ;;  %v2659_v59 = vpop.permute.xlu0 %2658  ;;  %v2235_v50 = vmul.f32 %v3271_v2, %v2163_v26  ;;  %v1644_v2 = vmul.u32 18, %v1643_v12  ;;  %v1666_v55 = vmul.u32 18, %v1665_v10  ;;  %p3515_p0 = pneg %p3514_p13 }
 0x1ad   : > { %v2192_v46 = vadd.f32 %v4995_v32, %v2161_v37  ;;  %v2233_v47 = vmul.f32 %v2161_v37, %v1405_v4  ;;  %2433 = vst.msk [vmem:[%s4945_s11 + $0x10] sm:$0xf] %vm5812_vm14, %v3201_v57  ;;  %v2661_v0 = vpop.permute.xlu1 %2660  ;;  %v2162_v18 = vmul.f32 %v3107_v58, %v1408_v16  ;;  %v3202_v27 = vpack.c.bf16 %v1408_v16, %v1408_v16 }
 0x1ae   : > { %2436 = vst.msk [vmem:[%s4945_s11 + $0x1c] sm:$0xf] %vm5814_vm5, %v3204_v42  ;;  %v2164_v32 = vmul.f32 %v3272_v8, %v3109_v48  ;;  %v2717_v14 = vsel %vm5817_vm1, %v2711_v34, %v2659_v59  ;;  %v2719_v24 = vsel %vm5818_vm6, %v2713_v44, %v2661_v0  ;;  %vm5823_vm13 = vmmov 0   ;;  %p3522_p5 = pnand %p3521_p3, %p3515_p0 }
 0x1af   : > { %v2264_v15 = vadd.f32 %v5002_v56, %v2233_v47  ;;  %v2193_v51 = vadd.f32 %v2192_v46, %v2162_v18  ;;  %v2234_v38 = vmul.f32 %v2162_v18, %v1408_v16  ;;  %2434 = vst.msk [vmem:[%s4945_s11 + $0x14] sm:$0xf] %vm5815_vm3, %v3202_v27  ;;  %v1645_v17 = vsub.s32 %v5072_v62, %v1644_v2 }
 0x1b0   : > { %v2674_v22 = vpop.permute.xlu0 %2673  ;;  %v2236_v48 = vmul.f32 %v3272_v8, %v2164_v32  ;;  %vm5824_vm14 = vcmask 97280   ;;  %v1667_v8 = vsub.s32 %v5068_v21, %v1666_v55  ;;  %v1656_v43 = vsub.s32 %v5080_v36, %v1655_v49 }
 0x1b1   : > { %v2194_v31 = vadd.f32 %v2193_v51, %v2163_v26  ;;  %v2265_v28 = vadd.f32 %v2264_v15, %v2234_v38  ;;  %v2676_v54 = vpop.permute.xlu1 %2675  ;;  %v2723_v56 = vsel %vm5819_vm9, %v2717_v14, %v2674_v22  ;;  %vm1941_vm4 = vcmp.lt.s32.totalorder %v1645_v17, 0 }
 0x1b2   : > { %v2725_v63 = vsel %vm5820_vm15, %v2719_v24, %v2676_v54  ;;  %v2736_v45 = vrot.slane %v2723_v56, 2  ;;  %v1678_v42 = vsub.s32 %v5077_v61, %v1677_v11  ;;  %vm1943_vm5 = vcmp.lt.s32.totalorder %v1667_v8, 0 }
 0x1b3   : > { %v2266_v5 = vadd.f32 %v2265_v28, %v2235_v50  ;;  %v2737_v19 = vrot.slane %v2725_v63, 2  ;;  %v5143_v39 = vadd.f32 %v2194_v31, %v2164_v32  ;;  %v2005_v62 = vadd.s32 18, %v1645_v17 }
 0x1b4   : > { %v2523_v7 = vpop.permute.xlu0 %2522  ;;  %vm1910_vm3 = vcmp.ne.s32.totalorder %v1656_v43, 0  ;;  %vm1942_vm12 = vcmp.lt.s32.totalorder %v1656_v43, 0  ;;  %v2007_v46 = vadd.s32 18, %v1667_v8  ;;  %vm5827_vm6 = vcmask 195584  }
 0x1b5   : > { %v2738_v40 = vsel %vm5821_vm2, %v2736_v45, %v2737_v19  ;;  %v2685_v53 = vsel %vm1033_vm7, %v3168_v29, %v2523_v7  ;;  %v2537_v3 = vpop.permute.xlu1 %2536  ;;  %v5148_v4 = vadd.f32 %v2266_v5, %v2236_v48  ;;  %vm1909_vm7 = vcmp.ne.s32.totalorder %v1645_v17, 0  ;;  %vm1974_vm2 = vmand %vm1942_vm12, %vm1910_vm3 }
 0x1b6   : > { %3304 = vmatmul.mubr.msk.bf16.vlgmr.msra.gmra.mrb[8].mxu1 %vm5822_vm0, %v2738_v40  ;;  %v2691_v58 = vsel %vm1067_vm8, %v2685_v53, %v2537_v3  ;;  %vm1911_vm8 = vcmp.ne.s32.totalorder %v1667_v8, 0  ;;  %vm5161_vm1 = vmand %vm1941_vm4, %vm1909_vm7  ;;  %vm1912_vm9 = vcmp.ne.s32.totalorder %v1678_v42, 0  ;;  %v2006_v61 = vadd.s32 18, %v1656_v43 }
 0x1b7   : > { %3307 = vmatprep.mubr.msk.bf16.mxu1 %vm5823_vm13, %v3600_v52  ;;  %vm5830_vm15 = vcmask 228352   ;;  %vm5831_vm0 = vcmask 261120   ;;  %v2037_v34 = vsel %vm5161_vm1, %v2005_v62, %v1645_v17  ;;  %v2008_v33 = vadd.s32 18, %v1678_v42 }
 0x1b8   : > { %v2559_v13 = vpop.permute.xlu0 %2558  ;;  %v2038_v15 = vsel %vm1974_vm2, %v2006_v61, %v1656_v43  ;;  %vm5832_vm7 = vcmask 1045504   ;;  %vm2069_vm4 = vcmp.lt.s32.totalorder %v2037_v34, 16  ;;  %vm5834_vm1 = vcmask 60416  }
 0x1b9   : > { %v2697_v37 = vsel %vm5824_vm14, %v2691_v58, %v2559_v13  ;;  %v2594_v57 = vpop.permute.xlu1 %2593  ;;  %vm2070_vm3 = vcmp.lt.s32.totalorder %v2038_v15, 16  ;;  %v3110_v38 = vsel %vm2069_vm4, 1.0, %v3600_v52  ;;  %v1531_v2 = vadd.s32 112, %v4802_v25 }
 0x1ba   : > { %v2703_v30 = vsel %vm1133_vm10, %v2697_v37, %v2594_v57  ;;  %vm5166_vm10 = vmand %vm1943_vm5, %vm1911_vm8  ;;  %vm5833_vm8 = vcmask 293888   ;;  %v3111_v12 = vsel %vm2070_vm3, 1.0, %v3600_v52  ;;  %v1532_v11 = vadd.s32 120, %v4802_v25 }
 0x1bb   : > { %v2039_v10 = vsel %vm5166_vm10, %v2007_v46, %v1667_v8  ;;  %vm5837_vm10 = vmmov %vm5833_vm8  ;;  %v5202_v37 = vmul.u32.u64.low 3817748708, %v1531_v2  ;;  %v5203_v57 = vmul.u32.u64.high 3817748708, %v1531_v2, %v5202_v37 }
 0x1bc   : > { %v2609_v26 = vpop.permute.xlu0 %2608  ;;  %vm2071_vm5 = vcmp.lt.s32.totalorder %v2039_v10, 16  ;;  %v5205_v8 = vmul.u32.u64.low 3817748708, %v1530_v41  ;;  %v5206_v43 = vmul.u32.u64.high 3817748708, %v1530_v41, %v5205_v8 }
 0x1bd   : > { %v2709_v16 = vsel %vm1166_vm11, %v2703_v30, %v2609_v26  ;;  %v2627_v59 = vpop.permute.xlu1 %2626  ;;  %vm1944_vm11 = vcmp.lt.s32.totalorder %v1678_v42, 0  ;;  %v3112_v50 = vsel %vm2071_vm5, 1.0, %v3600_v52  ;;  %v1709_v46 = vshrl.u32 %v5203_v57, 4 }
 0x1be   : > { %v2715_v36 = vsel %vm5827_vm6, %v2709_v16, %v2627_v59  ;;  %vm1976_vm14 = vmand %vm1944_vm11, %vm1912_vm9  ;;  %v5208_v16 = vmul.u32.u64.low 3817748708, %v1532_v11  ;;  %v5209_v59 = vmul.u32.u64.high 3817748708, %v1532_v11, %v5208_v16  ;;  %v1698_v21 = vshrl.u32 %v5206_v43, 4 }
 0x1bf   : > { %v2040_v51 = vsel %vm1976_vm14, %v2008_v33, %v1678_v42  ;;  %vm5836_vm6 = vmmov %vm5834_vm1  ;;  %v1710_v0 = vmul.u32 18, %v1709_v46  ;;  %v1533_v57 = vadd.s32 128, %v4802_v25  ;;  %v1535_v8 = vadd.s32 144, %v4802_v25 }
 0x1c0   : > { %v2663_v47 = vpop.permute.xlu0 %2662  ;;  %vm2072_vm12 = vcmp.lt.s32.totalorder %v2040_v51, 16  ;;  %vm5838_vm9 = vmmov %vm5834_vm1  ;;  %v1699_v61 = vmul.u32 18, %v1698_v21  ;;  %v1534_v43 = vadd.s32 136, %v4802_v25 }
 0x1c1   : > { %v2721_v18 = vsel %vm5830_vm15, %v2715_v36, %v2663_v47  ;;  %v2678_v27 = vpop.permute.xlu1 %2677  ;;  %v3113_v56 = vsel %vm2072_vm12, 1.0, %v3600_v52  ;;  %v1720_v47 = vshrl.u32 %v5209_v59, 4 }
 0x1c2   : > { %v2727_v9 = vsel %vm5831_vm0, %v2721_v18, %v2678_v27  ;;  %v1700_v34 = vsub.s32 %v1530_v41, %v1699_v61 }
 0x1c3   : > { %v2739_v29 = vrot.slane %v2727_v9, 2  ;;  %v1721_v27 = vmul.u32 18, %v1720_v47  ;;  %v1711_v9 = vsub.s32 %v1531_v2, %v1710_v0 }
 0x1c4   : > { %vm1914_vm14 = vcmp.ne.s32.totalorder %v1700_v34, 0  ;;  %v2010_v15 = vadd.s32 18, %v1700_v34 }
 0x1c5   : > { %v2740_v32 = vsel %vm5832_vm7, %v2737_v19, %v2739_v29  ;;  %v1722_v33 = vsub.s32 %v1532_v11, %v1721_v27  ;;  %vm1915_vm2 = vcmp.ne.s32.totalorder %v1711_v9, 0  ;;  %vm1947_vm0 = vcmp.lt.s32.totalorder %v1711_v9, 0 }
 0x1c6   : > { %3308 = vmatmul.mubr.msk.bf16.gmra.mrb[12].mxu1 %vm5833_vm8, %v2740_v32  ;;  %vm1946_vm7 = vcmp.lt.s32.totalorder %v1700_v34, 0  ;;  %v2011_v10 = vadd.s32 18, %v1711_v9  ;;  %vm1979_vm8 = vmand %vm1947_vm0, %vm1915_vm2 }
 0x1c7   : > { %3311 = vmatprep.mubr.msk.bf16.mxu1 %vm5823_vm13, %v3600_v52  ;;  %vm5835_vm13 = vmmov %vm5834_vm1  ;;  %vm1916_vm5 = vcmp.ne.s32.totalorder %v1722_v33, 0  ;;  %vm1948_vm3 = vcmp.lt.s32.totalorder %v1722_v33, 0  ;;  %v2012_v51 = vadd.s32 18, %v1722_v33 }
 0x1c8   : > { %vm1978_vm12 = vmand %vm1946_vm7, %vm1914_vm14 }
 0x1c9   : > { %v3275_v44 = vpop.f32.mrb[8].mxu0 }
 0x1ca   : > { %v3207_v14 = vpack.c.bf16 %v3275_v44, %v3275_v44  ;;  %v1421_v22 = vpop.f32.mrb[9].mxu0  ;;  %v2167_v54 = vmul.f32 %v3275_v44, %v3112_v50 }
 0x1cb   : > { %v2165_v24 = vmul.f32 %v3110_v38, %v1421_v22  ;;  %v3205_v31 = vpack.c.bf16 %v1421_v22, %v1421_v22  ;;  %v3276_v28 = vpop.f32.mrb[10].mxu0  ;;  %v2043_v38 = vsel %vm1979_vm8, %v2011_v10, %v1711_v9 }
 0x1cc   : > { %2439 = vst.msk [vmem:[%s4945_s11 + $0x28] sm:$0xf] %vm5834_vm1, %v3207_v14  ;;  %v3208_v63 = vpack.c.bf16 %v3276_v28, %v3276_v28  ;;  %v1424_v45 = vpop.f32.mrb[11].mxu0  ;;  %v2168_v53 = vmul.f32 %v3276_v28, %v3113_v56  ;;  %v2239_v58 = vmul.f32 %v3275_v44, %v2167_v54  ;;  %vm1980_vm1 = vmand %vm1948_vm3, %vm1916_vm5  ;;  %v2042_v44 = vsel %vm1978_vm12, %v2010_v15, %v1700_v34 }
 0x1cd   : > { %v2196_v48 = vadd.f32 %v5143_v39, %v2165_v24  ;;  %v2237_v5 = vmul.f32 %v2165_v24, %v1421_v22  ;;  %2437 = vst.msk [vmem:[%s4945_s11 + $0x20] sm:$0xf] %vm5835_vm13, %v3205_v31  ;;  %v2166_v19 = vmul.f32 %v3111_v12, %v1424_v45  ;;  %v3206_v7 = vpack.c.bf16 %v1424_v45, %v1424_v45 }
 0x1ce   : > { %2440 = vst.msk [vmem:[%s4945_s11 + $0x2c] sm:$0xf] %vm5836_vm6, %v3208_v63  ;;  %3312 = vmatmul.mubr.msk.bf16.gmra.mrb[16].mxu1 %vm5837_vm10, %v2739_v29  ;;  %v5198_v39 = vmul.u32.u64.low 3817748708, %v1529_v6  ;;  %v5199_v49 = vmul.u32.u64.high 3817748708, %v1529_v6, %v5198_v39  ;;  %vm2075_vm6 = vcmp.lt.s32.totalorder %v2043_v38, 16  ;;  %v2044_v50 = vsel %vm1980_vm1, %v2012_v51, %v1722_v33 }
 0x1cf   : > { %v2268_v40 = vadd.f32 %v5148_v4, %v2237_v5  ;;  %v2197_v3 = vadd.f32 %v2196_v48, %v2166_v19  ;;  %v2238_v55 = vmul.f32 %v2166_v19, %v1424_v45  ;;  %2438 = vst.msk [vmem:[%s4945_s11 + $0x24] sm:$0xf] %vm5838_vm9, %v3206_v7  ;;  %v2240_v4 = vmul.f32 %v3276_v28, %v2168_v53 }
 0x1d0   : > { %v1687_v62 = vshrl.u32 %v5199_v49, 4  ;;  %vm2074_vm10 = vcmp.lt.s32.totalorder %v2042_v44, 16  ;;  %v3116_v12 = vsel %vm2075_vm6, 1.0, %v3600_v52  ;;  %vm2076_vm9 = vcmp.lt.s32.totalorder %v2044_v50, 16 }
 0x1d1   : > { %v2198_v13 = vadd.f32 %v2197_v3, %v2167_v54  ;;  %v2269_v17 = vadd.f32 %v2268_v40, %v2238_v55  ;;  %v3115_v28 = vsel %vm2074_vm10, 1.0, %v3600_v52 }
 0x1d2   : > { %v1688_v36 = vmul.u32 18, %v1687_v62  ;;  %v5241_v59 = vmul.u32.u64.low 3817748708, %v1534_v43  ;;  %v5242_v62 = vmul.u32.u64.high 3817748708, %v1534_v43, %v5241_v59 }
 0x1d3   : > { %v2270_v30 = vadd.f32 %v2269_v17, %v2239_v58  ;;  %v2199_v26 = vadd.f32 %v2198_v13, %v2168_v53 }
 0x1d4   : > { %v1689_v18 = vsub.s32 %v1529_v6, %v1688_v36  ;;  %v3117_v6 = vsel %vm2076_vm9, 1.0, %v3600_v52  ;;  %v1742_v0 = vshrl.u32 %v5242_v62, 4 }
 0x1d5   : > { %v2271_v42 = vadd.f32 %v2270_v30, %v2240_v4  ;;  %v5234_v4 = vmul.u32.u64.low 3817748708, %v1533_v57  ;;  %v5235_v30 = vmul.u32.u64.high 3817748708, %v1533_v57, %v5234_v4 }
 0x1d6   : > { %vm1913_vm11 = vcmp.ne.s32.totalorder %v1689_v18, 0  ;;  %vm1945_vm15 = vcmp.lt.s32.totalorder %v1689_v18, 0  ;;  %v2009_v29 = vadd.s32 18, %v1689_v18  ;;  %v1743_v9 = vmul.u32 18, %v1742_v0 }
 0x1d7   : > { %vm1977_vm4 = vmand %vm1945_vm15, %vm1913_vm11  ;;  %vm5839_vm11 = vcmask 60416   ;;  %v1731_v36 = vshrl.u32 %v5235_v30, 4 }
 0x1d8   : > { %v2041_v32 = vsel %vm1977_vm4, %v2009_v29, %v1689_v18  ;;  %vm5840_vm15 = vmmov %vm5839_vm11  ;;  %v1744_v51 = vsub.s32 %v1534_v43, %v1743_v9  ;;  %v1542_v9 = vadd.s32 200, %v4802_v25 }
 0x1d9   : > { %vm2073_vm13 = vcmp.lt.s32.totalorder %v2041_v32, 16  ;;  %vm5841_vm2 = vmmov %vm5839_vm11  ;;  %v1732_v61 = vmul.u32 18, %v1731_v36  ;;  %v1543_v36 = vadd.s32 208, %v4802_v25 }
 0x1da   : > { %v3114_v14 = vsel %vm2073_vm13, 1.0, %v3600_v52  ;;  %vm5842_vm0 = vmmov %vm5841_vm2  ;;  %vm1918_vm1 = vcmp.ne.s32.totalorder %v1744_v51, 0  ;;  %vm1950_vm13 = vcmp.lt.s32.totalorder %v1744_v51, 0 }
 0x1db   : > { %v1733_v34 = vsub.s32 %v1533_v57, %v1732_v61  ;;  %vm5843_vm14 = vmmov %vm5842_vm0 }
 0x1dc   : > { %vm5844_vm8 = vmmov %vm5842_vm0 }
 0x1dd   : > { %vm1917_vm7 = vcmp.ne.s32.totalorder %v1733_v34, 0  ;;  %vm1949_vm4 = vcmp.lt.s32.totalorder %v1733_v34, 0  ;;  %vm5845_vm12 = vmmov %vm5842_vm0 }
 0x1de   : > { %vm5846_vm6 = vmmov %vm5842_vm0 }
 0x1df   : > { %vm1981_vm10 = vmand %vm1949_vm4, %vm1917_vm7 }
 0x1e0   : > { %vm5847_vm4 = vmmov %vm5846_vm6 }
 0x1f2   : > { %v3279_v22 = vpop.f32.mrb[12].mxu0 }
 0x1f3   : > { %v3211_v24 = vpack.c.bf16 %v3279_v22, %v3279_v22  ;;  %v1437_v31 = vpop.f32.mrb[13].mxu0  ;;  %v2171_v45 = vmul.f32 %v3279_v22, %v3116_v12 }
 0x1f4   : > { %v2169_v54 = vmul.f32 %v3114_v14, %v1437_v31  ;;  %v3209_v56 = vpack.c.bf16 %v1437_v31, %v1437_v31  ;;  %v3280_v63 = vpop.f32.mrb[14].mxu0 }
 0x1f5   : > { %2443 = vst.msk [vmem:[%s4945_s11 + $0x38] sm:$0xf] %vm5839_vm11, %v3211_v24  ;;  %v3212_v48 = vpack.c.bf16 %v3280_v63, %v3280_v63  ;;  %v1440_v5 = vpop.f32.mrb[15].mxu0  ;;  %v2172_v53 = vmul.f32 %v3280_v63, %v3117_v6  ;;  %v2243_v39 = vmul.f32 %v3279_v22, %v2171_v45  ;;  %v2013_v24 = vadd.s32 18, %v1733_v34 }
 0x1f6   : > { %v2200_v19 = vadd.f32 %v2199_v26, %v2169_v54  ;;  %v2241_v7 = vmul.f32 %v2169_v54, %v1437_v31  ;;  %2441 = vst.msk [vmem:[%s4945_s11 + $0x30] sm:$0xf] %vm5840_vm15, %v3209_v56  ;;  %v2170_v2 = vmul.f32 %v3115_v28, %v1440_v5  ;;  %v3210_v41 = vpack.c.bf16 %v1440_v5, %v1440_v5 }
 0x1f7   : > { %2444 = vst.msk [vmem:[%s4945_s11 + $0x3c] sm:$0xf] %vm5841_vm2, %v3212_v48  ;;  %v2244_v13 = vmul.f32 %v3280_v63, %v2172_v53  ;;  %v1536_v26 = vadd.s32 152, %v4802_v25  ;;  %v2014_v28 = vadd.s32 18, %v1744_v51  ;;  %vm1982_vm2 = vmand %vm1950_vm13, %vm1918_vm1  ;;  %v2045_v54 = vsel %vm1981_vm10, %v2013_v24, %v1733_v34 }
 0x1f8   : > { %v2272_v40 = vadd.f32 %v2271_v42, %v2241_v7  ;;  %v2201_v3 = vadd.f32 %v2200_v19, %v2170_v2  ;;  %v2242_v55 = vmul.f32 %v2170_v2, %v1440_v5  ;;  %2442 = vst.msk [vmem:[%s4945_s11 + $0x34] sm:$0xf] %vm5842_vm0, %v3210_v41  ;;  %v1537_v34 = vadd.s32 160, %v4802_v25 }
 0x1f9   : > { %v5238_v42 = vmul.u32.u64.low 3817748708, %v1535_v8  ;;  %v5239_v16 = vmul.u32.u64.high 3817748708, %v1535_v8, %v5238_v42  ;;  %v5244_v46 = vmul.u32.u64.low 3817748708, %v1536_v26  ;;  %v5245_v21 = vmul.u32.u64.high 3817748708, %v1536_v26, %v5244_v46 }
 0x1fa   : > { %v2202_v49 = vadd.f32 %v2201_v3, %v2171_v45  ;;  %v2273_v58 = vadd.f32 %v2272_v40, %v2242_v55  ;;  %v2046_v45 = vsel %vm1982_vm2, %v2014_v28, %v1744_v51  ;;  %v5316_v24 = vadd.s32 184, %v4802_v25 }
 0x1fb   : > { %v1753_v47 = vshrl.u32 %v5239_v16, 4  ;;  %v1764_v18 = vshrl.u32 %v5245_v21, 4 }
 0x1fc   : > { %v2274_v17 = vadd.f32 %v2273_v58, %v2243_v39  ;;  %v5227_v11 = vadd.f32 %v2202_v49, %v2172_v53 }
 0x1fd   : > { %v1754_v27 = vmul.u32 18, %v1753_v47  ;;  %v1765_v33 = vmul.u32 18, %v1764_v18  ;;  %v1541_v47 = vadd.s32 192, %v4802_v25 }
 0x1fe   : > { %v5229_v37 = vadd.f32 %v2274_v17, %v2244_v13 }
 0x1ff   : > { %v1755_v10 = vsub.s32 %v1535_v8, %v1754_v27  ;;  %v1766_v22 = vsub.s32 %v1536_v26, %v1765_v33  ;;  %v5298_v61 = vmul.u32.u64.low 3817748708, %v1541_v47  ;;  %v5299_v18 = vmul.u32.u64.high 3817748708, %v1541_v47, %v5298_v61 }
 0x200   : > { %v1544_v27 = vadd.s32 216, %v4802_v25 }
 0x201   : > { %vm1919_vm5 = vcmp.ne.s32.totalorder %v1755_v10, 0  ;;  %vm1951_vm3 = vcmp.lt.s32.totalorder %v1755_v10, 0  ;;  %v2015_v31 = vadd.s32 18, %v1755_v10  ;;  %vm1920_vm11 = vcmp.ne.s32.totalorder %v1766_v22, 0 }
 0x202   : > { %vm1983_vm9 = vmand %vm1951_vm3, %vm1919_vm5  ;;  %vm1952_vm15 = vcmp.lt.s32.totalorder %v1766_v22, 0  ;;  %v2016_v56 = vadd.s32 18, %v1766_v22  ;;  %v1819_v28 = vshrl.u32 %v5299_v18, 4 }
 0x203   : > { %v2047_v63 = vsel %vm1983_vm9, %v2015_v31, %v1755_v10  ;;  %vm1984_vm0 = vmand %vm1952_vm15, %vm1920_vm11  ;;  %v5304_v33 = vmul.u32.u64.low 3817748708, %v1544_v27  ;;  %v5305_v10 = vmul.u32.u64.high 3817748708, %v1544_v27, %v5304_v33 }
 0x204   : > { %v2048_v6 = vsel %vm1984_vm0, %v2016_v56, %v1766_v22  ;;  %vm5848_vm5 = vmmov %vm5847_vm4 }
 0x205   : > { %vm2080_vm7 = vcmp.lt.s32.totalorder %v2048_v6, 16  ;;  %vm5849_vm3 = vmmov %vm5847_vm4 }
 0x206   : > { %v3121_v39 = vsel %vm2080_vm7, 1.0, %v3600_v52  ;;  %vm5850_vm1 = vmmov %vm5849_vm3 }
 0x222   : > { %v5251_v29 = vpop.f32.mrb[0].mxu1 }
 0x223   : > { %v3223_v15 = vpack.c.bf16 %v5251_v29, %v5251_v29  ;;  %v5255_v32 = vpop.f32.mrb[1].mxu1 }
 0x224   : > { %v3221_v38 = vpack.c.bf16 %v5255_v32, %v5255_v32  ;;  %v5259_v44 = vpop.f32.mrb[2].mxu1 }
 0x225   : > { %2455 = vst.msk [vmem:[%s4945_s11 + $0x68] sm:$0xf] %vm5843_vm14, %v3223_v15  ;;  %v3224_v50 = vpack.c.bf16 %v5259_v44, %v5259_v44  ;;  %v5265_v14 = vpop.f32.mrb[3].mxu1  ;;  %vm2077_vm14 = vcmp.lt.s32.totalorder %v2045_v54, 16  ;;  %v1539_v15 = vadd.s32 176, %v4802_v25 }
 0x226   : > { %2453 = vst.msk [vmem:[%s4945_s11 + $0x60] sm:$0xf] %vm5844_vm8, %v3221_v38  ;;  %v3222_v12 = vpack.c.bf16 %v5265_v14, %v5265_v14  ;;  %vm2079_vm8 = vcmp.lt.s32.totalorder %v2047_v63, 16  ;;  %v3118_v48 = vsel %vm2077_vm14, 1.0, %v3600_v52 }
 0x227   : > { %2456 = vst.msk [vmem:[%s4945_s11 + $0x6c] sm:$0xf] %vm5845_vm12, %v3224_v50  ;;  %vm2078_vm12 = vcmp.lt.s32.totalorder %v2046_v45, 16  ;;  %v3120_v19 = vsel %vm2079_vm8, 1.0, %v3600_v52  ;;  %v5308_v51 = vmul.u32.u64.low 3817748708, %v1542_v9  ;;  %v5309_v38 = vmul.u32.u64.high 3817748708, %v1542_v9, %v5308_v51 }
 0x228   : > { %2454 = vst.msk [vmem:[%s4945_s11 + $0x64] sm:$0xf] %vm5846_vm6, %v3222_v12  ;;  %v3119_v41 = vsel %vm2078_vm12, 1.0, %v3600_v52  ;;  %v1538_v50 = vadd.s32 168, %v4802_v25  ;;  %v5312_v22 = vmul.u32.u64.low 3817748708, %v1537_v34  ;;  %v5313_v12 = vmul.u32.u64.high 3817748708, %v1537_v34, %v5312_v22 }
 0x229   : > { %v5320_v54 = vmul.u32.u64.low 3817748708, %v1539_v15  ;;  %v5321_v56 = vmul.u32.u64.high 3817748708, %v1539_v15, %v5320_v54 }
 0x22a   : > { %v5323_v63 = vmul.u32.u64.low 3817748708, %v1538_v50  ;;  %v5324_v45 = vmul.u32.u64.high 3817748708, %v1538_v50, %v5323_v63 }
 0x232   : > { %v3283_v5 = vpop.f32.mrb[16].mxu0 }
 0x233   : > { %v3215_v7 = vpack.c.bf16 %v3283_v5, %v3283_v5  ;;  %v1453_v2 = vpop.f32.mrb[17].mxu0  ;;  %v2175_v55 = vmul.f32 %v3283_v5, %v3120_v19  ;;  %v1820_v19 = vmul.u32 18, %v1819_v28 }
 0x234   : > { %v2173_v40 = vmul.f32 %v3118_v48, %v1453_v2  ;;  %v3213_v53 = vpack.c.bf16 %v1453_v2, %v1453_v2  ;;  %v3284_v3 = vpop.f32.mrb[18].mxu0  ;;  %v5327_v6 = vmul.u32.u64.low 3817748708, %v5316_v24  ;;  %v5328_v48 = vmul.u32.u64.high 3817748708, %v5316_v24, %v5327_v6 }
 0x235   : > { %2447 = vst.msk [vmem:[%s4945_s11 + $0x48] sm:$0xf] %vm5847_vm4, %v3215_v7  ;;  %v3216_v49 = vpack.c.bf16 %v3284_v3, %v3284_v3  ;;  %v1456_v58 = vpop.f32.mrb[19].mxu0  ;;  %v2176_v4 = vmul.f32 %v3284_v3, %v3121_v39  ;;  %v2247_v42 = vmul.f32 %v3283_v5, %v2175_v55  ;;  %v1852_v7 = vshrl.u32 %v5305_v10, 4 }
 0x236   : > { %v2204_v13 = vadd.f32 %v5227_v11, %v2173_v40  ;;  %v2245_v17 = vmul.f32 %v2173_v40, %v1453_v2  ;;  %2445 = vst.msk [vmem:[%s4945_s11 + $0x40] sm:$0xf] %vm5848_vm5, %v3213_v53  ;;  %v2174_v57 = vmul.f32 %v3119_v41, %v1456_v58  ;;  %v3214_v8 = vpack.c.bf16 %v1456_v58, %v1456_v58 }
 0x237   : > { %2448 = vst.msk [vmem:[%s4945_s11 + $0x4c] sm:$0xf] %vm5849_vm3, %v3216_v49  ;;  %v2248_v62 = vmul.f32 %v3284_v3, %v2176_v4  ;;  %v1830_v2 = vshrl.u32 %v5309_v38, 4  ;;  %v5333_v41 = vadd.s32 240, %v4802_v25  ;;  %v5336_v40 = vadd.s32 224, %v4802_v25 }
 0x238   : > { %v2276_v43 = vadd.f32 %v5229_v37, %v2245_v17  ;;  %v2205_v30 = vadd.f32 %v2204_v13, %v2174_v57  ;;  %v2246_v26 = vmul.f32 %v2174_v57, %v1456_v58  ;;  %2446 = vst.msk [vmem:[%s4945_s11 + $0x44] sm:$0xf] %vm5850_vm1, %v3214_v8  ;;  %v5339_v53 = vadd.s32 248, %v4802_v25 }
 0x239   : > { %v5295_v0 = vmul.u32.u64.low 3817748708, %v1543_v36  ;;  %v5296_v37 = vmul.u32.u64.high 3817748708, %v1543_v36, %v5295_v0  ;;  %v5342_v3 = vadd.s32 232, %v4802_v25  ;;  %v5347_v49 = vsub.s32 %v1541_v47, %v1820_v19 }
 0x23a   : > { %v2206_v16 = vadd.f32 %v2205_v30, %v2175_v55  ;;  %v2277_v59 = vadd.f32 %v2276_v43, %v2246_v26  ;;  %v1775_v55 = vshrl.u32 %v5313_v12, 4  ;;  %v1853_v58 = vmul.u32 18, %v1852_v7 }
 0x23b   : > { %v1841_v31 = vshrl.u32 %v5296_v37, 4  ;;  %v1797_v13 = vshrl.u32 %v5321_v56, 4  ;;  %v1831_v17 = vmul.u32 18, %v1830_v2  ;;  %v1786_v43 = vshrl.u32 %v5324_v45, 4 }
 0x23c   : > { %v2278_v46 = vadd.f32 %v2277_v59, %v2247_v42  ;;  %v5289_v11 = vadd.f32 %v2206_v16, %v2176_v4  ;;  %v5351_v57 = vmul.u32.u64.low 3817748708, %v5333_v41  ;;  %v5352_v8 = vmul.u32.u64.high 3817748708, %v5333_v41, %v5351_v57 }
 0x23d   : > { %v1842_v5 = vmul.u32 18, %v1841_v31  ;;  %v5356_v4 = vmul.u32.u64.low 3817748708, %v5336_v40  ;;  %v5357_v25 = vmul.u32.u64.high 3817748708, %v5336_v40, %v5356_v4  ;;  %v5370_v47 = vsub.s32 %v1542_v9, %v1831_v17 }
 0x23e   : > { %v5291_v21 = vadd.f32 %v2278_v46, %v2248_v62  ;;  %v5360_v30 = vmul.u32.u64.low 3817748708, %v5339_v53  ;;  %v5361_v26 = vmul.u32.u64.high 3817748708, %v5339_v53, %v5360_v30  ;;  %v1776_v59 = vmul.u32 18, %v1775_v55 }
 0x23f   : > { %v5345_v39 = vsub.s32 %v1543_v36, %v1842_v5  ;;  %v5364_v42 = vmul.u32.u64.low 3817748708, %v5342_v3  ;;  %v5365_v16 = vmul.u32.u64.high 3817748708, %v5342_v3, %v5364_v42  ;;  %v1808_v62 = vshrl.u32 %v5328_v48, 4 }
 0x240   : > { %v5368_v46 = vsub.s32 %v1544_v27, %v1853_v58  ;;  %v1798_v36 = vmul.u32 18, %v1797_v13  ;;  %v1787_v0 = vmul.u32 18, %v1786_v43  ;;  %vm1925_vm10 = vcmp.ne.s32.totalorder %v5347_v49, 0 }
 0x241   : > { %vm1927_vm13 = vcmp.ne.s32.totalorder %v5345_v39, 0  ;;  %vm1959_vm6 = vcmp.lt.s32.totalorder %v5345_v39, 0  ;;  %v5375_v37 = vsub.s32 %v1537_v34, %v1776_v59  ;;  %v1809_v61 = vmul.u32 18, %v1808_v62 }
 0x242   : > { %vm1957_vm9 = vcmp.lt.s32.totalorder %v5347_v49, 0  ;;  %v2021_v18 = vadd.s32 18, %v5347_v49  ;;  %vm1928_vm11 = vcmp.ne.s32.totalorder %v5368_v46, 0  ;;  %v5380_v27 = vsub.s32 %v1539_v15, %v1798_v36  ;;  %vm5395_vm14 = vmand %vm1959_vm6, %vm1927_vm13 }
 0x243   : > { %vm1960_vm15 = vcmp.lt.s32.totalorder %v5368_v46, 0  ;;  %vm1926_vm2 = vcmp.ne.s32.totalorder %v5370_v47, 0  ;;  %vm1958_vm0 = vcmp.lt.s32.totalorder %v5370_v47, 0  ;;  %v5385_v9 = vsub.s32 %v1538_v50, %v1787_v0  ;;  %vm5411_vm7 = vmand %vm1957_vm9, %vm1925_vm10 }
 0x244   : > { %v2022_v34 = vadd.s32 18, %v5370_v47  ;;  %v1885_v33 = vshrl.u32 %v5352_v8, 4  ;;  %v1863_v10 = vshrl.u32 %v5357_v25, 4  ;;  %v1896_v51 = vshrl.u32 %v5361_v26, 4  ;;  %vm5425_vm1 = vmand %vm1958_vm0, %vm1926_vm2 }
 0x245   : > { %v1874_v50 = vshrl.u32 %v5365_v16, 4  ;;  %vm1921_vm8 = vcmp.ne.s32.totalorder %v5375_v37, 0  ;;  %vm1953_vm12 = vcmp.lt.s32.totalorder %v5375_v37, 0  ;;  %v5405_v22 = vsub.s32 %v5316_v24, %v1809_v61 }
 0x246   : > { %vm2460_vm4 = vcmask 58368   ;;  %vm1923_vm5 = vcmp.ne.s32.totalorder %v5380_v27, 0  ;;  %vm1955_vm3 = vcmp.lt.s32.totalorder %v5380_v27, 0  ;;  %v2017_v63 = vadd.s32 18, %v5375_v37  ;;  %vm5447_vm9 = vmand %vm1953_vm12, %vm1921_vm8 }
 0x247   : > { %vm1922_vm13 = vcmp.ne.s32.totalorder %v5385_v9, 0  ;;  %vm1954_vm6 = vcmp.lt.s32.totalorder %v5385_v9, 0  ;;  %v1886_v45 = vmul.u32 18, %v1885_v33  ;;  %vm5857_vm10 = vcmask 60416   ;;  %vm5459_vm0 = vmand %vm1955_vm3, %vm1923_vm5 }
 0x248   : > { %v1864_v6 = vmul.u32 18, %v1863_v10  ;;  %v2019_v19 = vadd.s32 18, %v5380_v27  ;;  %vm5860_vm2 = vmmov %vm5857_vm10  ;;  %vm1956_vm8 = vcmp.lt.s32.totalorder %v5405_v22, 0  ;;  %v2018_v58 = vadd.s32 18, %v5385_v9 }
 0x249   : > { %v5467_v13 = vadd.s32 18, %v5345_v39  ;;  %v2053_v17 = vsel %vm5411_vm7, %v2021_v18, %v5347_v49  ;;  %v1897_v57 = vmul.u32 18, %v1896_v51  ;;  %vm5478_vm12 = vmand %vm1954_vm6, %vm1922_vm13  ;;  %v2024_v49 = vadd.s32 18, %v5368_v46 }
 0x24a   : > { %vm5486_vm5 = vmand %vm1960_vm15, %vm1928_vm11  ;;  %v1875_v4 = vmul.u32 18, %v1874_v50  ;;  %v2049_v25 = vsel %vm5447_vm9, %v2017_v63, %v5375_v37  ;;  %v2020_v30 = vadd.s32 18, %v5405_v22  ;;  %v5498_v26 = vsub.s32 %v5333_v41, %v1886_v45 }
 0x24b   : > { %vm5867_vm7 = vmmov %vm5860_vm2  ;;  %v2051_v42 = vsel %vm5459_vm0, %v2019_v19, %v5380_v27  ;;  %v2054_v59 = vsel %vm5425_vm1, %v2022_v34, %v5370_v47  ;;  %v5515_v62 = vsub.s32 %v5336_v40, %v1864_v6  ;;  %v2050_v41 = vsel %vm5478_vm12, %v2018_v58, %v5385_v9 }
 0x24c   : > { %v2055_v36 = vsel %vm5395_vm14, %v5467_v13, %v5345_v39  ;;  %vm5524_vm15 = vcmp.lt.s32.totalorder %v2053_v17, 16  ;;  %v5529_v37 = vsub.s32 %v5339_v53, %v1897_v57  ;;  %v2056_v40 = vsel %vm5486_vm5, %v2024_v49, %v5368_v46 }
 0x24d   : > { %v5535_v47 = vsub.s32 %v5342_v3, %v1875_v4  ;;  %vm2083_vm3 = vcmp.lt.s32.totalorder %v2051_v42, 16  ;;  %vm5540_vm14 = vcmp.lt.s32.totalorder %v2054_v59, 16  ;;  %vm1931_vm1 = vcmp.ne.s32.totalorder %v5498_v26, 0 }
 0x24e   : > { %vm1963_vm13 = vcmp.lt.s32.totalorder %v5498_v26, 0  ;;  %vm2082_vm6 = vcmp.lt.s32.totalorder %v2050_v41, 16  ;;  %vm1929_vm9 = vcmp.ne.s32.totalorder %v5515_v62, 0  ;;  %v2025_v53 = vadd.s32 18, %v5515_v62 }
 0x24f   : > { %vm1932_vm0 = vcmp.ne.s32.totalorder %v5529_v37, 0  ;;  %v3124_v18 = vsel %vm2083_vm3, 1.0, %v3600_v52  ;;  %vm5557_vm12 = vmand %vm1963_vm13, %vm1931_vm1  ;;  %vm1930_vm5 = vcmp.ne.s32.totalorder %v5535_v47, 0  ;;  %v3123_v10 = vsel %vm2082_vm6, 1.0, %v3600_v52 }
 0x250   : > { %v2027_v51 = vadd.s32 18, %v5498_v26  ;;  %v2028_v50 = vadd.s32 18, %v5529_v37  ;;  %vm5882_vm3 = vcmask 60416   ;;  %vm5599_vm6 = vcmp.lt.s32.totalorder %v2055_v36, 16 }
 0x251   : > { %vm5885_vm13 = vmmov %vm5882_vm3  ;;  %v3126_v17 = vsel %vm5524_vm15, 1.0, %v3600_v52  ;;  %v3128_v36 = vsel %vm5599_vm6, 1.0, %v3600_v52 }
 0x252   : > { %v2181_v16 = vmul.f32 %v3126_v17, %v5255_v32 }
 0x254   : > { %v2253_v61 = vmul.f32 %v2181_v16, %v5255_v32 }
 0x269   : > { %v5399_v38 = vpop.f32.mrb[4].mxu1 }
 0x26a   : > { %v3227_v31 = vpack.c.bf16 %v5399_v38, %v5399_v38  ;;  %v5417_v28 = vpop.f32.mrb[5].mxu1 }
 0x26b   : > { %v3225_v54 = vpack.c.bf16 %v5417_v28, %v5417_v28  ;;  %v5431_v56 = vpop.f32.mrb[6].mxu1 }
 0x26c   : > { %2459 = vst.msk [vmem:[%s4945_s11 + $0x78] sm:$0xf] %vm5857_vm10, %v3227_v31  ;;  %v3228_v48 = vpack.c.bf16 %v5431_v56, %v5431_v56  ;;  %v5440_v5 = vpop.f32.mrb[7].mxu1  ;;  %vm1924_vm10 = vcmp.ne.s32.totalorder %v5405_v22, 0 }
 0x26d   : > { %2457 = vst.msk [vmem:[%s4945_s11 + $0x70] sm:$0xf] %vm5860_vm2, %v3225_v54  ;;  %v3226_v2 = vpack.c.bf16 %v5440_v5, %v5440_v5  ;;  %vm5507_vm11 = vmand %vm1956_vm8, %vm1924_vm10  ;;  %vm1961_vm2 = vcmp.lt.s32.totalorder %v5515_v62, 0  ;;  %vm1964_vm10 = vcmp.lt.s32.totalorder %v5529_v37, 0  ;;  %v2026_v54 = vadd.s32 18, %v5535_v47 }
 0x26e   : > { %2461 = vst.msk [vmem:[%s4945_s11 + $0x7c] sm:$0x3] %vm2460_vm4, %v3228_v48  ;;  %vm2081_vm4 = vcmp.lt.s32.totalorder %v2049_v25, 16  ;;  %v2052_v39 = vsel %vm5507_vm11, %v2020_v30, %v5405_v22  ;;  %vm5569_vm11 = vmand %vm1961_vm2, %vm1929_vm9  ;;  %vm5606_vm9 = vcmp.lt.s32.totalorder %v2056_v40, 16  ;;  %v3127_v25 = vsel %vm5540_vm14, 1.0, %v3600_v52 }
 0x26f   : > { %2458 = vst.msk [vmem:[%s4945_s11 + $0x74] sm:$0xf] %vm5867_vm7, %v3226_v2  ;;  %v3122_v3 = vsel %vm2081_vm4, 1.0, %v3600_v52  ;;  %vm5553_vm8 = vcmp.lt.s32.totalorder %v2052_v39, 16  ;;  %vm1962_vm7 = vcmp.lt.s32.totalorder %v5535_v47, 0  ;;  %vm5578_vm4 = vmand %vm1964_vm10, %vm1932_vm0  ;;  %v2059_v30 = vsel %vm5557_vm12, %v2027_v51, %v5498_v26 }
 0x270   : > { %v3125_v45 = vsel %vm5553_vm8, 1.0, %v3600_v52  ;;  %vm5592_vm1 = vmand %vm1962_vm7, %vm1930_vm5  ;;  %v2060_v42 = vsel %vm5578_vm4, %v2028_v50, %v5529_v37  ;;  %v2182_v26 = vmul.f32 %v3127_v25, %v5265_v14  ;;  %v3129_v37 = vsel %vm5606_vm9, 1.0, %v3600_v52 }
 0x271   : > { %vm5890_vm2 = vmmov %vm5882_vm3  ;;  %vm2091_vm14 = vcmp.lt.s32.totalorder %v2059_v30, 16  ;;  %vm2092_vm10 = vcmp.lt.s32.totalorder %v2060_v42, 16  ;;  %vm2219_vm12 = vcmask 1043456   ;;  %vm2894_vm5 = vcmask 60418  }
 0x272   : > { %vm5891_vm0 = vmmov %vm5890_vm2  ;;  %v2254_v27 = vmul.f32 %v2182_v26, %v5265_v14  ;;  %vm2874_vm7 = vcmask 1045508   ;;  %vm5899_vm9 = vcmask 1040384  }
 0x273   : > { %vm5898_vm6 = vmmov %vm5891_vm0 }
 0x276   : > { %v3287_v46 = vpop.f32.mrb[20].mxu0 }
 0x277   : > { %v3219_v34 = vpack.c.bf16 %v3287_v46, %v3287_v46  ;;  %v1469_v33 = vpop.f32.mrb[21].mxu0  ;;  %v2179_v63 = vmul.f32 %v3287_v46, %v3124_v18  ;;  %v2184_v18 = vmul.f32 %v5259_v44, %v3129_v37 }
 0x278   : > { %v2177_v22 = vmul.f32 %v3122_v3, %v1469_v33  ;;  %v3217_v12 = vpack.c.bf16 %v1469_v33, %v1469_v33  ;;  %v3288_v31 = vpop.f32.mrb[22].mxu0 }
 0x279   : > { %2451 = vst.msk [vmem:[%s4945_s11 + $0x58] sm:$0xf] %vm5882_vm3, %v3219_v34  ;;  %v3220_v6 = vpack.c.bf16 %v3288_v31, %v3288_v31  ;;  %v1472_v48 = vpop.f32.mrb[23].mxu0  ;;  %v2180_v43 = vmul.f32 %v3288_v31, %v3125_v45  ;;  %v2251_v59 = vmul.f32 %v3287_v46, %v2179_v63  ;;  %vm5895_vm3 = vmmov %vm5891_vm0 }
 0x27a   : > { %v2208_v7 = vadd.f32 %v5289_v11, %v2177_v22  ;;  %v2249_v2 = vmul.f32 %v2177_v22, %v1469_v33  ;;  %2449 = vst.msk [vmem:[%s4945_s11 + $0x50] sm:$0xf] %vm5885_vm13, %v3217_v12  ;;  %v2178_v55 = vmul.f32 %v3123_v10, %v1472_v48  ;;  %v3218_v58 = vpack.c.bf16 %v1472_v48, %v1472_v48  ;;  %vm5897_vm13 = vmmov %vm5891_vm0 }
 0x27b   : > { %v2057_v11 = vsel %vm5569_vm11, %v2025_v53, %v5515_v62  ;;  %2452 = vst.msk [vmem:[%s4945_s11 + $0x5c] sm:$0xf] %vm5890_vm2, %v3220_v6  ;;  %v2252_v0 = vmul.f32 %v3288_v31, %v2180_v43  ;;  %v3132_v33 = vsel %vm2091_vm14, 1.0, %v3600_v52  ;;  %v3133_v10 = vsel %vm2092_vm10, 1.0, %v3600_v52 }
 0x27c   : > { %v2280_v8 = vadd.f32 %v5291_v21, %v2249_v2  ;;  %v2209_v49 = vadd.f32 %v2208_v7, %v2178_v55  ;;  %v2250_v4 = vmul.f32 %v2178_v55, %v1472_v48  ;;  %2450 = vst.msk [vmem:[%s4945_s11 + $0x54] sm:$0xf] %vm5891_vm0, %v3218_v58  ;;  %v2058_v21 = vsel %vm5592_vm1, %v2026_v54, %v5535_v47  ;;  %vm5896_vm1 = vmmov %vm5891_vm0 }
 0x27d   : > { %vm2089_vm15 = vcmp.lt.s32.totalorder %v2057_v11, 16  ;;  %vm2090_vm8 = vcmp.lt.s32.totalorder %v2058_v21, 16  ;;  %v2183_v47 = vmul.f32 %v5251_v29, %v3128_v36  ;;  %v2256_v12 = vmul.f32 %v5259_v44, %v2184_v18 }
 0x27e   : > { %v2210_v62 = vadd.f32 %v2209_v49, %v2179_v63  ;;  %v2281_v41 = vadd.f32 %v2280_v8, %v2250_v4  ;;  %v3130_v46 = vsel %vm2089_vm15, 1.0, %v3600_v52  ;;  %v3131_v51 = vsel %vm2090_vm8, 1.0, %v3600_v52 }
 0x27f   : > { %v2255_v15 = vmul.f32 %v5251_v29, %v2183_v47  ;;  %v2185_v32 = vmul.f32 %v3130_v46, %v5417_v28  ;;  %v2186_v31 = vmul.f32 %v3131_v51, %v5440_v5  ;;  %v2187_v54 = vmul.f32 %v5399_v38, %v3132_v33 }
 0x280   : > { %v2211_v40 = vadd.f32 %v2210_v62, %v2180_v43  ;;  %v2282_v39 = vadd.f32 %v2281_v41, %v2251_v59  ;;  %v2188_v63 = vmul.f32 %v5431_v56, %v3133_v10  ;;  %vm5892_vm11 = vcmask 1041408  }
 0x281   : > { %v2257_v6 = vmul.f32 %v2185_v32, %v5417_v28  ;;  %v2258_v2 = vmul.f32 %v2186_v31, %v5440_v5  ;;  %v2259_v57 = vmul.f32 %v5399_v38, %v2187_v54  ;;  %vm5661_vm4 = vmor %vm5892_vm11, %vm2874_vm7 }
 0x282   : > { %v2212_v53 = vadd.f32 %v2211_v40, %v2181_v16  ;;  %v2283_v3 = vadd.f32 %v2282_v39, %v2252_v0  ;;  %v2260_v28 = vmul.f32 %v5431_v56, %v2188_v63 }
 0x284   : > { %v2213_v9 = vadd.f32 %v2212_v53, %v2182_v26  ;;  %v2284_v34 = vadd.f32 %v2283_v3, %v2253_v61 }
 0x286   : > { %v2214_v50 = vadd.f32 %v2213_v9, %v2183_v47  ;;  %v2285_v22 = vadd.f32 %v2284_v34, %v2254_v27 }
 0x288   : > { %v2215_v24 = vadd.f32 %v2214_v50, %v2184_v18  ;;  %v2286_v14 = vadd.f32 %v2285_v22, %v2255_v15 }
 0x289   : > { %v2802_v45 = vpop.f32.mrb[8].mxu1 }
 0x28a   : > { %v2216_v52 = vadd.f32 %v2215_v24, %v2185_v32  ;;  %v2287_v48 = vadd.f32 %v2286_v14, %v2256_v12  ;;  %v3229_v29 = vpack.c.bf16 %v2802_v45, %v2802_v45  ;;  %v3305_v19 = vpop.f32.mrb[9].mxu1  ;;  %v2824_v7 = vmul.f32 %v4935_v20, %v2802_v45 }
 0x28b   : > { %v2805_v44 = vpop.f32.mrb[10].mxu1  ;;  %v2220_v20 = vsel %vm2219_vm12, %v2188_v63, 0.0 }
 0x28c   : > { %v2217_v55 = vadd.f32 %v2216_v52, %v2186_v31  ;;  %v2288_v58 = vadd.f32 %v2287_v48, %v2257_v6  ;;  %v2876_v13 = vrot.slane %v3229_v29, 6  ;;  %v3306_v17 = vpop.f32.mrb[11].mxu1  ;;  %v2825_v11 = vmul.f32 %v4950_v35, %v2805_v44 }
 0x28d   : > { %v3230_v8 = vpack.c.bf16 %v2805_v44, %v2805_v44  ;;  %v2841_v25 = vmul.f32 %v2824_v7, %v2802_v45  ;;  %v2291_v35 = vsel %vm2219_vm12, %v2260_v28, 0.0 }
 0x28e   : > { %v2289_v43 = vadd.f32 %v2288_v58, %v2258_v2  ;;  %v2877_v49 = vrot.slane %v2876_v13, 4  ;;  %2895 = vst.msk [vmem:[%s4945_s11 + $0x7c] sm:$0xc] %vm2894_vm5, %v2876_v13  ;;  %v2218_v4 = vadd.f32 %v2217_v55, %v2187_v54  ;;  %v2829_v30 = vadd.f32 %v2825_v11, %v2824_v7 }
 0x28f   : > { %v2842_v38 = vmul.f32 %v2825_v11, %v2805_v44  ;;  %v2878_v42 = vrot.slane %v3230_v8, 6 }
 0x290   : > { %v2221_v56 = vadd.f32 %v2220_v20, %v2218_v4  ;;  %v2290_v21 = vadd.f32 %v2289_v43, %v2259_v57 }
 0x291   : > { %v2846_v16 = vadd.f32 %v2842_v38, %v2841_v25  ;;  %v2879_v59 = vsel %vm5661_vm4, %v2877_v49, %v2878_v42  ;;  %v2880_v40 = vrot.slane %v2878_v42, 4 }
 0x292   : > { %2896 = vst.msk [vmem:[%s4945_s11 + $0x80] sm:$0xf] %vm5895_vm3, %v2879_v59  ;;  %v2292_v62 = vadd.f32 %v2291_v35, %v2290_v21  ;;  %v2222_v18 = vrot.slane %v2221_v56, 4 }
 0x294   : > { %v2293_v51 = vrot.slane %v2292_v62, 4  ;;  %v2223_v50 = vadd.f32 %v2222_v18, %v2221_v56 }
 0x296   : > { %v2294_v14 = vadd.f32 %v2293_v51, %v2292_v62  ;;  %v2224_v29 = vrot.slane %v2223_v50, 2 }
 0x298   : > { %v2295_v2 = vrot.slane %v2294_v14, 2  ;;  %v2225_v13 = vadd.f32 %v2224_v29, %v2223_v50 }
 0x299   : > { %v2810_v41 = vpop.f32.mrb[12].mxu1 }
 0x29a   : > { %v2826_v36 = vmul.f32 %v4931_v1, %v2810_v41  ;;  %v3231_v26 = vpack.c.bf16 %v2810_v41, %v2810_v41  ;;  %v3309_v0 = vpop.f32.mrb[13].mxu1  ;;  %v2296_v28 = vadd.f32 %v2295_v2, %v2294_v14  ;;  %v2226_v20 = vrot.slane %v2225_v13, 1 }
 0x29b   : > { %v2813_v39 = vpop.f32.mrb[14].mxu1 }
 0x29c   : > { %v2830_v37 = vadd.f32 %v2829_v30, %v2826_v36  ;;  %v2843_v47 = vmul.f32 %v2826_v36, %v2810_v41  ;;  %v2881_v61 = vrot.slane %v3231_v26, 6  ;;  %v2827_v53 = vmul.f32 %v4962_v23, %v2813_v39  ;;  %v3310_v3 = vpop.f32.mrb[15].mxu1 }
 0x29d   : > { %v3232_v46 = vpack.c.bf16 %v2813_v39, %v2813_v39  ;;  %v2297_v5 = vrot.slane %v2296_v28, 1  ;;  %v2227_v25 = vadd.f32 %v2226_v20, %v2225_v13 }
 0x29e   : > { %v2847_v27 = vadd.f32 %v2846_v16, %v2843_v47  ;;  %v2882_v9 = vsel %vm5661_vm4, %v2880_v40, %v2881_v61  ;;  %v2883_v34 = vrot.slane %v2881_v61, 4  ;;  %v2831_v1 = vadd.f32 %v2830_v37, %v2827_v53 }
 0x29f   : > { %2897 = vst.msk [vmem:[%s4945_s11 + $0x84] sm:$0xf] %vm5896_vm1, %v2882_v9  ;;  %v2844_v33 = vmul.f32 %v2827_v53, %v2813_v39  ;;  %v2884_v10 = vrot.slane %v3232_v46, 6  ;;  %v2298_v38 = vadd.f32 %v2297_v5, %v2296_v28 }
 0x2a1   : > { %v2848_v15 = vadd.f32 %v2847_v27, %v2844_v33  ;;  %v2885_v32 = vsel %vm5661_vm4, %v2883_v34, %v2884_v10  ;;  %v2818_v23 = vpop.f32.mrb[16].mxu1  ;;  %v2886_v54 = vrot.slane %v2884_v10, 4 }
 0x2a2   : > { %2898 = vst.msk [vmem:[%s4945_s11 + $0x88] sm:$0xf] %vm5897_vm13, %v2885_v32  ;;  %v2828_v22 = vmul.f32 %v5088_v60, %v2818_v23  ;;  %v3233_v12 = vpack.c.bf16 %v2818_v23, %v2818_v23  ;;  %v3313_v31 = vpop.f32.mrb[17].mxu1 }
 0x2a3   : > { %v2821_v24 = vpop.f32.mrb[18].mxu1 }
 0x2a4   : > { %v2832_v63 = vsel %vm2219_vm12, %v2828_v22, 0.0  ;;  %v2845_v45 = vmul.f32 %v2828_v22, %v2818_v23  ;;  %v2887_v6 = vrot.slane %v3233_v12, 6  ;;  %v3314_v52 = vpop.f32.mrb[19].mxu1 }
 0x2a5   : > { %v2833_v48 = vadd.f32 %v2832_v63, %v2831_v1 }
 0x2a6   : > { %v2849_v19 = vsel %vm2219_vm12, %v2845_v45, 0.0  ;;  %v2888_v7 = vsel %vm5661_vm4, %v2886_v54, %v2887_v6 }
 0x2a7   : > { %v2834_v60 = vrot.slane %v2833_v48, 4  ;;  %v2850_v44 = vadd.f32 %v2849_v19, %v2848_v15  ;;  %2899 = vst.msk [vmem:[%s4945_s11 + $0x8c] sm:$0xf] %vm5898_vm6, %v2888_v7 }
 0x2a9   : > { %v2835_v55 = vadd.f32 %v2834_v60, %v2833_v48  ;;  %v2851_v58 = vrot.slane %v2850_v44, 4 }
 0x2ab   : > { %v2836_v17 = vrot.slane %v2835_v55, 2  ;;  %v2852_v57 = vadd.f32 %v2851_v58, %v2850_v44 }
 0x2ad   : > { %v2837_v11 = vadd.f32 %v2836_v17, %v2835_v55  ;;  %v2853_v8 = vrot.slane %v2852_v57, 2 }
 0x2af   : > { %v2838_v43 = vrot.slane %v2837_v11, 1  ;;  %v2854_v49 = vadd.f32 %v2853_v8, %v2852_v57 }
 0x2b1   : > { %v2855_v4 = vrot.slane %v2854_v49, 1  ;;  %v2839_v30 = vadd.f32 %v2838_v43, %v2837_v11 }
 0x2b3   : > { %v2840_v42 = vadd.f32 %v2839_v30, %v2227_v25  ;;  %v2856_v56 = vadd.f32 %v2855_v4, %v2854_v49 }
 0x2b5   : > { %v2857_v21 = vadd.f32 %v2856_v56, %v2298_v38 }
 0x2b7   : > { %v2901_v35 = vsel %vm5899_vm9, %v2840_v42, %v2857_v21 }
 0x2b8   : > { %2902 = vst [vmem:[%s201_s21] sm:$0x3] %v2901_v35 }
 0x2b9   : > { %3525 = shalt.err (!%p3522_p5)
}
 0x2ba   : > { %s3526_s8 = scalar_lea.hbm %s5692_s29, 32  ;;  %s3530_s10 = scalar_lea.hbm %s5743_s3, 64 }
 0x2bb   : > { %p3527_p6 = scmp.ne.s32.totalorder %s5692_s29, %s3526_s8  ;;  %p3531_p10 = scmp.lt.u32.totalorder %s5692_s29, %s5743_s3 }
 0x2bc   : > { %p3532_p11 = scmp.lt.u32.totalorder %s3530_s10, %s3526_s8  ;;  %p3534_p13 = scmp.lt.u32.totalorder %s3526_s8, %s5692_s29 }
 0x2bd   : > { %p3528_p7 = pnand %p3527_p6, %p3663_p4 }
 0x2be   : > { %p3533_p12 = por %p3532_p11, %p3531_p10 }
 0x2bf   : > { %p3529_p9 = pneg %p3528_p7 }
 0x2c0   : > { %p3535_p0 = por %p3534_p13, %p3533_p12 }
 0x2c2   : > { %p3536_p1 = pnand %p3535_p0, %p3529_p9 }
 0x2c4   : > { %3539 = shalt.err (!%p3536_p1)
}
 0x2c5   : > { %3389 = dma.vmem_to_hbm [thread:$0]  (%p3663_p4), %s5694_s23, 32, %s5692_s29, %s2913_s4  }
 0x2c6 PF: > { %p3395_p2 = scmp.ge.s32.totalorder %s3590_s17, 2  ;;  %s2954_s18 = sand.u32 1, %s3570_s12  }
 0x2c7   : > { %s2955_s19 = scalar_lea.sflag [#allocation3], %s2954_s18 }
 0x2c8   : > { %p3392_p3 = pnand %p3395_p2, %p3670_p8 }
 0x2ca   : > { %3565 = dma.done.wait (!%p3392_p3), %s2955_s19, 32  }
 0x2cb   : > { %3567 = vsyncadd (!%p3392_p3), %s2955_s19, 4294967264  ;;  %s17_s17 = sadd.s32 1, %s3590_s17   ;;  %s5900_s12 = smov %s3574_s13 }
 0x2cc   : > { %p14_p5 = scmp.ge.s32.totalorder %s17_s17, 4   ;;  %s5901_s13 = smov %s3578_s14 }
 0x2cd   : > { %s5902_s14 = smov %s3676_s25  ;;  %s5903_s15 = smov %s3586_s16 }
 0x2ce   : > { %s5904_s16 = smov %s5906_s20  ;;  %16 = sbr.rel (!%p14_p5) target bundleno = 4 (0x4), region = 75 }
 0x2d5   :  { %2960 = vsyncpa [#allocation3], 1 }
 0x2d6   :  { %2962 = vsyncpa [#allocation3 + $0x1], 1 }

</bundles_post_ra>
